<compile_context>
chip_gen: v7x
topology: tpu7x:2x2x1
jax: 0.10.0
libtpu: 0.0.40
codegen_flags: <defaults>
</compile_context>

<pallas_src>
import functools

import jax
import jax.numpy as jnp
from jax.experimental import pallas as pl
from jax.experimental.pallas import tpu as pltpu


def _round_up(x, m):
    return ((x + m - 1) // m) * m


def _pick_tile(dim, cap, granule):
    """Largest tile <= cap that divides dim and is a multiple of granule.
    `dim` is always a multiple of `granule` (padded upstream)."""
    if dim <= cap:
        return dim
    best = granule
    t = granule
    while t <= cap:
        if dim % t == 0:
            best = t
        t += granule
    return best


# ----------------------------------------------------------------------------
# Kernel 1: tiled matmul + bias (the output/logits Linear).
#   x: (M, K) bf16, w: (K, N) bf16, b: (N,) f32 -> (M, N) out_dtype
#   Bias is loaded into the f32 accumulator at k == 0 (no epilogue add).
# ----------------------------------------------------------------------------
def _matmul_bias_kernel(x_ref, w_ref, b_ref, o_ref, acc_ref):
    k = pl.program_id(2)

    @pl.when(k == 0)
    def _():
        acc_ref[...] = jnp.broadcast_to(b_ref[...], acc_ref.shape)

    acc_ref[...] += jnp.dot(x_ref[...], w_ref[...],
                            preferred_element_type=jnp.float32)

    @pl.when(k == pl.num_programs(2) - 1)
    def _():
        o_ref[...] = acc_ref[...].astype(o_ref.dtype)


def matmul_bias(x, w, b, *, out_dtype=jnp.float32,
                tm_cap=256, tn_cap=1024, tk_cap=1024):
    """M must be a multiple of 16; K, N multiples of 128 (padded upstream)."""
    M, K = x.shape
    K2, N = w.shape
    assert K == K2
    tm = _pick_tile(M, tm_cap, 16)   # bf16 second-minor granule
    tn = _pick_tile(N, tn_cap, 128)
    tk = _pick_tile(K, tk_cap, 128)
    grid = (M // tm, N // tn, K // tk)

    out_isize = jnp.dtype(out_dtype).itemsize
    flops = 2 * M * N * K
    bytes_accessed = (M * K * x.dtype.itemsize + K * N * w.dtype.itemsize
                      + M * N * out_isize + N * 4)

    return pl.pallas_call(
        _matmul_bias_kernel,
        out_shape=jax.ShapeDtypeStruct((M, N), out_dtype),
        grid_spec=pltpu.PrefetchScalarGridSpec(
            num_scalar_prefetch=0,
            grid=grid,
            in_specs=[
                pl.BlockSpec((tm, tk), lambda i, j, k: (i, k)),
                pl.BlockSpec((tk, tn), lambda i, j, k: (k, j)),
                pl.BlockSpec((1, tn), lambda i, j, k: (0, j)),
            ],
            out_specs=pl.BlockSpec((tm, tn), lambda i, j, k: (i, j)),
            scratch_shapes=[pltpu.VMEM((tm, tn), jnp.float32)],
        ),
        compiler_params=pltpu.CompilerParams(
            dimension_semantics=("parallel", "parallel", "arbitrary"),
            # Generation-safe budget (v7x has 64 MiB physical VMEM).
            vmem_limit_bytes=48 * 1024 * 1024,
        ),
        cost_estimate=pl.CostEstimate(
            flops=flops, transcendentals=0, bytes_accessed=bytes_accessed),
    )(x, w, b.reshape(1, N))


# ----------------------------------------------------------------------------
# Kernel 2: fused input-projection + LSTM recurrence, blocked over time.
#   grid = (batch_tiles ["parallel"], time_blocks ["arbitrary"])
#   Per grid step: one wide (TK*bt, Ep) x (Ep, 4Hp) bf16 matmul fills a VMEM
#   gate scratch (bias folded in), then TK fully-unrolled recurrent steps use
#   a bf16 (bt, Hp) x (Hp, 4Hp) matmul with f32 accumulation. h/c state live
#   in VMEM scratch; h is stored bf16 (the only consumer is bf16), c stays f32.
#   Gate order inside the 4H axis is (i, f, o, g)  [reordered at param prep],
#   so one wide sigmoid covers the 3H slab.
# ----------------------------------------------------------------------------
def _lstm_fused_kernel(emb_ref, wih_ref, whh_ref, b_ref, hseq_ref,
                       xg_sc, h_sc, c_sc):
    @pl.when(pl.program_id(1) == 0)   # new batch tile -> reset recurrent state
    def _():
        h_sc[...] = jnp.zeros_like(h_sc)
        c_sc[...] = jnp.zeros_like(c_sc)

    TK, bt, Ep = emb_ref.shape
    Hp = h_sc.shape[-1]

    # Fused input projection for all TK timesteps of this batch tile.
    xg_sc[...] = (
        jnp.dot(emb_ref[...].reshape(TK * bt, Ep), wih_ref[...],
                preferred_element_type=jnp.float32)
        + b_ref[...])

    # TK is a small compile-time constant -> fully unrolled (LLO-visible).
    # TODO(synk): if bundle dumps show spills at large batch_tile, switch to
    # lax.fori_loop with partial unroll to bound live ranges.
    for k in range(TK):
        z = xg_sc[pl.ds(k * bt, bt), :] + jnp.dot(
            h_sc[...], whh_ref[...], preferred_element_type=jnp.float32)
        sig = jax.nn.sigmoid(z[:, : 3 * Hp])   # one wide sigmoid over (i, f, o)
        i_g = sig[:, 0 * Hp:1 * Hp]
        f_g = sig[:, 1 * Hp:2 * Hp]
        o_g = sig[:, 2 * Hp:3 * Hp]
        g_g = jnp.tanh(z[:, 3 * Hp:])
        c_new = f_g * c_sc[...] + i_g * g_g
        h_new = (o_g * jnp.tanh(c_new)).astype(hseq_ref.dtype)
        c_sc[...] = c_new
        h_sc[...] = h_new
        hseq_ref[k] = h_new


def _choose_lstm_tiles(Bp, Ep, Hp, *, budget_bytes=40 << 20):
    """Pick (time_block, batch_tile) so the fused-LSTM VMEM working set
    (double-buffered IO + resident weights + gate scratch + state) fits a
    v7x-safe budget."""
    H4 = 4 * Hp

    def est(tb, bt):
        return (2 * tb * bt * Ep * 2        # emb blocks (bf16, double-buffered)
                + 2 * Ep * H4 * 2           # w_ih (bf16)
                + 2 * Hp * H4 * 2           # w_hh (bf16)
                + 2 * tb * bt * Hp * 2      # h_seq out blocks (bf16)
                + tb * bt * H4 * 4          # gate pre-activation scratch (f32)
                + bt * Hp * 6)              # h (bf16) + c (f32) state

    # Keep >= 2 batch tiles when possible so v7x's second TensorCore has work.
    bt_cap = 256 if Bp < 16 else min(256, Bp // 2)
    for tb in (16, 8):
        cap = bt_cap
        while True:
            bt = _pick_tile(Bp, cap, 8)
            if est(tb, bt) <= budget_bytes:
                return tb, bt
            if bt <= 8:
                break
            cap = max(8, bt // 2)
    return 8, 8


def lstm_fused(emb, w_ih_t, w_hh_t, b_gates, *, time_block, batch_tile):
    """emb: (Tp, Bp, Ep) bf16, w_ih_t: (Ep, 4Hp) bf16, w_hh_t: (Hp, 4Hp) bf16,
    b_gates: (4Hp,) f32  ->  (Tp, Bp, Hp) bf16."""
    Tp, Bp, Ep = emb.shape
    Hp, H4 = w_hh_t.shape
    assert Tp % time_block == 0 and Bp % batch_tile == 0
    grid = (Bp // batch_tile, Tp // time_block)

    flops = 2 * Tp * Bp * H4 * (Ep + Hp) + 10 * Tp * Bp * Hp
    transcendentals = 5 * Tp * Bp * Hp
    bytes_accessed = (Tp * Bp * Ep * 2 + Ep * H4 * 2 + Hp * H4 * 2
                      + H4 * 4 + Tp * Bp * Hp * 2)

    return pl.pallas_call(
        _lstm_fused_kernel,
        out_shape=jax.ShapeDtypeStruct((Tp, Bp, Hp), jnp.bfloat16),
        grid_spec=pltpu.PrefetchScalarGridSpec(
            num_scalar_prefetch=0,
            grid=grid,
            in_specs=[
                pl.BlockSpec((time_block, batch_tile, Ep),
                             lambda b, t: (t, b, 0)),
                # Invariant weights: same block each step, stay VMEM-resident.
                pl.BlockSpec((Ep, H4), lambda b, t: (0, 0)),
                pl.BlockSpec((Hp, H4), lambda b, t: (0, 0)),
                pl.BlockSpec((1, H4), lambda b, t: (0, 0)),
            ],
            out_specs=pl.BlockSpec((time_block, batch_tile, Hp),
                                   lambda b, t: (t, b, 0)),
            scratch_shapes=[
                pltpu.VMEM((time_block * batch_tile, H4), jnp.float32),  # gates
                pltpu.VMEM((batch_tile, Hp), jnp.bfloat16),              # h_t
                pltpu.VMEM((batch_tile, Hp), jnp.float32),               # c_t
            ],
        ),
        compiler_params=pltpu.CompilerParams(
            # batch tiles are independent (megacore-shardable on v7x);
            # time is a true recurrence and must stay sequential.
            dimension_semantics=("parallel", "arbitrary"),
            vmem_limit_bytes=48 * 1024 * 1024,
        ),
        cost_estimate=pl.CostEstimate(
            flops=flops, transcendentals=transcendentals,
            bytes_accessed=bytes_accessed),
    )(emb, w_ih_t, w_hh_t, b_gates.reshape(1, H4))


# ----------------------------------------------------------------------------
# Parameter preparation: (8,128) padding, gate reorder (i,f,g,o)->(i,f,o,g),
# bf16 cast of all weight matrices (biases stay f32).
# ----------------------------------------------------------------------------
def prepare_params(params):
    emb = params["emb"]            # (V, E)
    w_ih_t = params["w_ih_t"]      # (E, 4H)
    w_hh_t = params["w_hh_t"]      # (H, 4H)
    b_gates = params["b_gates"]    # (4H,)
    w_out_t = params["w_out_t"]    # (H, V)
    b_out = params["b_out"]        # (V,)

    V, E = emb.shape
    H = w_hh_t.shape[0]
    Ep, Hp, Vp = _round_up(E, 128), _round_up(H, 128), _round_up(V, 128)

    src_order = {"i": 0, "f": 1, "g": 2, "o": 3}   # PyTorch nn.LSTM order
    dst_order = {"i": 0, "f": 1, "o": 2, "g": 3}   # kernel order

    def reorder_pad_cols(a, rows_p):
        rows = a.shape[0]
        out = jnp.zeros((rows_p, 4 * Hp), jnp.float32)
        for g in ("i", "f", "g", "o"):
            blk = a[:, src_order[g] * H:(src_order[g] + 1) * H]
            out = out.at[:rows, dst_order[g] * Hp:dst_order[g] * Hp + H].set(blk)
        return out

    def reorder_pad_vec(v):
        out = jnp.zeros((4 * Hp,), jnp.float32)
        for g in ("i", "f", "g", "o"):
            blk = v[src_order[g] * H:(src_order[g] + 1) * H]
            out = out.at[dst_order[g] * Hp:dst_order[g] * Hp + H].set(blk)
        return out

    emb_p = jnp.zeros((V, Ep), jnp.float32).at[:, :E].set(emb)
    w_out_p = jnp.zeros((Hp, Vp), jnp.float32).at[:H, :V].set(w_out_t)
    b_out_p = jnp.zeros((Vp,), jnp.float32).at[:V].set(b_out)

    return {
        "emb": emb_p.astype(jnp.bfloat16),                              # (V, Ep)  bf16
        "w_ih_t": reorder_pad_cols(w_ih_t, Ep).astype(jnp.bfloat16),    # (Ep,4Hp) bf16
        "w_hh_t": reorder_pad_cols(w_hh_t, Hp).astype(jnp.bfloat16),    # (Hp,4Hp) bf16
        "b_gates": reorder_pad_vec(b_gates),                            # (4Hp,)   f32
        "w_out_t": w_out_p.astype(jnp.bfloat16),                        # (Hp,Vp)  bf16
        "b_out": b_out_p,                                               # (Vp,)    f32
    }


# ----------------------------------------------------------------------------
# Full forward pass.
# ----------------------------------------------------------------------------
@functools.partial(jax.jit, static_argnames=("n_vocab",))
def lm_lstm_forward(tokens, pparams, *, n_vocab):
    emb_table = pparams["emb"]
    w_ih_t = pparams["w_ih_t"]
    w_hh_t = pparams["w_hh_t"]
    b_gates = pparams["b_gates"]
    w_out_t = pparams["w_out_t"]
    b_out = pparams["b_out"]

    B, T = tokens.shape
    Ep = emb_table.shape[1]
    Hp, H4 = w_hh_t.shape
    Vp = w_out_t.shape[1]

    Bp = _round_up(B, 8)
    time_block, batch_tile = _choose_lstm_tiles(Bp, Ep, Hp)
    Tp = _round_up(T, time_block)

    # Time-major token layout up front so the hidden sequence is produced
    # directly in (T, B, feat): no big activation transpose.
    tok_tb = jnp.zeros((Tp, Bp), jnp.int32).at[:T, :B].set(tokens.T)

    # Embedding lookup (padding_idx row 0 is zero); bf16 table -> bf16 gather.
    # TODO(synk): the gather itself stays in XLA (data-dependent row gather).
    emb = jnp.take(emb_table, tok_tb, axis=0)                  # (Tp, Bp, Ep) bf16
    # emb_dropout / output_dropout: identity (eval-mode semantics).

    # Fused input projection + recurrence -> (Tp, Bp, Hp) bf16.
    h_seq = lstm_fused(emb, w_ih_t, w_hh_t, b_gates,
                       time_block=time_block, batch_tile=batch_tile)

    h_flat = h_seq.reshape(Tp * Bp, Hp)                        # free reshape, bf16
    logits = matmul_bias(h_flat, w_out_t, b_out,
                         out_dtype=jnp.bfloat16)               # (Tp*Bp, Vp) bf16
    logits = logits.reshape(Tp, Bp, Vp)

    # Crop + permute in bf16 (largest tensor), cast to f32 at the very end to
    # keep the module's float32 output dtype. XLA fuses the cast into the
    # transpose write.
    out = logits[:T, :B, :n_vocab].transpose(1, 2, 0)          # (B, V, T) bf16
    return out.astype(jnp.float32)


# ----------------------------------------------------------------------------
# Pure-JAX reference (mirrors PyTorch nn.LSTM math; recurrent matmul at
# HIGHEST f32 precision, feed-forward matmuls in bf16 like the kernels).
# ----------------------------------------------------------------------------
def reference_forward(tokens, params):
    bf16 = jnp.bfloat16
    emb = jnp.take(params["emb"], tokens, axis=0)              # (B, T, E)
    B, T, E = emb.shape
    H = params["w_hh_t"].shape[0]

    x_gates = jnp.dot(emb.astype(bf16), params["w_ih_t"].astype(bf16),
                      preferred_element_type=jnp.float32) + params["b_gates"]

    def step(carry, z_x):
        h, c = carry
        z = z_x + jnp.dot(h, params["w_hh_t"],
                          preferred_element_type=jnp.float32,
                          precision=jax.lax.Precision.HIGHEST)
        i = jax.nn.sigmoid(z[:, 0 * H:1 * H])
        f = jax.nn.sigmoid(z[:, 1 * H:2 * H])
        g = jnp.tanh(z[:, 2 * H:3 * H])
        o = jax.nn.sigmoid(z[:, 3 * H:4 * H])
        c = f * c + i * g
        h = o * jnp.tanh(c)
        return (h, c), h

    h0 = jnp.zeros((B, H), jnp.float32)
    (_, _), h_seq = jax.lax.scan(step, (h0, h0), x_gates.transpose(1, 0, 2))
    h_seq = h_seq.transpose(1, 0, 2)                           # (B, T, H)
    logits = jnp.dot(h_seq.astype(bf16), params["w_out_t"].astype(bf16),
                     preferred_element_type=jnp.float32) + params["b_out"]
    return logits.transpose(0, 2, 1)                           # (B, V, T)


# ----------------------------------------------------------------------------
# Deterministic parameter init + driver.
# ----------------------------------------------------------------------------
def init_params(key, vocab, emb_size, hidden_size):
    ks = jax.random.split(key, 6)
    H = hidden_size
    bound = 1.0 / jnp.sqrt(H)
    emb = jax.random.normal(ks[0], (vocab, emb_size), jnp.float32)
    emb = emb.at[0].set(0.0)  # padding_idx = 0
    w_ih_t = jax.random.uniform(ks[1], (emb_size, 4 * H), jnp.float32, -bound, bound)
    w_hh_t = jax.random.uniform(ks[2], (H, 4 * H), jnp.float32, -bound, bound)
    b_ih = jax.random.uniform(ks[3], (4 * H,), jnp.float32, -bound, bound)
    b_hh = jax.random.uniform(ks[4], (4 * H,), jnp.float32, -bound, bound)
    w_out_t = jax.random.uniform(ks[5], (H, vocab), jnp.float32, -bound, bound)
    b_out = jnp.zeros((vocab,), jnp.float32)
    return {
        "emb": emb,
        "w_ih_t": w_ih_t,
        "w_hh_t": w_hh_t,
        "b_gates": b_ih + b_hh,
        "w_out_t": w_out_t,
        "b_out": b_out,
    }


if __name__ == "__main__":
    B, T = 2, 8
    emb_size, hidden_size, output_size = 16, 32, 20

    key = jax.random.PRNGKey(0)
    k_tok, k_param = jax.random.split(key)
    params = init_params(k_param, output_size, emb_size, hidden_size)
    tokens = jax.random.randint(k_tok, (B, T), 0, output_size, dtype=jnp.int32)

    pparams = prepare_params(params)
    out = lm_lstm_forward(tokens, pparams, n_vocab=output_size)
    out = jax.block_until_ready(out)

    ref = reference_forward(tokens, params)
    assert out.shape == (B, output_size, T), out.shape
    max_err = float(jnp.max(jnp.abs(out - ref)))
    # Kernel runs the recurrence / logits in bf16 (f32 accumulation); reference
    # recurrence is f32 HIGHEST -> tolerance covers the bf16 drift.
    assert max_err < 2e-2, max_err
    print("KERNEL_OK")
</pallas_src>

<mosaic_0001>
module attributes {stable_mosaic.version = 11 : i64} {
  func.func @_matmul_bias_kernel(%arg0: i32, %arg1: i32, %arg2: i32, %arg3: memref<128x128xbf16, #tpu.memory_space<vmem>>, %arg4: memref<128x128xbf16, #tpu.memory_space<vmem>>, %arg5: memref<1x128xf32, #tpu.memory_space<vmem>>, %arg6: memref<128x128xbf16, #tpu.memory_space<vmem>>, %arg7: memref<128x128xf32, #tpu.memory_space<vmem>>) attributes {dimension_semantics = [#tpu.dimension_semantics<parallel>, #tpu.dimension_semantics<parallel>, #tpu.dimension_semantics<arbitrary>], iteration_bounds = array<i64: 1, 1, 1>, scalar_prefetch = 0 : i64, scratch_operands = 1 : i64, tpu.core_type = #tpu.core_type<tc>, window_params = [{transform_indices = @transform_0, window_bounds = array<i64: 128, 128>}, {transform_indices = @transform_1, window_bounds = array<i64: 128, 128>}, {transform_indices = @transform_2, window_bounds = array<i64: 1, 128>}, {transform_indices = @transform_3, window_bounds = array<i64: 128, 128>}]} {
    %c0_i32 = arith.constant 0 : i32
    %0 = arith.cmpi eq, %arg2, %c0_i32 : i32
    %1 = arith.extui %0 : i1 to i32
    %c0_i32_0 = arith.constant 0 : i32
    %2 = arith.cmpi ne, %1, %c0_i32_0 : i32
    scf.if %2 {
      %c0_10 = arith.constant 0 : index
      %c0_11 = arith.constant 0 : index
      %12 = vector.load %arg5[%c0_10, %c0_11] : memref<1x128xf32, #tpu.memory_space<vmem>>, vector<1x128xf32>
      %13 = vector.shape_cast %12 : vector<1x128xf32> to vector<1x128xf32>
      %14 = vector.broadcast %13 : vector<1x128xf32> to vector<128x128xf32>
      %c0_12 = arith.constant 0 : index
      %c0_13 = arith.constant 0 : index
      %15 = vector.load %arg7[%c0_12, %c0_13] : memref<128x128xf32, #tpu.memory_space<vmem>>, vector<128x128xf32>
      tpu.vector_store %arg7[%c0_12, %c0_13], %14 {strides = array<i32>} : memref<128x128xf32, #tpu.memory_space<vmem>>, vector<128x128xf32>,
    } else {
    }
    %c0 = arith.constant 0 : index
    %c0_1 = arith.constant 0 : index
    %3 = vector.load %arg7[%c0, %c0_1] : memref<128x128xf32, #tpu.memory_space<vmem>>, vector<128x128xf32>
    %c0_2 = arith.constant 0 : index
    %c0_3 = arith.constant 0 : index
    %4 = vector.load %arg3[%c0_2, %c0_3] : memref<128x128xbf16, #tpu.memory_space<vmem>>, vector<128x128xbf16>
    %c0_4 = arith.constant 0 : index
    %c0_5 = arith.constant 0 : index
    %5 = vector.load %arg4[%c0_4, %c0_5] : memref<128x128xbf16, #tpu.memory_space<vmem>>, vector<128x128xbf16>
    %cst = arith.constant dense<0.000000e+00> : vector<128x128xf32>
    %6 = tpu.matmul %4, %5, %cst {dimension_numbers = #tpu.dot_dimension_numbers<[1], [0], [0], [1], [0, 0, 1, 1], [], []>} : vector<128x128xbf16>, vector<128x128xbf16>, vector<128x128xf32> -> vector<128x128xf32>
    %7 = arith.addf %3, %6 : vector<128x128xf32>
    %c0_6 = arith.constant 0 : index
    %c0_7 = arith.constant 0 : index
    %8 = vector.load %arg7[%c0_6, %c0_7] : memref<128x128xf32, #tpu.memory_space<vmem>>, vector<128x128xf32>
    tpu.vector_store %arg7[%c0_6, %c0_7], %7 {strides = array<i32>} : memref<128x128xf32, #tpu.memory_space<vmem>>, vector<128x128xf32>,
    %c0_i32_8 = arith.constant 0 : i32
    %9 = arith.cmpi eq, %arg2, %c0_i32_8 : i32
    %10 = arith.extui %9 : i1 to i32
    %c0_i32_9 = arith.constant 0 : i32
    %11 = arith.cmpi ne, %10, %c0_i32_9 : i32
    scf.if %11 {
      %c0_10 = arith.constant 0 : index
      %c0_11 = arith.constant 0 : index
      %12 = vector.load %arg7[%c0_10, %c0_11] : memref<128x128xf32, #tpu.memory_space<vmem>>, vector<128x128xf32>
      %13 = arith.truncf %12 : vector<128x128xf32> to vector<128x128xbf16>
      %c0_12 = arith.constant 0 : index
      %c0_13 = arith.constant 0 : index
      %14 = vector.load %arg6[%c0_12, %c0_13] : memref<128x128xbf16, #tpu.memory_space<vmem>>, vector<128x128xbf16>
      tpu.vector_store %arg6[%c0_12, %c0_13], %13 {strides = array<i32>} : memref<128x128xbf16, #tpu.memory_space<vmem>>, vector<128x128xbf16>,
    } else {
    }
    return
  }
  func.func @transform_0(%arg0: i32, %arg1: i32, %arg2: i32) -> (i32, i32) {
    %c0_i32 = arith.constant 0 : i32
    return %arg0, %arg2 : i32, i32
  }
  func.func @transform_1(%arg0: i32, %arg1: i32, %arg2: i32) -> (i32, i32) {
    %c0_i32 = arith.constant 0 : i32
    return %arg2, %arg1 : i32, i32
  }
  func.func @transform_2(%arg0: i32, %arg1: i32, %arg2: i32) -> (i32, i32) {
    %c0_i32 = arith.constant 0 : i32
    %c0_i32_0 = arith.constant 0 : i32
    return %c0_i32, %arg1 : i32, i32
  }
  func.func @transform_3(%arg0: i32, %arg1: i32, %arg2: i32) -> (i32, i32) {
    %c0_i32 = arith.constant 0 : i32
    return %arg0, %arg1 : i32, i32
  }
}

module attributes {stable_mosaic.version = 11 : i64} {
  func.func @_lstm_fused_kernel(%arg0: i32, %arg1: i32, %arg2: memref<16x8x128xbf16, #tpu.memory_space<vmem>>, %arg3: memref<128x512xbf16, #tpu.memory_space<vmem>>, %arg4: memref<128x512xbf16, #tpu.memory_space<vmem>>, %arg5: memref<1x512xf32, #tpu.memory_space<vmem>>, %arg6: memref<16x8x128xbf16, #tpu.memory_space<vmem>>, %arg7: memref<128x512xf32, #tpu.memory_space<vmem>>, %arg8: memref<8x128xbf16, #tpu.memory_space<vmem>>, %arg9: memref<8x128xf32, #tpu.memory_space<vmem>>) attributes {dimension_semantics = [#tpu.dimension_semantics<parallel>, #tpu.dimension_semantics<arbitrary>], iteration_bounds = array<i64: 1, 1>, scalar_prefetch = 0 : i64, scratch_operands = 3 : i64, tpu.core_type = #tpu.core_type<tc>, window_params = [{transform_indices = @transform_0, window_bounds = array<i64: 16, 8, 128>}, {pipeline_mode = #tpu.pipeline_mode<synchronous>, transform_indices = @transform_1, window_bounds = array<i64: 128, 512>}, {pipeline_mode = #tpu.pipeline_mode<synchronous>, transform_indices = @transform_2, window_bounds = array<i64: 128, 512>}, {pipeline_mode = #tpu.pipeline_mode<synchronous>, transform_indices = @transform_3, window_bounds = array<i64: 1, 512>}, {transform_indices = @transform_4, window_bounds = array<i64: 16, 8, 128>}]} {
    %c0_i32 = arith.constant 0 : i32
    %0 = arith.cmpi eq, %arg1, %c0_i32 : i32
    %1 = arith.extui %0 : i1 to i32
    %c0_i32_0 = arith.constant 0 : i32
    %2 = arith.cmpi ne, %1, %c0_i32_0 : i32
    scf.if %2 {
      %cst_252 = arith.constant 0.000000e+00 : bf16
      %459 = vector.broadcast %cst_252 : bf16 to vector<8x128xbf16>
      %c0_253 = arith.constant 0 : index
      %c0_254 = arith.constant 0 : index
      %460 = vector.load %arg8[%c0_253, %c0_254] : memref<8x128xbf16, #tpu.memory_space<vmem>>, vector<8x128xbf16>
      tpu.vector_store %arg8[%c0_253, %c0_254], %459 {strides = array<i32>} : memref<8x128xbf16, #tpu.memory_space<vmem>>, vector<8x128xbf16>,
      %cst_255 = arith.constant 0.000000e+00 : f32
      %461 = vector.broadcast %cst_255 : f32 to vector<8x128xf32>
      %c0_256 = arith.constant 0 : index
      %c0_257 = arith.constant 0 : index
      %462 = vector.load %arg9[%c0_256, %c0_257] : memref<8x128xf32, #tpu.memory_space<vmem>>, vector<8x128xf32>
      tpu.vector_store %arg9[%c0_256, %c0_257], %461 {strides = array<i32>} : memref<8x128xf32, #tpu.memory_space<vmem>>, vector<8x128xf32>,
    } else {
    }
    %c0 = arith.constant 0 : index
    %c0_1 = arith.constant 0 : index
    %c0_2 = arith.constant 0 : index
    %3 = vector.load %arg2[%c0, %c0_1, %c0_2] : memref<16x8x128xbf16, #tpu.memory_space<vmem>>, vector<16x8x128xbf16>
    %4 = vector.shape_cast %3 : vector<16x8x128xbf16> to vector<128x128xbf16>
    %c0_3 = arith.constant 0 : index
    %c0_4 = arith.constant 0 : index
    %5 = vector.load %arg3[%c0_3, %c0_4] : memref<128x512xbf16, #tpu.memory_space<vmem>>, vector<128x512xbf16>
    %cst = arith.constant dense<0.000000e+00> : vector<128x512xf32>
    %6 = tpu.matmul %4, %5, %cst {dimension_numbers = #tpu.dot_dimension_numbers<[1], [0], [0], [1], [0, 0, 1, 1], [], []>} : vector<128x128xbf16>, vector<128x512xbf16>, vector<128x512xf32> -> vector<128x512xf32>
    %c0_5 = arith.constant 0 : index
    %c0_6 = arith.constant 0 : index
    %7 = vector.load %arg5[%c0_5, %c0_6] : memref<1x512xf32, #tpu.memory_space<vmem>>, vector<1x512xf32>
    %8 = vector.broadcast %7 : vector<1x512xf32> to vector<128x512xf32>
    %9 = arith.addf %6, %8 : vector<128x512xf32>
    %c0_7 = arith.constant 0 : index
    %c0_8 = arith.constant 0 : index
    %10 = vector.load %arg7[%c0_7, %c0_8] : memref<128x512xf32, #tpu.memory_space<vmem>>, vector<128x512xf32>
    tpu.vector_store %arg7[%c0_7, %c0_8], %9 {strides = array<i32>} : memref<128x512xf32, #tpu.memory_space<vmem>>, vector<128x512xf32>,
    %c0_9 = arith.constant 0 : index
    %c0_10 = arith.constant 0 : index
    %11 = vector.load %arg7[%c0_9, %c0_10] : memref<128x512xf32, #tpu.memory_space<vmem>>, vector<8x512xf32>
    %c0_11 = arith.constant 0 : index
    %c0_12 = arith.constant 0 : index
    %12 = vector.load %arg8[%c0_11, %c0_12] : memref<8x128xbf16, #tpu.memory_space<vmem>>, vector<8x128xbf16>
    %c0_13 = arith.constant 0 : index
    %c0_14 = arith.constant 0 : index
    %13 = vector.load %arg4[%c0_13, %c0_14] : memref<128x512xbf16, #tpu.memory_space<vmem>>, vector<128x512xbf16>
    %cst_15 = arith.constant dense<0.000000e+00> : vector<8x512xf32>
    %14 = tpu.matmul %12, %13, %cst_15 {dimension_numbers = #tpu.dot_dimension_numbers<[1], [0], [0], [1], [0, 0, 1, 1], [], []>} : vector<8x128xbf16>, vector<128x512xbf16>, vector<8x512xf32> -> vector<8x512xf32>
    %15 = arith.addf %11, %14 : vector<8x512xf32>
    %16 = vector.extract_strided_slice %15 {offsets = [0, 0], sizes = [8, 384], strides = [1, 1]} : vector<8x512xf32> to vector<8x384xf32>
    %17 = arith.negf %16 : vector<8x384xf32>
    %18 = math.exp %17 : vector<8x384xf32>
    %cst_16 = arith.constant 1.000000e+00 : f32
    %19 = vector.broadcast %cst_16 : f32 to vector<8x384xf32>
    %20 = arith.addf %19, %18 : vector<8x384xf32>
    %21 = arith.divf %19, %20 : vector<8x384xf32>
    %22 = vector.extract_strided_slice %21 {offsets = [0, 0], sizes = [8, 128], strides = [1, 1]} : vector<8x384xf32> to vector<8x128xf32>
    %23 = vector.extract_strided_slice %21 {offsets = [0, 128], sizes = [8, 128], strides = [1, 1]} : vector<8x384xf32> to vector<8x128xf32>
    %24 = vector.extract_strided_slice %21 {offsets = [0, 256], sizes = [8, 128], strides = [1, 1]} : vector<8x384xf32> to vector<8x128xf32>
    %25 = vector.extract_strided_slice %15 {offsets = [0, 384], sizes = [8, 128], strides = [1, 1]} : vector<8x512xf32> to vector<8x128xf32>
    %26 = math.tanh %25 : vector<8x128xf32>
    %c0_17 = arith.constant 0 : index
    %c0_18 = arith.constant 0 : index
    %27 = vector.load %arg9[%c0_17, %c0_18] : memref<8x128xf32, #tpu.memory_space<vmem>>, vector<8x128xf32>
    %28 = arith.mulf %23, %27 : vector<8x128xf32>
    %29 = arith.mulf %22, %26 : vector<8x128xf32>
    %30 = arith.addf %28, %29 : vector<8x128xf32>
    %31 = math.tanh %30 : vector<8x128xf32>
    %32 = arith.mulf %24, %31 : vector<8x128xf32>
    %33 = arith.truncf %32 : vector<8x128xf32> to vector<8x128xbf16>
    %c0_19 = arith.constant 0 : index
    %c0_20 = arith.constant 0 : index
    %34 = vector.load %arg9[%c0_19, %c0_20] : memref<8x128xf32, #tpu.memory_space<vmem>>, vector<8x128xf32>
    tpu.vector_store %arg9[%c0_19, %c0_20], %30 {strides = array<i32>} : memref<8x128xf32, #tpu.memory_space<vmem>>, vector<8x128xf32>,
    %c0_21 = arith.constant 0 : index
    %c0_22 = arith.constant 0 : index
    %35 = vector.load %arg8[%c0_21, %c0_22] : memref<8x128xbf16, #tpu.memory_space<vmem>>, vector<8x128xbf16>
    tpu.vector_store %arg8[%c0_21, %c0_22], %33 {strides = array<i32>} : memref<8x128xbf16, #tpu.memory_space<vmem>>, vector<8x128xbf16>,
    %c0_23 = arith.constant 0 : index
    %c0_24 = arith.constant 0 : index
    %c0_25 = arith.constant 0 : index
    %36 = vector.load %arg6[%c0_23, %c0_24, %c0_25] : memref<16x8x128xbf16, #tpu.memory_space<vmem>>, vector<1x8x128xbf16>
    %37 = vector.shape_cast %36 : vector<1x8x128xbf16> to vector<8x128xbf16>
    %38 = vector.shape_cast %33 : vector<8x128xbf16> to vector<1x8x128xbf16>
    tpu.vector_store %arg6[%c0_23, %c0_24, %c0_25], %38 {strides = array<i32>} : memref<16x8x128xbf16, #tpu.memory_space<vmem>>, vector<1x8x128xbf16>,
    %c8 = arith.constant 8 : index
    %c0_26 = arith.constant 0 : index
    %39 = vector.load %arg7[%c8, %c0_26] : memref<128x512xf32, #tpu.memory_space<vmem>>, vector<8x512xf32>
    %c0_27 = arith.constant 0 : index
    %c0_28 = arith.constant 0 : index
    %40 = vector.load %arg8[%c0_27, %c0_28] : memref<8x128xbf16, #tpu.memory_space<vmem>>, vector<8x128xbf16>
    %c0_29 = arith.constant 0 : index
    %c0_30 = arith.constant 0 : index
    %41 = vector.load %arg4[%c0_29, %c0_30] : memref<128x512xbf16, #tpu.memory_space<vmem>>, vector<128x512xbf16>
    %cst_31 = arith.constant dense<0.000000e+00> : vector<8x512xf32>
    %42 = tpu.matmul %40, %41, %cst_31 {dimension_numbers = #tpu.dot_dimension_numbers<[1], [0], [0], [1], [0, 0, 1, 1], [], []>} : vector<8x128xbf16>, vector<128x512xbf16>, vector<8x512xf32> -> vector<8x512xf32>
    %43 = arith.addf %39, %42 : vector<8x512xf32>
    %44 = vector.extract_strided_slice %43 {offsets = [0, 0], sizes = [8, 384], strides = [1, 1]} : vector<8x512xf32> to vector<8x384xf32>
    %45 = arith.negf %44 : vector<8x384xf32>
    %46 = math.exp %45 : vector<8x384xf32>
    %cst_32 = arith.constant 1.000000e+00 : f32
    %47 = vector.broadcast %cst_32 : f32 to vector<8x384xf32>
    %48 = arith.addf %47, %46 : vector<8x384xf32>
    %49 = arith.divf %47, %48 : vector<8x384xf32>
    %50 = vector.extract_strided_slice %49 {offsets = [0, 0], sizes = [8, 128], strides = [1, 1]} : vector<8x384xf32> to vector<8x128xf32>
    %51 = vector.extract_strided_slice %49 {offsets = [0, 128], sizes = [8, 128], strides = [1, 1]} : vector<8x384xf32> to vector<8x128xf32>
    %52 = vector.extract_strided_slice %49 {offsets = [0, 256], sizes = [8, 128], strides = [1, 1]} : vector<8x384xf32> to vector<8x128xf32>
    %53 = vector.extract_strided_slice %43 {offsets = [0, 384], sizes = [8, 128], strides = [1, 1]} : vector<8x512xf32> to vector<8x128xf32>
    %54 = math.tanh %53 : vector<8x128xf32>
    %c0_33 = arith.constant 0 : index
    %c0_34 = arith.constant 0 : index
    %55 = vector.load %arg9[%c0_33, %c0_34] : memref<8x128xf32, #tpu.memory_space<vmem>>, vector<8x128xf32>
    %56 = arith.mulf %51, %55 : vector<8x128xf32>
    %57 = arith.mulf %50, %54 : vector<8x128xf32>
    %58 = arith.addf %56, %57 : vector<8x128xf32>
    %59 = math.tanh %58 : vector<8x128xf32>
    %60 = arith.mulf %52, %59 : vector<8x128xf32>
    %61 = arith.truncf %60 : vector<8x128xf32> to vector<8x128xbf16>
    %c0_35 = arith.constant 0 : index
    %c0_36 = arith.constant 0 : index
    %62 = vector.load %arg9[%c0_35, %c0_36] : memref<8x128xf32, #tpu.memory_space<vmem>>, vector<8x128xf32>
    tpu.vector_store %arg9[%c0_35, %c0_36], %58 {strides = array<i32>} : memref<8x128xf32, #tpu.memory_space<vmem>>, vector<8x128xf32>,
    %c0_37 = arith.constant 0 : index
    %c0_38 = arith.constant 0 : index
    %63 = vector.load %arg8[%c0_37, %c0_38] : memref<8x128xbf16, #tpu.memory_space<vmem>>, vector<8x128xbf16>
    tpu.vector_store %arg8[%c0_37, %c0_38], %61 {strides = array<i32>} : memref<8x128xbf16, #tpu.memory_space<vmem>>, vector<8x128xbf16>,
    %c1 = arith.constant 1 : index
    %c0_39 = arith.constant 0 : index
    %c0_40 = arith.constant 0 : index
    %64 = vector.load %arg6[%c1, %c0_39, %c0_40] : memref<16x8x128xbf16, #tpu.memory_space<vmem>>, vector<1x8x128xbf16>
    %65 = vector.shape_cast %64 : vector<1x8x128xbf16> to vector<8x128xbf16>
    %66 = vector.shape_cast %61 : vector<8x128xbf16> to vector<1x8x128xbf16>
    tpu.vector_store %arg6[%c1, %c0_39, %c0_40], %66 {strides = array<i32>} : memref<16x8x128xbf16, #tpu.memory_space<vmem>>, vector<1x8x128xbf16>,
    %c16 = arith.constant 16 : index
    %c0_41 = arith.constant 0 : index
    %67 = vector.load %arg7[%c16, %c0_41] : memref<128x512xf32, #tpu.memory_space<vmem>>, vector<8x512xf32>
    %c0_42 = arith.constant 0 : index
    %c0_43 = arith.constant 0 : index
    %68 = vector.load %arg8[%c0_42, %c0_43] : memref<8x128xbf16, #tpu.memory_space<vmem>>, vector<8x128xbf16>
    %c0_44 = arith.constant 0 : index
    %c0_45 = arith.constant 0 : index
    %69 = vector.load %arg4[%c0_44, %c0_45] : memref<128x512xbf16, #tpu.memory_space<vmem>>, vector<128x512xbf16>
    %cst_46 = arith.constant dense<0.000000e+00> : vector<8x512xf32>
    %70 = tpu.matmul %68, %69, %cst_46 {dimension_numbers = #tpu.dot_dimension_numbers<[1], [0], [0], [1], [0, 0, 1, 1], [], []>} : vector<8x128xbf16>, vector<128x512xbf16>, vector<8x512xf32> -> vector<8x512xf32>
    %71 = arith.addf %67, %70 : vector<8x512xf32>
    %72 = vector.extract_strided_slice %71 {offsets = [0, 0], sizes = [8, 384], strides = [1, 1]} : vector<8x512xf32> to vector<8x384xf32>
    %73 = arith.negf %72 : vector<8x384xf32>
    %74 = math.exp %73 : vector<8x384xf32>
    %cst_47 = arith.constant 1.000000e+00 : f32
    %75 = vector.broadcast %cst_47 : f32 to vector<8x384xf32>
    %76 = arith.addf %75, %74 : vector<8x384xf32>
    %77 = arith.divf %75, %76 : vector<8x384xf32>
    %78 = vector.extract_strided_slice %77 {offsets = [0, 0], sizes = [8, 128], strides = [1, 1]} : vector<8x384xf32> to vector<8x128xf32>
    %79 = vector.extract_strided_slice %77 {offsets = [0, 128], sizes = [8, 128], strides = [1, 1]} : vector<8x384xf32> to vector<8x128xf32>
    %80 = vector.extract_strided_slice %77 {offsets = [0, 256], sizes = [8, 128], strides = [1, 1]} : vector<8x384xf32> to vector<8x128xf32>
    %81 = vector.extract_strided_slice %71 {offsets = [0, 384], sizes = [8, 128], strides = [1, 1]} : vector<8x512xf32> to vector<8x128xf32>
    %82 = math.tanh %81 : vector<8x128xf32>
    %c0_48 = arith.constant 0 : index
    %c0_49 = arith.constant 0 : index
    %83 = vector.load %arg9[%c0_48, %c0_49] : memref<8x128xf32, #tpu.memory_space<vmem>>, vector<8x128xf32>
    %84 = arith.mulf %79, %83 : vector<8x128xf32>
    %85 = arith.mulf %78, %82 : vector<8x128xf32>
    %86 = arith.addf %84, %85 : vector<8x128xf32>
    %87 = math.tanh %86 : vector<8x128xf32>
    %88 = arith.mulf %80, %87 : vector<8x128xf32>
    %89 = arith.truncf %88 : vector<8x128xf32> to vector<8x128xbf16>
    %c0_50 = arith.constant 0 : index
    %c0_51 = arith.constant 0 : index
    %90 = vector.load %arg9[%c0_50, %c0_51] : memref<8x128xf32, #tpu.memory_space<vmem>>, vector<8x128xf32>
    tpu.vector_store %arg9[%c0_50, %c0_51], %86 {strides = array<i32>} : memref<8x128xf32, #tpu.memory_space<vmem>>, vector<8x128xf32>,
    %c0_52 = arith.constant 0 : index
    %c0_53 = arith.constant 0 : index
    %91 = vector.load %arg8[%c0_52, %c0_53] : memref<8x128xbf16, #tpu.memory_space<vmem>>, vector<8x128xbf16>
    tpu.vector_store %arg8[%c0_52, %c0_53], %89 {strides = array<i32>} : memref<8x128xbf16, #tpu.memory_space<vmem>>, vector<8x128xbf16>,
    %c2 = arith.constant 2 : index
    %c0_54 = arith.constant 0 : index
    %c0_55 = arith.constant 0 : index
    %92 = vector.load %arg6[%c2, %c0_54, %c0_55] : memref<16x8x128xbf16, #tpu.memory_space<vmem>>, vector<1x8x128xbf16>
    %93 = vector.shape_cast %92 : vector<1x8x128xbf16> to vector<8x128xbf16>
    %94 = vector.shape_cast %89 : vector<8x128xbf16> to vector<1x8x128xbf16>
    tpu.vector_store %arg6[%c2, %c0_54, %c0_55], %94 {strides = array<i32>} : memref<16x8x128xbf16, #tpu.memory_space<vmem>>, vector<1x8x128xbf16>,
    %c24 = arith.constant 24 : index
    %c0_56 = arith.constant 0 : index
    %95 = vector.load %arg7[%c24, %c0_56] : memref<128x512xf32, #tpu.memory_space<vmem>>, vector<8x512xf32>
    %c0_57 = arith.constant 0 : index
    %c0_58 = arith.constant 0 : index
    %96 = vector.load %arg8[%c0_57, %c0_58] : memref<8x128xbf16, #tpu.memory_space<vmem>>, vector<8x128xbf16>
    %c0_59 = arith.constant 0 : index
    %c0_60 = arith.constant 0 : index
    %97 = vector.load %arg4[%c0_59, %c0_60] : memref<128x512xbf16, #tpu.memory_space<vmem>>, vector<128x512xbf16>
    %cst_61 = arith.constant dense<0.000000e+00> : vector<8x512xf32>
    %98 = tpu.matmul %96, %97, %cst_61 {dimension_numbers = #tpu.dot_dimension_numbers<[1], [0], [0], [1], [0, 0, 1, 1], [], []>} : vector<8x128xbf16>, vector<128x512xbf16>, vector<8x512xf32> -> vector<8x512xf32>
    %99 = arith.addf %95, %98 : vector<8x512xf32>
    %100 = vector.extract_strided_slice %99 {offsets = [0, 0], sizes = [8, 384], strides = [1, 1]} : vector<8x512xf32> to vector<8x384xf32>
    %101 = arith.negf %100 : vector<8x384xf32>
    %102 = math.exp %101 : vector<8x384xf32>
    %cst_62 = arith.constant 1.000000e+00 : f32
    %103 = vector.broadcast %cst_62 : f32 to vector<8x384xf32>
    %104 = arith.addf %103, %102 : vector<8x384xf32>
    %105 = arith.divf %103, %104 : vector<8x384xf32>
    %106 = vector.extract_strided_slice %105 {offsets = [0, 0], sizes = [8, 128], strides = [1, 1]} : vector<8x384xf32> to vector<8x128xf32>
    %107 = vector.extract_strided_slice %105 {offsets = [0, 128], sizes = [8, 128], strides = [1, 1]} : vector<8x384xf32> to vector<8x128xf32>
    %108 = vector.extract_strided_slice %105 {offsets = [0, 256], sizes = [8, 128], strides = [1, 1]} : vector<8x384xf32> to vector<8x128xf32>
    %109 = vector.extract_strided_slice %99 {offsets = [0, 384], sizes = [8, 128], strides = [1, 1]} : vector<8x512xf32> to vector<8x128xf32>
    %110 = math.tanh %109 : vector<8x128xf32>
    %c0_63 = arith.constant 0 : index
    %c0_64 = arith.constant 0 : index
    %111 = vector.load %arg9[%c0_63, %c0_64] : memref<8x128xf32, #tpu.memory_space<vmem>>, vector<8x128xf32>
    %112 = arith.mulf %107, %111 : vector<8x128xf32>
    %113 = arith.mulf %106, %110 : vector<8x128xf32>
    %114 = arith.addf %112, %113 : vector<8x128xf32>
    %115 = math.tanh %114 : vector<8x128xf32>
    %116 = arith.mulf %108, %115 : vector<8x128xf32>
    %117 = arith.truncf %116 : vector<8x128xf32> to vector<8x128xbf16>
    %c0_65 = arith.constant 0 : index
    %c0_66 = arith.constant 0 : index
    %118 = vector.load %arg9[%c0_65, %c0_66] : memref<8x128xf32, #tpu.memory_space<vmem>>, vector<8x128xf32>
    tpu.vector_store %arg9[%c0_65, %c0_66], %114 {strides = array<i32>} : memref<8x128xf32, #tpu.memory_space<vmem>>, vector<8x128xf32>,
    %c0_67 = arith.constant 0 : index
    %c0_68 = arith.constant 0 : index
    %119 = vector.load %arg8[%c0_67, %c0_68] : memref<8x128xbf16, #tpu.memory_space<vmem>>, vector<8x128xbf16>
    tpu.vector_store %arg8[%c0_67, %c0_68], %117 {strides = array<i32>} : memref<8x128xbf16, #tpu.memory_space<vmem>>, vector<8x128xbf16>,
    %c3 = arith.constant 3 : index
    %c0_69 = arith.constant 0 : index
    %c0_70 = arith.constant 0 : index
    %120 = vector.load %arg6[%c3, %c0_69, %c0_70] : memref<16x8x128xbf16, #tpu.memory_space<vmem>>, vector<1x8x128xbf16>
    %121 = vector.shape_cast %120 : vector<1x8x128xbf16> to vector<8x128xbf16>
    %122 = vector.shape_cast %117 : vector<8x128xbf16> to vector<1x8x128xbf16>
    tpu.vector_store %arg6[%c3, %c0_69, %c0_70], %122 {strides = array<i32>} : memref<16x8x128xbf16, #tpu.memory_space<vmem>>, vector<1x8x128xbf16>,
    %c32 = arith.constant 32 : index
    %c0_71 = arith.constant 0 : index
    %123 = vector.load %arg7[%c32, %c0_71] : memref<128x512xf32, #tpu.memory_space<vmem>>, vector<8x512xf32>
    %c0_72 = arith.constant 0 : index
    %c0_73 = arith.constant 0 : index
    %124 = vector.load %arg8[%c0_72, %c0_73] : memref<8x128xbf16, #tpu.memory_space<vmem>>, vector<8x128xbf16>
    %c0_74 = arith.constant 0 : index
    %c0_75 = arith.constant 0 : index
    %125 = vector.load %arg4[%c0_74, %c0_75] : memref<128x512xbf16, #tpu.memory_space<vmem>>, vector<128x512xbf16>
    %cst_76 = arith.constant dense<0.000000e+00> : vector<8x512xf32>
    %126 = tpu.matmul %124, %125, %cst_76 {dimension_numbers = #tpu.dot_dimension_numbers<[1], [0], [0], [1], [0, 0, 1, 1], [], []>} : vector<8x128xbf16>, vector<128x512xbf16>, vector<8x512xf32> -> vector<8x512xf32>
    %127 = arith.addf %123, %126 : vector<8x512xf32>
    %128 = vector.extract_strided_slice %127 {offsets = [0, 0], sizes = [8, 384], strides = [1, 1]} : vector<8x512xf32> to vector<8x384xf32>
    %129 = arith.negf %128 : vector<8x384xf32>
    %130 = math.exp %129 : vector<8x384xf32>
    %cst_77 = arith.constant 1.000000e+00 : f32
    %131 = vector.broadcast %cst_77 : f32 to vector<8x384xf32>
    %132 = arith.addf %131, %130 : vector<8x384xf32>
    %133 = arith.divf %131, %132 : vector<8x384xf32>
    %134 = vector.extract_strided_slice %133 {offsets = [0, 0], sizes = [8, 128], strides = [1, 1]} : vector<8x384xf32> to vector<8x128xf32>
    %135 = vector.extract_strided_slice %133 {offsets = [0, 128], sizes = [8, 128], strides = [1, 1]} : vector<8x384xf32> to vector<8x128xf32>
    %136 = vector.extract_strided_slice %133 {offsets = [0, 256], sizes = [8, 128], strides = [1, 1]} : vector<8x384xf32> to vector<8x128xf32>
    %137 = vector.extract_strided_slice %127 {offsets = [0, 384], sizes = [8, 128], strides = [1, 1]} : vector<8x512xf32> to vector<8x128xf32>
    %138 = math.tanh %137 : vector<8x128xf32>
    %c0_78 = arith.constant 0 : index
    %c0_79 = arith.constant 0 : index
    %139 = vector.load %arg9[%c0_78, %c0_79] : memref<8x128xf32, #tpu.memory_space<vmem>>, vector<8x128xf32>
    %140 = arith.mulf %135, %139 : vector<8x128xf32>
    %141 = arith.mulf %134, %138 : vector<8x128xf32>
    %142 = arith.addf %140, %141 : vector<8x128xf32>
    %143 = math.tanh %142 : vector<8x128xf32>
    %144 = arith.mulf %136, %143 : vector<8x128xf32>
    %145 = arith.truncf %144 : vector<8x128xf32> to vector<8x128xbf16>
    %c0_80 = arith.constant 0 : index
    %c0_81 = arith.constant 0 : index
    %146 = vector.load %arg9[%c0_80, %c0_81] : memref<8x128xf32, #tpu.memory_space<vmem>>, vector<8x128xf32>
    tpu.vector_store %arg9[%c0_80, %c0_81], %142 {strides = array<i32>} : memref<8x128xf32, #tpu.memory_space<vmem>>, vector<8x128xf32>,
    %c0_82 = arith.constant 0 : index
    %c0_83 = arith.constant 0 : index
    %147 = vector.load %arg8[%c0_82, %c0_83] : memref<8x128xbf16, #tpu.memory_space<vmem>>, vector<8x128xbf16>
    tpu.vector_store %arg8[%c0_82, %c0_83], %145 {strides = array<i32>} : memref<8x128xbf16, #tpu.memory_space<vmem>>, vector<8x128xbf16>,
    %c4 = arith.constant 4 : index
    %c0_84 = arith.constant 0 : index
    %c0_85 = arith.constant 0 : index
    %148 = vector.load %arg6[%c4, %c0_84, %c0_85] : memref<16x8x128xbf16, #tpu.memory_space<vmem>>, vector<1x8x128xbf16>
    %149 = vector.shape_cast %148 : vector<1x8x128xbf16> to vector<8x128xbf16>
    %150 = vector.shape_cast %145 : vector<8x128xbf16> to vector<1x8x128xbf16>
    tpu.vector_store %arg6[%c4, %c0_84, %c0_85], %150 {strides = array<i32>} : memref<16x8x128xbf16, #tpu.memory_space<vmem>>, vector<1x8x128xbf16>,
    %c40 = arith.constant 40 : index
    %c0_86 = arith.constant 0 : index
    %151 = vector.load %arg7[%c40, %c0_86] : memref<128x512xf32, #tpu.memory_space<vmem>>, vector<8x512xf32>
    %c0_87 = arith.constant 0 : index
    %c0_88 = arith.constant 0 : index
    %152 = vector.load %arg8[%c0_87, %c0_88] : memref<8x128xbf16, #tpu.memory_space<vmem>>, vector<8x128xbf16>
    %c0_89 = arith.constant 0 : index
    %c0_90 = arith.constant 0 : index
    %153 = vector.load %arg4[%c0_89, %c0_90] : memref<128x512xbf16, #tpu.memory_space<vmem>>, vector<128x512xbf16>
    %cst_91 = arith.constant dense<0.000000e+00> : vector<8x512xf32>
    %154 = tpu.matmul %152, %153, %cst_91 {dimension_numbers = #tpu.dot_dimension_numbers<[1], [0], [0], [1], [0, 0, 1, 1], [], []>} : vector<8x128xbf16>, vector<128x512xbf16>, vector<8x512xf32> -> vector<8x512xf32>
    %155 = arith.addf %151, %154 : vector<8x512xf32>
    %156 = vector.extract_strided_slice %155 {offsets = [0, 0], sizes = [8, 384], strides = [1, 1]} : vector<8x512xf32> to vector<8x384xf32>
    %157 = arith.negf %156 : vector<8x384xf32>
    %158 = math.exp %157 : vector<8x384xf32>
    %cst_92 = arith.constant 1.000000e+00 : f32
    %159 = vector.broadcast %cst_92 : f32 to vector<8x384xf32>
    %160 = arith.addf %159, %158 : vector<8x384xf32>
    %161 = arith.divf %159, %160 : vector<8x384xf32>
    %162 = vector.extract_strided_slice %161 {offsets = [0, 0], sizes = [8, 128], strides = [1, 1]} : vector<8x384xf32> to vector<8x128xf32>
    %163 = vector.extract_strided_slice %161 {offsets = [0, 128], sizes = [8, 128], strides = [1, 1]} : vector<8x384xf32> to vector<8x128xf32>
    %164 = vector.extract_strided_slice %161 {offsets = [0, 256], sizes = [8, 128], strides = [1, 1]} : vector<8x384xf32> to vector<8x128xf32>
    %165 = vector.extract_strided_slice %155 {offsets = [0, 384], sizes = [8, 128], strides = [1, 1]} : vector<8x512xf32> to vector<8x128xf32>
    %166 = math.tanh %165 : vector<8x128xf32>
    %c0_93 = arith.constant 0 : index
    %c0_94 = arith.constant 0 : index
    %167 = vector.load %arg9[%c0_93, %c0_94] : memref<8x128xf32, #tpu.memory_space<vmem>>, vector<8x128xf32>
    %168 = arith.mulf %163, %167 : vector<8x128xf32>
    %169 = arith.mulf %162, %166 : vector<8x128xf32>
    %170 = arith.addf %168, %169 : vector<8x128xf32>
    %171 = math.tanh %170 : vector<8x128xf32>
    %172 = arith.mulf %164, %171 : vector<8x128xf32>
    %173 = arith.truncf %172 : vector<8x128xf32> to vector<8x128xbf16>
    %c0_95 = arith.constant 0 : index
    %c0_96 = arith.constant 0 : index
    %174 = vector.load %arg9[%c0_95, %c0_96] : memref<8x128xf32, #tpu.memory_space<vmem>>, vector<8x128xf32>
    tpu.vector_store %arg9[%c0_95, %c0_96], %170 {strides = array<i32>} : memref<8x128xf32, #tpu.memory_space<vmem>>, vector<8x128xf32>,
    %c0_97 = arith.constant 0 : index
    %c0_98 = arith.constant 0 : index
    %175 = vector.load %arg8[%c0_97, %c0_98] : memref<8x128xbf16, #tpu.memory_space<vmem>>, vector<8x128xbf16>
    tpu.vector_store %arg8[%c0_97, %c0_98], %173 {strides = array<i32>} : memref<8x128xbf16, #tpu.memory_space<vmem>>, vector<8x128xbf16>,
    %c5 = arith.constant 5 : index
    %c0_99 = arith.constant 0 : index
    %c0_100 = arith.constant 0 : index
    %176 = vector.load %arg6[%c5, %c0_99, %c0_100] : memref<16x8x128xbf16, #tpu.memory_space<vmem>>, vector<1x8x128xbf16>
    %177 = vector.shape_cast %176 : vector<1x8x128xbf16> to vector<8x128xbf16>
    %178 = vector.shape_cast %173 : vector<8x128xbf16> to vector<1x8x128xbf16>
    tpu.vector_store %arg6[%c5, %c0_99, %c0_100], %178 {strides = array<i32>} : memref<16x8x128xbf16, #tpu.memory_space<vmem>>, vector<1x8x128xbf16>,
    %c48 = arith.constant 48 : index
    %c0_101 = arith.constant 0 : index
    %179 = vector.load %arg7[%c48, %c0_101] : memref<128x512xf32, #tpu.memory_space<vmem>>, vector<8x512xf32>
    %c0_102 = arith.constant 0 : index
    %c0_103 = arith.constant 0 : index
    %180 = vector.load %arg8[%c0_102, %c0_103] : memref<8x128xbf16, #tpu.memory_space<vmem>>, vector<8x128xbf16>
    %c0_104 = arith.constant 0 : index
    %c0_105 = arith.constant 0 : index
    %181 = vector.load %arg4[%c0_104, %c0_105] : memref<128x512xbf16, #tpu.memory_space<vmem>>, vector<128x512xbf16>
    %cst_106 = arith.constant dense<0.000000e+00> : vector<8x512xf32>
    %182 = tpu.matmul %180, %181, %cst_106 {dimension_numbers = #tpu.dot_dimension_numbers<[1], [0], [0], [1], [0, 0, 1, 1], [], []>} : vector<8x128xbf16>, vector<128x512xbf16>, vector<8x512xf32> -> vector<8x512xf32>
    %183 = arith.addf %179, %182 : vector<8x512xf32>
    %184 = vector.extract_strided_slice %183 {offsets = [0, 0], sizes = [8, 384], strides = [1, 1]} : vector<8x512xf32> to vector<8x384xf32>
    %185 = arith.negf %184 : vector<8x384xf32>
    %186 = math.exp %185 : vector<8x384xf32>
    %cst_107 = arith.constant 1.000000e+00 : f32
    %187 = vector.broadcast %cst_107 : f32 to vector<8x384xf32>
    %188 = arith.addf %187, %186 : vector<8x384xf32>
    %189 = arith.divf %187, %188 : vector<8x384xf32>
    %190 = vector.extract_strided_slice %189 {offsets = [0, 0], sizes = [8, 128], strides = [1, 1]} : vector<8x384xf32> to vector<8x128xf32>
    %191 = vector.extract_strided_slice %189 {offsets = [0, 128], sizes = [8, 128], strides = [1, 1]} : vector<8x384xf32> to vector<8x128xf32>
    %192 = vector.extract_strided_slice %189 {offsets = [0, 256], sizes = [8, 128], strides = [1, 1]} : vector<8x384xf32> to vector<8x128xf32>
    %193 = vector.extract_strided_slice %183 {offsets = [0, 384], sizes = [8, 128], strides = [1, 1]} : vector<8x512xf32> to vector<8x128xf32>
    %194 = math.tanh %193 : vector<8x128xf32>
    %c0_108 = arith.constant 0 : index
    %c0_109 = arith.constant 0 : index
    %195 = vector.load %arg9[%c0_108, %c0_109] : memref<8x128xf32, #tpu.memory_space<vmem>>, vector<8x128xf32>
    %196 = arith.mulf %191, %195 : vector<8x128xf32>
    %197 = arith.mulf %190, %194 : vector<8x128xf32>
    %198 = arith.addf %196, %197 : vector<8x128xf32>
    %199 = math.tanh %198 : vector<8x128xf32>
    %200 = arith.mulf %192, %199 : vector<8x128xf32>
    %201 = arith.truncf %200 : vector<8x128xf32> to vector<8x128xbf16>
    %c0_110 = arith.constant 0 : index
    %c0_111 = arith.constant 0 : index
    %202 = vector.load %arg9[%c0_110, %c0_111] : memref<8x128xf32, #tpu.memory_space<vmem>>, vector<8x128xf32>
    tpu.vector_store %arg9[%c0_110, %c0_111], %198 {strides = array<i32>} : memref<8x128xf32, #tpu.memory_space<vmem>>, vector<8x128xf32>,
    %c0_112 = arith.constant 0 : index
    %c0_113 = arith.constant 0 : index
    %203 = vector.load %arg8[%c0_112, %c0_113] : memref<8x128xbf16, #tpu.memory_space<vmem>>, vector<8x128xbf16>
    tpu.vector_store %arg8[%c0_112, %c0_113], %201 {strides = array<i32>} : memref<8x128xbf16, #tpu.memory_space<vmem>>, vector<8x128xbf16>,
    %c6 = arith.constant 6 : index
    %c0_114 = arith.constant 0 : index
    %c0_115 = arith.constant 0 : index
    %204 = vector.load %arg6[%c6, %c0_114, %c0_115] : memref<16x8x128xbf16, #tpu.memory_space<vmem>>, vector<1x8x128xbf16>
    %205 = vector.shape_cast %204 : vector<1x8x128xbf16> to vector<8x128xbf16>
    %206 = vector.shape_cast %201 : vector<8x128xbf16> to vector<1x8x128xbf16>
    tpu.vector_store %arg6[%c6, %c0_114, %c0_115], %206 {strides = array<i32>} : memref<16x8x128xbf16, #tpu.memory_space<vmem>>, vector<1x8x128xbf16>,
    %c56 = arith.constant 56 : index
    %c0_116 = arith.constant 0 : index
    %207 = vector.load %arg7[%c56, %c0_116] : memref<128x512xf32, #tpu.memory_space<vmem>>, vector<8x512xf32>
    %c0_117 = arith.constant 0 : index
    %c0_118 = arith.constant 0 : index
    %208 = vector.load %arg8[%c0_117, %c0_118] : memref<8x128xbf16, #tpu.memory_space<vmem>>, vector<8x128xbf16>
    %c0_119 = arith.constant 0 : index
    %c0_120 = arith.constant 0 : index
    %209 = vector.load %arg4[%c0_119, %c0_120] : memref<128x512xbf16, #tpu.memory_space<vmem>>, vector<128x512xbf16>
    %cst_121 = arith.constant dense<0.000000e+00> : vector<8x512xf32>
    %210 = tpu.matmul %208, %209, %cst_121 {dimension_numbers = #tpu.dot_dimension_numbers<[1], [0], [0], [1], [0, 0, 1, 1], [], []>} : vector<8x128xbf16>, vector<128x512xbf16>, vector<8x512xf32> -> vector<8x512xf32>
    %211 = arith.addf %207, %210 : vector<8x512xf32>
    %212 = vector.extract_strided_slice %211 {offsets = [0, 0], sizes = [8, 384], strides = [1, 1]} : vector<8x512xf32> to vector<8x384xf32>
    %213 = arith.negf %212 : vector<8x384xf32>
    %214 = math.exp %213 : vector<8x384xf32>
    %cst_122 = arith.constant 1.000000e+00 : f32
    %215 = vector.broadcast %cst_122 : f32 to vector<8x384xf32>
    %216 = arith.addf %215, %214 : vector<8x384xf32>
    %217 = arith.divf %215, %216 : vector<8x384xf32>
    %218 = vector.extract_strided_slice %217 {offsets = [0, 0], sizes = [8, 128], strides = [1, 1]} : vector<8x384xf32> to vector<8x128xf32>
    %219 = vector.extract_strided_slice %217 {offsets = [0, 128], sizes = [8, 128], strides = [1, 1]} : vector<8x384xf32> to vector<8x128xf32>
    %220 = vector.extract_strided_slice %217 {offsets = [0, 256], sizes = [8, 128], strides = [1, 1]} : vector<8x384xf32> to vector<8x128xf32>
    %221 = vector.extract_strided_slice %211 {offsets = [0, 384], sizes = [8, 128], strides = [1, 1]} : vector<8x512xf32> to vector<8x128xf32>
    %222 = math.tanh %221 : vector<8x128xf32>
    %c0_123 = arith.constant 0 : index
    %c0_124 = arith.constant 0 : index
    %223 = vector.load %arg9[%c0_123, %c0_124] : memref<8x128xf32, #tpu.memory_space<vmem>>, vector<8x128xf32>
    %224 = arith.mulf %219, %223 : vector<8x128xf32>
    %225 = arith.mulf %218, %222 : vector<8x128xf32>
    %226 = arith.addf %224, %225 : vector<8x128xf32>
    %227 = math.tanh %226 : vector<8x128xf32>
    %228 = arith.mulf %220, %227 : vector<8x128xf32>
    %229 = arith.truncf %228 : vector<8x128xf32> to vector<8x128xbf16>
    %c0_125 = arith.constant 0 : index
    %c0_126 = arith.constant 0 : index
    %230 = vector.load %arg9[%c0_125, %c0_126] : memref<8x128xf32, #tpu.memory_space<vmem>>, vector<8x128xf32>
    tpu.vector_store %arg9[%c0_125, %c0_126], %226 {strides = array<i32>} : memref<8x128xf32, #tpu.memory_space<vmem>>, vector<8x128xf32>,
    %c0_127 = arith.constant 0 : index
    %c0_128 = arith.constant 0 : index
    %231 = vector.load %arg8[%c0_127, %c0_128] : memref<8x128xbf16, #tpu.memory_space<vmem>>, vector<8x128xbf16>
    tpu.vector_store %arg8[%c0_127, %c0_128], %229 {strides = array<i32>} : memref<8x128xbf16, #tpu.memory_space<vmem>>, vector<8x128xbf16>,
    %c7 = arith.constant 7 : index
    %c0_129 = arith.constant 0 : index
    %c0_130 = arith.constant 0 : index
    %232 = vector.load %arg6[%c7, %c0_129, %c0_130] : memref<16x8x128xbf16, #tpu.memory_space<vmem>>, vector<1x8x128xbf16>
    %233 = vector.shape_cast %232 : vector<1x8x128xbf16> to vector<8x128xbf16>
    %234 = vector.shape_cast %229 : vector<8x128xbf16> to vector<1x8x128xbf16>
    tpu.vector_store %arg6[%c7, %c0_129, %c0_130], %234 {strides = array<i32>} : memref<16x8x128xbf16, #tpu.memory_space<vmem>>, vector<1x8x128xbf16>,
    %c64 = arith.constant 64 : index
    %c0_131 = arith.constant 0 : index
    %235 = vector.load %arg7[%c64, %c0_131] : memref<128x512xf32, #tpu.memory_space<vmem>>, vector<8x512xf32>
    %c0_132 = arith.constant 0 : index
    %c0_133 = arith.constant 0 : index
    %236 = vector.load %arg8[%c0_132, %c0_133] : memref<8x128xbf16, #tpu.memory_space<vmem>>, vector<8x128xbf16>
    %c0_134 = arith.constant 0 : index
    %c0_135 = arith.constant 0 : index
    %237 = vector.load %arg4[%c0_134, %c0_135] : memref<128x512xbf16, #tpu.memory_space<vmem>>, vector<128x512xbf16>
    %cst_136 = arith.constant dense<0.000000e+00> : vector<8x512xf32>
    %238 = tpu.matmul %236, %237, %cst_136 {dimension_numbers = #tpu.dot_dimension_numbers<[1], [0], [0], [1], [0, 0, 1, 1], [], []>} : vector<8x128xbf16>, vector<128x512xbf16>, vector<8x512xf32> -> vector<8x512xf32>
    %239 = arith.addf %235, %238 : vector<8x512xf32>
    %240 = vector.extract_strided_slice %239 {offsets = [0, 0], sizes = [8, 384], strides = [1, 1]} : vector<8x512xf32> to vector<8x384xf32>
    %241 = arith.negf %240 : vector<8x384xf32>
    %242 = math.exp %241 : vector<8x384xf32>
    %cst_137 = arith.constant 1.000000e+00 : f32
    %243 = vector.broadcast %cst_137 : f32 to vector<8x384xf32>
    %244 = arith.addf %243, %242 : vector<8x384xf32>
    %245 = arith.divf %243, %244 : vector<8x384xf32>
    %246 = vector.extract_strided_slice %245 {offsets = [0, 0], sizes = [8, 128], strides = [1, 1]} : vector<8x384xf32> to vector<8x128xf32>
    %247 = vector.extract_strided_slice %245 {offsets = [0, 128], sizes = [8, 128], strides = [1, 1]} : vector<8x384xf32> to vector<8x128xf32>
    %248 = vector.extract_strided_slice %245 {offsets = [0, 256], sizes = [8, 128], strides = [1, 1]} : vector<8x384xf32> to vector<8x128xf32>
    %249 = vector.extract_strided_slice %239 {offsets = [0, 384], sizes = [8, 128], strides = [1, 1]} : vector<8x512xf32> to vector<8x128xf32>
    %250 = math.tanh %249 : vector<8x128xf32>
    %c0_138 = arith.constant 0 : index
    %c0_139 = arith.constant 0 : index
    %251 = vector.load %arg9[%c0_138, %c0_139] : memref<8x128xf32, #tpu.memory_space<vmem>>, vector<8x128xf32>
    %252 = arith.mulf %247, %251 : vector<8x128xf32>
    %253 = arith.mulf %246, %250 : vector<8x128xf32>
    %254 = arith.addf %252, %253 : vector<8x128xf32>
    %255 = math.tanh %254 : vector<8x128xf32>
    %256 = arith.mulf %248, %255 : vector<8x128xf32>
    %257 = arith.truncf %256 : vector<8x128xf32> to vector<8x128xbf16>
    %c0_140 = arith.constant 0 : index
    %c0_141 = arith.constant 0 : index
    %258 = vector.load %arg9[%c0_140, %c0_141] : memref<8x128xf32, #tpu.memory_space<vmem>>, vector<8x128xf32>
    tpu.vector_store %arg9[%c0_140, %c0_141], %254 {strides = array<i32>} : memref<8x128xf32, #tpu.memory_space<vmem>>, vector<8x128xf32>,
    %c0_142 = arith.constant 0 : index
    %c0_143 = arith.constant 0 : index
    %259 = vector.load %arg8[%c0_142, %c0_143] : memref<8x128xbf16, #tpu.memory_space<vmem>>, vector<8x128xbf16>
    tpu.vector_store %arg8[%c0_142, %c0_143], %257 {strides = array<i32>} : memref<8x128xbf16, #tpu.memory_space<vmem>>, vector<8x128xbf16>,
    %c8_144 = arith.constant 8 : index
    %c0_145 = arith.constant 0 : index
    %c0_146 = arith.constant 0 : index
    %260 = vector.load %arg6[%c8_144, %c0_145, %c0_146] : memref<16x8x128xbf16, #tpu.memory_space<vmem>>, vector<1x8x128xbf16>
    %261 = vector.shape_cast %260 : vector<1x8x128xbf16> to vector<8x128xbf16>
    %262 = vector.shape_cast %257 : vector<8x128xbf16> to vector<1x8x128xbf16>
    tpu.vector_store %arg6[%c8_144, %c0_145, %c0_146], %262 {strides = array<i32>} : memref<16x8x128xbf16, #tpu.memory_space<vmem>>, vector<1x8x128xbf16>,
    %c72 = arith.constant 72 : index
    %c0_147 = arith.constant 0 : index
    %263 = vector.load %arg7[%c72, %c0_147] : memref<128x512xf32, #tpu.memory_space<vmem>>, vector<8x512xf32>
    %c0_148 = arith.constant 0 : index
    %c0_149 = arith.constant 0 : index
    %264 = vector.load %arg8[%c0_148, %c0_149] : memref<8x128xbf16, #tpu.memory_space<vmem>>, vector<8x128xbf16>
    %c0_150 = arith.constant 0 : index
    %c0_151 = arith.constant 0 : index
    %265 = vector.load %arg4[%c0_150, %c0_151] : memref<128x512xbf16, #tpu.memory_space<vmem>>, vector<128x512xbf16>
    %cst_152 = arith.constant dense<0.000000e+00> : vector<8x512xf32>
    %266 = tpu.matmul %264, %265, %cst_152 {dimension_numbers = #tpu.dot_dimension_numbers<[1], [0], [0], [1], [0, 0, 1, 1], [], []>} : vector<8x128xbf16>, vector<128x512xbf16>, vector<8x512xf32> -> vector<8x512xf32>
    %267 = arith.addf %263, %266 : vector<8x512xf32>
    %268 = vector.extract_strided_slice %267 {offsets = [0, 0], sizes = [8, 384], strides = [1, 1]} : vector<8x512xf32> to vector<8x384xf32>
    %269 = arith.negf %268 : vector<8x384xf32>
    %270 = math.exp %269 : vector<8x384xf32>
    %cst_153 = arith.constant 1.000000e+00 : f32
    %271 = vector.broadcast %cst_153 : f32 to vector<8x384xf32>
    %272 = arith.addf %271, %270 : vector<8x384xf32>
    %273 = arith.divf %271, %272 : vector<8x384xf32>
    %274 = vector.extract_strided_slice %273 {offsets = [0, 0], sizes = [8, 128], strides = [1, 1]} : vector<8x384xf32> to vector<8x128xf32>
    %275 = vector.extract_strided_slice %273 {offsets = [0, 128], sizes = [8, 128], strides = [1, 1]} : vector<8x384xf32> to vector<8x128xf32>
    %276 = vector.extract_strided_slice %273 {offsets = [0, 256], sizes = [8, 128], strides = [1, 1]} : vector<8x384xf32> to vector<8x128xf32>
    %277 = vector.extract_strided_slice %267 {offsets = [0, 384], sizes = [8, 128], strides = [1, 1]} : vector<8x512xf32> to vector<8x128xf32>
    %278 = math.tanh %277 : vector<8x128xf32>
    %c0_154 = arith.constant 0 : index
    %c0_155 = arith.constant 0 : index
    %279 = vector.load %arg9[%c0_154, %c0_155] : memref<8x128xf32, #tpu.memory_space<vmem>>, vector<8x128xf32>
    %280 = arith.mulf %275, %279 : vector<8x128xf32>
    %281 = arith.mulf %274, %278 : vector<8x128xf32>
    %282 = arith.addf %280, %281 : vector<8x128xf32>
    %283 = math.tanh %282 : vector<8x128xf32>
    %284 = arith.mulf %276, %283 : vector<8x128xf32>
    %285 = arith.truncf %284 : vector<8x128xf32> to vector<8x128xbf16>
    %c0_156 = arith.constant 0 : index
    %c0_157 = arith.constant 0 : index
    %286 = vector.load %arg9[%c0_156, %c0_157] : memref<8x128xf32, #tpu.memory_space<vmem>>, vector<8x128xf32>
    tpu.vector_store %arg9[%c0_156, %c0_157], %282 {strides = array<i32>} : memref<8x128xf32, #tpu.memory_space<vmem>>, vector<8x128xf32>,
    %c0_158 = arith.constant 0 : index
    %c0_159 = arith.constant 0 : index
    %287 = vector.load %arg8[%c0_158, %c0_159] : memref<8x128xbf16, #tpu.memory_space<vmem>>, vector<8x128xbf16>
    tpu.vector_store %arg8[%c0_158, %c0_159], %285 {strides = array<i32>} : memref<8x128xbf16, #tpu.memory_space<vmem>>, vector<8x128xbf16>,
    %c9 = arith.constant 9 : index
    %c0_160 = arith.constant 0 : index
    %c0_161 = arith.constant 0 : index
    %288 = vector.load %arg6[%c9, %c0_160, %c0_161] : memref<16x8x128xbf16, #tpu.memory_space<vmem>>, vector<1x8x128xbf16>
    %289 = vector.shape_cast %288 : vector<1x8x128xbf16> to vector<8x128xbf16>
    %290 = vector.shape_cast %285 : vector<8x128xbf16> to vector<1x8x128xbf16>
    tpu.vector_store %arg6[%c9, %c0_160, %c0_161], %290 {strides = array<i32>} : memref<16x8x128xbf16, #tpu.memory_space<vmem>>, vector<1x8x128xbf16>,
    %c80 = arith.constant 80 : index
    %c0_162 = arith.constant 0 : index
    %291 = vector.load %arg7[%c80, %c0_162] : memref<128x512xf32, #tpu.memory_space<vmem>>, vector<8x512xf32>
    %c0_163 = arith.constant 0 : index
    %c0_164 = arith.constant 0 : index
    %292 = vector.load %arg8[%c0_163, %c0_164] : memref<8x128xbf16, #tpu.memory_space<vmem>>, vector<8x128xbf16>
    %c0_165 = arith.constant 0 : index
    %c0_166 = arith.constant 0 : index
    %293 = vector.load %arg4[%c0_165, %c0_166] : memref<128x512xbf16, #tpu.memory_space<vmem>>, vector<128x512xbf16>
    %cst_167 = arith.constant dense<0.000000e+00> : vector<8x512xf32>
    %294 = tpu.matmul %292, %293, %cst_167 {dimension_numbers = #tpu.dot_dimension_numbers<[1], [0], [0], [1], [0, 0, 1, 1], [], []>} : vector<8x128xbf16>, vector<128x512xbf16>, vector<8x512xf32> -> vector<8x512xf32>
    %295 = arith.addf %291, %294 : vector<8x512xf32>
    %296 = vector.extract_strided_slice %295 {offsets = [0, 0], sizes = [8, 384], strides = [1, 1]} : vector<8x512xf32> to vector<8x384xf32>
    %297 = arith.negf %296 : vector<8x384xf32>
    %298 = math.exp %297 : vector<8x384xf32>
    %cst_168 = arith.constant 1.000000e+00 : f32
    %299 = vector.broadcast %cst_168 : f32 to vector<8x384xf32>
    %300 = arith.addf %299, %298 : vector<8x384xf32>
    %301 = arith.divf %299, %300 : vector<8x384xf32>
    %302 = vector.extract_strided_slice %301 {offsets = [0, 0], sizes = [8, 128], strides = [1, 1]} : vector<8x384xf32> to vector<8x128xf32>
    %303 = vector.extract_strided_slice %301 {offsets = [0, 128], sizes = [8, 128], strides = [1, 1]} : vector<8x384xf32> to vector<8x128xf32>
    %304 = vector.extract_strided_slice %301 {offsets = [0, 256], sizes = [8, 128], strides = [1, 1]} : vector<8x384xf32> to vector<8x128xf32>
    %305 = vector.extract_strided_slice %295 {offsets = [0, 384], sizes = [8, 128], strides = [1, 1]} : vector<8x512xf32> to vector<8x128xf32>
    %306 = math.tanh %305 : vector<8x128xf32>
    %c0_169 = arith.constant 0 : index
    %c0_170 = arith.constant 0 : index
    %307 = vector.load %arg9[%c0_169, %c0_170] : memref<8x128xf32, #tpu.memory_space<vmem>>, vector<8x128xf32>
    %308 = arith.mulf %303, %307 : vector<8x128xf32>
    %309 = arith.mulf %302, %306 : vector<8x128xf32>
    %310 = arith.addf %308, %309 : vector<8x128xf32>
    %311 = math.tanh %310 : vector<8x128xf32>
    %312 = arith.mulf %304, %311 : vector<8x128xf32>
    %313 = arith.truncf %312 : vector<8x128xf32> to vector<8x128xbf16>
    %c0_171 = arith.constant 0 : index
    %c0_172 = arith.constant 0 : index
    %314 = vector.load %arg9[%c0_171, %c0_172] : memref<8x128xf32, #tpu.memory_space<vmem>>, vector<8x128xf32>
    tpu.vector_store %arg9[%c0_171, %c0_172], %310 {strides = array<i32>} : memref<8x128xf32, #tpu.memory_space<vmem>>, vector<8x128xf32>,
    %c0_173 = arith.constant 0 : index
    %c0_174 = arith.constant 0 : index
    %315 = vector.load %arg8[%c0_173, %c0_174] : memref<8x128xbf16, #tpu.memory_space<vmem>>, vector<8x128xbf16>
    tpu.vector_store %arg8[%c0_173, %c0_174], %313 {strides = array<i32>} : memref<8x128xbf16, #tpu.memory_space<vmem>>, vector<8x128xbf16>,
    %c10 = arith.constant 10 : index
    %c0_175 = arith.constant 0 : index
    %c0_176 = arith.constant 0 : index
    %316 = vector.load %arg6[%c10, %c0_175, %c0_176] : memref<16x8x128xbf16, #tpu.memory_space<vmem>>, vector<1x8x128xbf16>
    %317 = vector.shape_cast %316 : vector<1x8x128xbf16> to vector<8x128xbf16>
    %318 = vector.shape_cast %313 : vector<8x128xbf16> to vector<1x8x128xbf16>
    tpu.vector_store %arg6[%c10, %c0_175, %c0_176], %318 {strides = array<i32>} : memref<16x8x128xbf16, #tpu.memory_space<vmem>>, vector<1x8x128xbf16>,
    %c88 = arith.constant 88 : index
    %c0_177 = arith.constant 0 : index
    %319 = vector.load %arg7[%c88, %c0_177] : memref<128x512xf32, #tpu.memory_space<vmem>>, vector<8x512xf32>
    %c0_178 = arith.constant 0 : index
    %c0_179 = arith.constant 0 : index
    %320 = vector.load %arg8[%c0_178, %c0_179] : memref<8x128xbf16, #tpu.memory_space<vmem>>, vector<8x128xbf16>
    %c0_180 = arith.constant 0 : index
    %c0_181 = arith.constant 0 : index
    %321 = vector.load %arg4[%c0_180, %c0_181] : memref<128x512xbf16, #tpu.memory_space<vmem>>, vector<128x512xbf16>
    %cst_182 = arith.constant dense<0.000000e+00> : vector<8x512xf32>
    %322 = tpu.matmul %320, %321, %cst_182 {dimension_numbers = #tpu.dot_dimension_numbers<[1], [0], [0], [1], [0, 0, 1, 1], [], []>} : vector<8x128xbf16>, vector<128x512xbf16>, vector<8x512xf32> -> vector<8x512xf32>
    %323 = arith.addf %319, %322 : vector<8x512xf32>
    %324 = vector.extract_strided_slice %323 {offsets = [0, 0], sizes = [8, 384], strides = [1, 1]} : vector<8x512xf32> to vector<8x384xf32>
    %325 = arith.negf %324 : vector<8x384xf32>
    %326 = math.exp %325 : vector<8x384xf32>
    %cst_183 = arith.constant 1.000000e+00 : f32
    %327 = vector.broadcast %cst_183 : f32 to vector<8x384xf32>
    %328 = arith.addf %327, %326 : vector<8x384xf32>
    %329 = arith.divf %327, %328 : vector<8x384xf32>
    %330 = vector.extract_strided_slice %329 {offsets = [0, 0], sizes = [8, 128], strides = [1, 1]} : vector<8x384xf32> to vector<8x128xf32>
    %331 = vector.extract_strided_slice %329 {offsets = [0, 128], sizes = [8, 128], strides = [1, 1]} : vector<8x384xf32> to vector<8x128xf32>
    %332 = vector.extract_strided_slice %329 {offsets = [0, 256], sizes = [8, 128], strides = [1, 1]} : vector<8x384xf32> to vector<8x128xf32>
    %333 = vector.extract_strided_slice %323 {offsets = [0, 384], sizes = [8, 128], strides = [1, 1]} : vector<8x512xf32> to vector<8x128xf32>
    %334 = math.tanh %333 : vector<8x128xf32>
    %c0_184 = arith.constant 0 : index
    %c0_185 = arith.constant 0 : index
    %335 = vector.load %arg9[%c0_184, %c0_185] : memref<8x128xf32, #tpu.memory_space<vmem>>, vector<8x128xf32>
    %336 = arith.mulf %331, %335 : vector<8x128xf32>
    %337 = arith.mulf %330, %334 : vector<8x128xf32>
    %338 = arith.addf %336, %337 : vector<8x128xf32>
    %339 = math.tanh %338 : vector<8x128xf32>
    %340 = arith.mulf %332, %339 : vector<8x128xf32>
    %341 = arith.truncf %340 : vector<8x128xf32> to vector<8x128xbf16>
    %c0_186 = arith.constant 0 : index
    %c0_187 = arith.constant 0 : index
    %342 = vector.load %arg9[%c0_186, %c0_187] : memref<8x128xf32, #tpu.memory_space<vmem>>, vector<8x128xf32>
    tpu.vector_store %arg9[%c0_186, %c0_187], %338 {strides = array<i32>} : memref<8x128xf32, #tpu.memory_space<vmem>>, vector<8x128xf32>,
    %c0_188 = arith.constant 0 : index
    %c0_189 = arith.constant 0 : index
    %343 = vector.load %arg8[%c0_188, %c0_189] : memref<8x128xbf16, #tpu.memory_space<vmem>>, vector<8x128xbf16>
    tpu.vector_store %arg8[%c0_188, %c0_189], %341 {strides = array<i32>} : memref<8x128xbf16, #tpu.memory_space<vmem>>, vector<8x128xbf16>,
    %c11 = arith.constant 11 : index
    %c0_190 = arith.constant 0 : index
    %c0_191 = arith.constant 0 : index
    %344 = vector.load %arg6[%c11, %c0_190, %c0_191] : memref<16x8x128xbf16, #tpu.memory_space<vmem>>, vector<1x8x128xbf16>
    %345 = vector.shape_cast %344 : vector<1x8x128xbf16> to vector<8x128xbf16>
    %346 = vector.shape_cast %341 : vector<8x128xbf16> to vector<1x8x128xbf16>
    tpu.vector_store %arg6[%c11, %c0_190, %c0_191], %346 {strides = array<i32>} : memref<16x8x128xbf16, #tpu.memory_space<vmem>>, vector<1x8x128xbf16>,
    %c96 = arith.constant 96 : index
    %c0_192 = arith.constant 0 : index
    %347 = vector.load %arg7[%c96, %c0_192] : memref<128x512xf32, #tpu.memory_space<vmem>>, vector<8x512xf32>
    %c0_193 = arith.constant 0 : index
    %c0_194 = arith.constant 0 : index
    %348 = vector.load %arg8[%c0_193, %c0_194] : memref<8x128xbf16, #tpu.memory_space<vmem>>, vector<8x128xbf16>
    %c0_195 = arith.constant 0 : index
    %c0_196 = arith.constant 0 : index
    %349 = vector.load %arg4[%c0_195, %c0_196] : memref<128x512xbf16, #tpu.memory_space<vmem>>, vector<128x512xbf16>
    %cst_197 = arith.constant dense<0.000000e+00> : vector<8x512xf32>
    %350 = tpu.matmul %348, %349, %cst_197 {dimension_numbers = #tpu.dot_dimension_numbers<[1], [0], [0], [1], [0, 0, 1, 1], [], []>} : vector<8x128xbf16>, vector<128x512xbf16>, vector<8x512xf32> -> vector<8x512xf32>
    %351 = arith.addf %347, %350 : vector<8x512xf32>
    %352 = vector.extract_strided_slice %351 {offsets = [0, 0], sizes = [8, 384], strides = [1, 1]} : vector<8x512xf32> to vector<8x384xf32>
    %353 = arith.negf %352 : vector<8x384xf32>
    %354 = math.exp %353 : vector<8x384xf32>
    %cst_198 = arith.constant 1.000000e+00 : f32
    %355 = vector.broadcast %cst_198 : f32 to vector<8x384xf32>
    %356 = arith.addf %355, %354 : vector<8x384xf32>
    %357 = arith.divf %355, %356 : vector<8x384xf32>
    %358 = vector.extract_strided_slice %357 {offsets = [0, 0], sizes = [8, 128], strides = [1, 1]} : vector<8x384xf32> to vector<8x128xf32>
    %359 = vector.extract_strided_slice %357 {offsets = [0, 128], sizes = [8, 128], strides = [1, 1]} : vector<8x384xf32> to vector<8x128xf32>
    %360 = vector.extract_strided_slice %357 {offsets = [0, 256], sizes = [8, 128], strides = [1, 1]} : vector<8x384xf32> to vector<8x128xf32>
    %361 = vector.extract_strided_slice %351 {offsets = [0, 384], sizes = [8, 128], strides = [1, 1]} : vector<8x512xf32> to vector<8x128xf32>
    %362 = math.tanh %361 : vector<8x128xf32>
    %c0_199 = arith.constant 0 : index
    %c0_200 = arith.constant 0 : index
    %363 = vector.load %arg9[%c0_199, %c0_200] : memref<8x128xf32, #tpu.memory_space<vmem>>, vector<8x128xf32>
    %364 = arith.mulf %359, %363 : vector<8x128xf32>
    %365 = arith.mulf %358, %362 : vector<8x128xf32>
    %366 = arith.addf %364, %365 : vector<8x128xf32>
    %367 = math.tanh %366 : vector<8x128xf32>
    %368 = arith.mulf %360, %367 : vector<8x128xf32>
    %369 = arith.truncf %368 : vector<8x128xf32> to vector<8x128xbf16>
    %c0_201 = arith.constant 0 : index
    %c0_202 = arith.constant 0 : index
    %370 = vector.load %arg9[%c0_201, %c0_202] : memref<8x128xf32, #tpu.memory_space<vmem>>, vector<8x128xf32>
    tpu.vector_store %arg9[%c0_201, %c0_202], %366 {strides = array<i32>} : memref<8x128xf32, #tpu.memory_space<vmem>>, vector<8x128xf32>,
    %c0_203 = arith.constant 0 : index
    %c0_204 = arith.constant 0 : index
    %371 = vector.load %arg8[%c0_203, %c0_204] : memref<8x128xbf16, #tpu.memory_space<vmem>>, vector<8x128xbf16>
    tpu.vector_store %arg8[%c0_203, %c0_204], %369 {strides = array<i32>} : memref<8x128xbf16, #tpu.memory_space<vmem>>, vector<8x128xbf16>,
    %c12 = arith.constant 12 : index
    %c0_205 = arith.constant 0 : index
    %c0_206 = arith.constant 0 : index
    %372 = vector.load %arg6[%c12, %c0_205, %c0_206] : memref<16x8x128xbf16, #tpu.memory_space<vmem>>, vector<1x8x128xbf16>
    %373 = vector.shape_cast %372 : vector<1x8x128xbf16> to vector<8x128xbf16>
    %374 = vector.shape_cast %369 : vector<8x128xbf16> to vector<1x8x128xbf16>
    tpu.vector_store %arg6[%c12, %c0_205, %c0_206], %374 {strides = array<i32>} : memref<16x8x128xbf16, #tpu.memory_space<vmem>>, vector<1x8x128xbf16>,
    %c104 = arith.constant 104 : index
    %c0_207 = arith.constant 0 : index
    %375 = vector.load %arg7[%c104, %c0_207] : memref<128x512xf32, #tpu.memory_space<vmem>>, vector<8x512xf32>
    %c0_208 = arith.constant 0 : index
    %c0_209 = arith.constant 0 : index
    %376 = vector.load %arg8[%c0_208, %c0_209] : memref<8x128xbf16, #tpu.memory_space<vmem>>, vector<8x128xbf16>
    %c0_210 = arith.constant 0 : index
    %c0_211 = arith.constant 0 : index
    %377 = vector.load %arg4[%c0_210, %c0_211] : memref<128x512xbf16, #tpu.memory_space<vmem>>, vector<128x512xbf16>
    %cst_212 = arith.constant dense<0.000000e+00> : vector<8x512xf32>
    %378 = tpu.matmul %376, %377, %cst_212 {dimension_numbers = #tpu.dot_dimension_numbers<[1], [0], [0], [1], [0, 0, 1, 1], [], []>} : vector<8x128xbf16>, vector<128x512xbf16>, vector<8x512xf32> -> vector<8x512xf32>
    %379 = arith.addf %375, %378 : vector<8x512xf32>
    %380 = vector.extract_strided_slice %379 {offsets = [0, 0], sizes = [8, 384], strides = [1, 1]} : vector<8x512xf32> to vector<8x384xf32>
    %381 = arith.negf %380 : vector<8x384xf32>
    %382 = math.exp %381 : vector<8x384xf32>
    %cst_213 = arith.constant 1.000000e+00 : f32
    %383 = vector.broadcast %cst_213 : f32 to vector<8x384xf32>
    %384 = arith.addf %383, %382 : vector<8x384xf32>
    %385 = arith.divf %383, %384 : vector<8x384xf32>
    %386 = vector.extract_strided_slice %385 {offsets = [0, 0], sizes = [8, 128], strides = [1, 1]} : vector<8x384xf32> to vector<8x128xf32>
    %387 = vector.extract_strided_slice %385 {offsets = [0, 128], sizes = [8, 128], strides = [1, 1]} : vector<8x384xf32> to vector<8x128xf32>
    %388 = vector.extract_strided_slice %385 {offsets = [0, 256], sizes = [8, 128], strides = [1, 1]} : vector<8x384xf32> to vector<8x128xf32>
    %389 = vector.extract_strided_slice %379 {offsets = [0, 384], sizes = [8, 128], strides = [1, 1]} : vector<8x512xf32> to vector<8x128xf32>
    %390 = math.tanh %389 : vector<8x128xf32>
    %c0_214 = arith.constant 0 : index
    %c0_215 = arith.constant 0 : index
    %391 = vector.load %arg9[%c0_214, %c0_215] : memref<8x128xf32, #tpu.memory_space<vmem>>, vector<8x128xf32>
    %392 = arith.mulf %387, %391 : vector<8x128xf32>
    %393 = arith.mulf %386, %390 : vector<8x128xf32>
    %394 = arith.addf %392, %393 : vector<8x128xf32>
    %395 = math.tanh %394 : vector<8x128xf32>
    %396 = arith.mulf %388, %395 : vector<8x128xf32>
    %397 = arith.truncf %396 : vector<8x128xf32> to vector<8x128xbf16>
    %c0_216 = arith.constant 0 : index
    %c0_217 = arith.constant 0 : index
    %398 = vector.load %arg9[%c0_216, %c0_217] : memref<8x128xf32, #tpu.memory_space<vmem>>, vector<8x128xf32>
    tpu.vector_store %arg9[%c0_216, %c0_217], %394 {strides = array<i32>} : memref<8x128xf32, #tpu.memory_space<vmem>>, vector<8x128xf32>,
    %c0_218 = arith.constant 0 : index
    %c0_219 = arith.constant 0 : index
    %399 = vector.load %arg8[%c0_218, %c0_219] : memref<8x128xbf16, #tpu.memory_space<vmem>>, vector<8x128xbf16>
    tpu.vector_store %arg8[%c0_218, %c0_219], %397 {strides = array<i32>} : memref<8x128xbf16, #tpu.memory_space<vmem>>, vector<8x128xbf16>,
    %c13 = arith.constant 13 : index
    %c0_220 = arith.constant 0 : index
    %c0_221 = arith.constant 0 : index
    %400 = vector.load %arg6[%c13, %c0_220, %c0_221] : memref<16x8x128xbf16, #tpu.memory_space<vmem>>, vector<1x8x128xbf16>
    %401 = vector.shape_cast %400 : vector<1x8x128xbf16> to vector<8x128xbf16>
    %402 = vector.shape_cast %397 : vector<8x128xbf16> to vector<1x8x128xbf16>
    tpu.vector_store %arg6[%c13, %c0_220, %c0_221], %402 {strides = array<i32>} : memref<16x8x128xbf16, #tpu.memory_space<vmem>>, vector<1x8x128xbf16>,
    %c112 = arith.constant 112 : index
    %c0_222 = arith.constant 0 : index
    %403 = vector.load %arg7[%c112, %c0_222] : memref<128x512xf32, #tpu.memory_space<vmem>>, vector<8x512xf32>
    %c0_223 = arith.constant 0 : index
    %c0_224 = arith.constant 0 : index
    %404 = vector.load %arg8[%c0_223, %c0_224] : memref<8x128xbf16, #tpu.memory_space<vmem>>, vector<8x128xbf16>
    %c0_225 = arith.constant 0 : index
    %c0_226 = arith.constant 0 : index
    %405 = vector.load %arg4[%c0_225, %c0_226] : memref<128x512xbf16, #tpu.memory_space<vmem>>, vector<128x512xbf16>
    %cst_227 = arith.constant dense<0.000000e+00> : vector<8x512xf32>
    %406 = tpu.matmul %404, %405, %cst_227 {dimension_numbers = #tpu.dot_dimension_numbers<[1], [0], [0], [1], [0, 0, 1, 1], [], []>} : vector<8x128xbf16>, vector<128x512xbf16>, vector<8x512xf32> -> vector<8x512xf32>
    %407 = arith.addf %403, %406 : vector<8x512xf32>
    %408 = vector.extract_strided_slice %407 {offsets = [0, 0], sizes = [8, 384], strides = [1, 1]} : vector<8x512xf32> to vector<8x384xf32>
    %409 = arith.negf %408 : vector<8x384xf32>
    %410 = math.exp %409 : vector<8x384xf32>
    %cst_228 = arith.constant 1.000000e+00 : f32
    %411 = vector.broadcast %cst_228 : f32 to vector<8x384xf32>
    %412 = arith.addf %411, %410 : vector<8x384xf32>
    %413 = arith.divf %411, %412 : vector<8x384xf32>
    %414 = vector.extract_strided_slice %413 {offsets = [0, 0], sizes = [8, 128], strides = [1, 1]} : vector<8x384xf32> to vector<8x128xf32>
    %415 = vector.extract_strided_slice %413 {offsets = [0, 128], sizes = [8, 128], strides = [1, 1]} : vector<8x384xf32> to vector<8x128xf32>
    %416 = vector.extract_strided_slice %413 {offsets = [0, 256], sizes = [8, 128], strides = [1, 1]} : vector<8x384xf32> to vector<8x128xf32>
    %417 = vector.extract_strided_slice %407 {offsets = [0, 384], sizes = [8, 128], strides = [1, 1]} : vector<8x512xf32> to vector<8x128xf32>
    %418 = math.tanh %417 : vector<8x128xf32>
    %c0_229 = arith.constant 0 : index
    %c0_230 = arith.constant 0 : index
    %419 = vector.load %arg9[%c0_229, %c0_230] : memref<8x128xf32, #tpu.memory_space<vmem>>, vector<8x128xf32>
    %420 = arith.mulf %415, %419 : vector<8x128xf32>
    %421 = arith.mulf %414, %418 : vector<8x128xf32>
    %422 = arith.addf %420, %421 : vector<8x128xf32>
    %423 = math.tanh %422 : vector<8x128xf32>
    %424 = arith.mulf %416, %423 : vector<8x128xf32>
    %425 = arith.truncf %424 : vector<8x128xf32> to vector<8x128xbf16>
    %c0_231 = arith.constant 0 : index
    %c0_232 = arith.constant 0 : index
    %426 = vector.load %arg9[%c0_231, %c0_232] : memref<8x128xf32, #tpu.memory_space<vmem>>, vector<8x128xf32>
    tpu.vector_store %arg9[%c0_231, %c0_232], %422 {strides = array<i32>} : memref<8x128xf32, #tpu.memory_space<vmem>>, vector<8x128xf32>,
    %c0_233 = arith.constant 0 : index
    %c0_234 = arith.constant 0 : index
    %427 = vector.load %arg8[%c0_233, %c0_234] : memref<8x128xbf16, #tpu.memory_space<vmem>>, vector<8x128xbf16>
    tpu.vector_store %arg8[%c0_233, %c0_234], %425 {strides = array<i32>} : memref<8x128xbf16, #tpu.memory_space<vmem>>, vector<8x128xbf16>,
    %c14 = arith.constant 14 : index
    %c0_235 = arith.constant 0 : index
    %c0_236 = arith.constant 0 : index
    %428 = vector.load %arg6[%c14, %c0_235, %c0_236] : memref<16x8x128xbf16, #tpu.memory_space<vmem>>, vector<1x8x128xbf16>
    %429 = vector.shape_cast %428 : vector<1x8x128xbf16> to vector<8x128xbf16>
    %430 = vector.shape_cast %425 : vector<8x128xbf16> to vector<1x8x128xbf16>
    tpu.vector_store %arg6[%c14, %c0_235, %c0_236], %430 {strides = array<i32>} : memref<16x8x128xbf16, #tpu.memory_space<vmem>>, vector<1x8x128xbf16>,
    %c120 = arith.constant 120 : index
    %c0_237 = arith.constant 0 : index
    %431 = vector.load %arg7[%c120, %c0_237] : memref<128x512xf32, #tpu.memory_space<vmem>>, vector<8x512xf32>
    %c0_238 = arith.constant 0 : index
    %c0_239 = arith.constant 0 : index
    %432 = vector.load %arg8[%c0_238, %c0_239] : memref<8x128xbf16, #tpu.memory_space<vmem>>, vector<8x128xbf16>
    %c0_240 = arith.constant 0 : index
    %c0_241 = arith.constant 0 : index
    %433 = vector.load %arg4[%c0_240, %c0_241] : memref<128x512xbf16, #tpu.memory_space<vmem>>, vector<128x512xbf16>
    %cst_242 = arith.constant dense<0.000000e+00> : vector<8x512xf32>
    %434 = tpu.matmul %432, %433, %cst_242 {dimension_numbers = #tpu.dot_dimension_numbers<[1], [0], [0], [1], [0, 0, 1, 1], [], []>} : vector<8x128xbf16>, vector<128x512xbf16>, vector<8x512xf32> -> vector<8x512xf32>
    %435 = arith.addf %431, %434 : vector<8x512xf32>
    %436 = vector.extract_strided_slice %435 {offsets = [0, 0], sizes = [8, 384], strides = [1, 1]} : vector<8x512xf32> to vector<8x384xf32>
    %437 = arith.negf %436 : vector<8x384xf32>
    %438 = math.exp %437 : vector<8x384xf32>
    %cst_243 = arith.constant 1.000000e+00 : f32
    %439 = vector.broadcast %cst_243 : f32 to vector<8x384xf32>
    %440 = arith.addf %439, %438 : vector<8x384xf32>
    %441 = arith.divf %439, %440 : vector<8x384xf32>
    %442 = vector.extract_strided_slice %441 {offsets = [0, 0], sizes = [8, 128], strides = [1, 1]} : vector<8x384xf32> to vector<8x128xf32>
    %443 = vector.extract_strided_slice %441 {offsets = [0, 128], sizes = [8, 128], strides = [1, 1]} : vector<8x384xf32> to vector<8x128xf32>
    %444 = vector.extract_strided_slice %441 {offsets = [0, 256], sizes = [8, 128], strides = [1, 1]} : vector<8x384xf32> to vector<8x128xf32>
    %445 = vector.extract_strided_slice %435 {offsets = [0, 384], sizes = [8, 128], strides = [1, 1]} : vector<8x512xf32> to vector<8x128xf32>
    %446 = math.tanh %445 : vector<8x128xf32>
    %c0_244 = arith.constant 0 : index
    %c0_245 = arith.constant 0 : index
    %447 = vector.load %arg9[%c0_244, %c0_245] : memref<8x128xf32, #tpu.memory_space<vmem>>, vector<8x128xf32>
    %448 = arith.mulf %443, %447 : vector<8x128xf32>
    %449 = arith.mulf %442, %446 : vector<8x128xf32>
    %450 = arith.addf %448, %449 : vector<8x128xf32>
    %451 = math.tanh %450 : vector<8x128xf32>
    %452 = arith.mulf %444, %451 : vector<8x128xf32>
    %453 = arith.truncf %452 : vector<8x128xf32> to vector<8x128xbf16>
    %c0_246 = arith.constant 0 : index
    %c0_247 = arith.constant 0 : index
    %454 = vector.load %arg9[%c0_246, %c0_247] : memref<8x128xf32, #tpu.memory_space<vmem>>, vector<8x128xf32>
    tpu.vector_store %arg9[%c0_246, %c0_247], %450 {strides = array<i32>} : memref<8x128xf32, #tpu.memory_space<vmem>>, vector<8x128xf32>,
    %c0_248 = arith.constant 0 : index
    %c0_249 = arith.constant 0 : index
    %455 = vector.load %arg8[%c0_248, %c0_249] : memref<8x128xbf16, #tpu.memory_space<vmem>>, vector<8x128xbf16>
    tpu.vector_store %arg8[%c0_248, %c0_249], %453 {strides = array<i32>} : memref<8x128xbf16, #tpu.memory_space<vmem>>, vector<8x128xbf16>,
    %c15 = arith.constant 15 : index
    %c0_250 = arith.constant 0 : index
    %c0_251 = arith.constant 0 : index
    %456 = vector.load %arg6[%c15, %c0_250, %c0_251] : memref<16x8x128xbf16, #tpu.memory_space<vmem>>, vector<1x8x128xbf16>
    %457 = vector.shape_cast %456 : vector<1x8x128xbf16> to vector<8x128xbf16>
    %458 = vector.shape_cast %453 : vector<8x128xbf16> to vector<1x8x128xbf16>
    tpu.vector_store %arg6[%c15, %c0_250, %c0_251], %458 {strides = array<i32>} : memref<16x8x128xbf16, #tpu.memory_space<vmem>>, vector<1x8x128xbf16>,
    return
  }
  func.func @transform_0(%arg0: i32, %arg1: i32) -> (i32, i32, i32) {
    %c0_i32 = arith.constant 0 : i32
    %c0_i32_0 = arith.constant 0 : i32
    return %arg1, %arg0, %c0_i32 : i32, i32, i32
  }
  func.func @transform_1(%arg0: i32, %arg1: i32) -> (i32, i32) {
    %c0_i32 = arith.constant 0 : i32
    %c0_i32_0 = arith.constant 0 : i32
    %c0_i32_1 = arith.constant 0 : i32
    return %c0_i32, %c0_i32_0 : i32, i32
  }
  func.func @transform_2(%arg0: i32, %arg1: i32) -> (i32, i32) {
    %c0_i32 = arith.constant 0 : i32
    %c0_i32_0 = arith.constant 0 : i32
    %c0_i32_1 = arith.constant 0 : i32
    return %c0_i32, %c0_i32_0 : i32, i32
  }
  func.func @transform_3(%arg0: i32, %arg1: i32) -> (i32, i32) {
    %c0_i32 = arith.constant 0 : i32
    %c0_i32_0 = arith.constant 0 : i32
    %c0_i32_1 = arith.constant 0 : i32
    return %c0_i32, %c0_i32_0 : i32, i32
  }
  func.func @transform_4(%arg0: i32, %arg1: i32) -> (i32, i32, i32) {
    %c0_i32 = arith.constant 0 : i32
    %c0_i32_0 = arith.constant 0 : i32
    return %arg1, %arg0, %c0_i32 : i32, i32, i32
  }
}

</mosaic_0001>

<bundles_post_ra>
// kernel: lm_lstm_forward.3
= control target key start
LH: loop header
LB: loop body
LE: loop exit
PB: predicated region body
PF: predicated region fallthrough
CT: control target
= control target key end

     0   :  { %s689_s1 = inlined_call_operand.vmem [shape: bf16[128,128], index: 1, kind: input, shape index: {}]   ;;  %s690_s0 = inlined_call_operand.vmem [shape: bf16[128,128], index: 0, kind: input, shape index: {}]   ;;  %s691_s2 = inlined_call_operand.vmem [shape: f32[1,128], index: 2, kind: input, shape index: {}]   ;;  %s692_s3 = inlined_call_operand.vmem [shape: bf16[128,128], index: 3, kind: output, shape index: {}]  }
   0x1   :  { %v578_v0 = vld [vmem:[%s689_s1] sm:$0xff]   ;;  %v579_v1 = vld [vmem:[%s689_s1 + $0x8] sm:$0xff]   ;;  %v580_v2 = vld [vmem:[%s689_s1 + $0x10] sm:$0xff]  }
   0x2   :  { %530 = vmatprep.subr.bf16.mxu0 %v578_v0  ;;  %562 = vmatprep.subr.bf16.mxu1 %v578_v0  ;;  %v581_v3 = vld [vmem:[%s689_s1 + $0x18] sm:$0xff]   ;;  %v586_v4 = vld [vmem:[%s690_s0] sm:$0xff]   ;;  %v583_v7 = vld [vmem:[%s689_s1 + $0x28] sm:$0xff]  }
   0x3   :  { %531 = vmatpush3.bf16.msra.mxu0 %v578_v0  ;;  %570 = vmatpush3.bf16.msra.mxu1 %v578_v0  ;;  %v587_v5 = vld [vmem:[%s690_s0 + $0x20] sm:$0xff]   ;;  %v584_v8 = vld [vmem:[%s689_s1 + $0x30] sm:$0xff]   ;;  %v585_v9 = vld [vmem:[%s689_s1 + $0x38] sm:$0xff]  }
   0x4   :  { %532 = vmatprep.subr.bf16.mxu0 %v579_v1  ;;  %563 = vmatprep.subr.bf16.mxu1 %v579_v1  ;;  %v582_v6 = vld [vmem:[%s689_s1 + $0x20] sm:$0xff]   ;;  %v588_v10 = vld [vmem:[%s690_s0 + $0x8] sm:$0xff]   ;;  %v590_v12 = vld [vmem:[%s690_s0 + $0x10] sm:$0xff]  }
   0x5   :  { %546 = vmatprep.mubr.bf16.mxu0 %v586_v4  ;;  %554 = vmatprep.mubr.bf16.mxu1 %v587_v5  ;;  %v589_v11 = vld [vmem:[%s690_s0 + $0x28] sm:$0xff]   ;;  %v591_v13 = vld [vmem:[%s690_s0 + $0x30] sm:$0xff]   ;;  %v592_v14 = vld [vmem:[%s690_s0 + $0x18] sm:$0xff]  }
   0x6   :  { %v593_v15 = vld [vmem:[%s690_s0 + $0x38] sm:$0xff]   ;;  %v418_v16 = vld [vmem:[%s691_s2] ss:$0 sm:$0xff] }
   0x7   :  { %533 = vmatpush3.bf16.msra.mxu0 %v579_v1  ;;  %571 = vmatpush3.bf16.msra.mxu1 %v579_v1 }
   0x8   :  { %534 = vmatprep.subr.bf16.mxu0 %v580_v2  ;;  %564 = vmatprep.subr.bf16.mxu1 %v580_v2 }
   0xb   :  { %535 = vmatpush3.bf16.msra.mxu0 %v580_v2  ;;  %572 = vmatpush3.bf16.msra.mxu1 %v580_v2 }
   0xc   :  { %536 = vmatprep.subr.bf16.mxu0 %v581_v3  ;;  %565 = vmatprep.subr.bf16.mxu1 %v581_v3 }
   0xf   :  { %537 = vmatpush3.bf16.msra.mxu0 %v581_v3  ;;  %573 = vmatpush3.bf16.msra.mxu1 %v581_v3 }
  0x10   :  { %538 = vmatprep.subr.bf16.mxu0 %v582_v6  ;;  %566 = vmatprep.subr.bf16.mxu1 %v582_v6 }
  0x13   :  { %539 = vmatpush3.bf16.msra.mxu0 %v582_v6  ;;  %574 = vmatpush3.bf16.msra.mxu1 %v582_v6 }
  0x14   :  { %540 = vmatprep.subr.bf16.mxu0 %v583_v7  ;;  %567 = vmatprep.subr.bf16.mxu1 %v583_v7 }
  0x17   :  { %541 = vmatpush3.bf16.msra.mxu0 %v583_v7  ;;  %575 = vmatpush3.bf16.msra.mxu1 %v583_v7 }
  0x18   :  { %542 = vmatprep.subr.bf16.mxu0 %v584_v8  ;;  %568 = vmatprep.subr.bf16.mxu1 %v584_v8 }
  0x1b   :  { %543 = vmatpush3.bf16.msra.mxu0 %v584_v8  ;;  %576 = vmatpush3.bf16.msra.mxu1 %v584_v8 }
  0x1c   :  { %544 = vmatprep.subr.bf16.mxu0 %v585_v9  ;;  %569 = vmatprep.subr.bf16.mxu1 %v585_v9 }
  0x1f   :  { %545 = vmatpush3.bf16.msra.mxu0 %v585_v9  ;;  %577 = vmatpush3.bf16.msra.mxu1 %v585_v9 }
  0x22   :  { %547 = vmatmul.mubr.bf16.vlgmr.msra.gmra.mrb[0].mxu0 %v588_v10  ;;  %555 = vmatmul.mubr.bf16.vlgmr.msra.gmra.mrb[0].mxu1 %v589_v11 }
  0x23   :  { %550 = vmatprep.mubr.bf16.mxu0 %v590_v12  ;;  %558 = vmatprep.mubr.bf16.mxu1 %v591_v13 }
  0x2a   :  { %551 = vmatmul.mubr.bf16.gmra.mrb[4].mxu0 %v592_v14  ;;  %559 = vmatmul.mubr.bf16.gmra.mrb[4].mxu1 %v593_v15 }
  0xf5   :  { %v548_v17 = vpop.f32.mrb[0].mxu0  ;;  %v556_v18 = vpop.f32.mrb[0].mxu1 }
  0xf6   :  { %v220_v19 = vpop.f32.mrb[1].mxu0  ;;  %v252_v20 = vpop.f32.mrb[1].mxu1  ;;  %v285_v23 = vadd.f32 %v548_v17, %v418_v16  ;;  %v293_v24 = vadd.f32 %v556_v18, %v418_v16 }
  0xf7   :  { %v549_v21 = vpop.f32.mrb[2].mxu0  ;;  %v557_v22 = vpop.f32.mrb[2].mxu1  ;;  %v283_v29 = vadd.f32 %v418_v16, %v220_v19  ;;  %v291_v30 = vadd.f32 %v418_v16, %v252_v20 }
  0xf8   :  { %v286_v25 = vadd.f32 %v549_v21, %v418_v16  ;;  %v294_v26 = vadd.f32 %v557_v22, %v418_v16  ;;  %v223_v27 = vpop.f32.mrb[3].mxu0  ;;  %v255_v28 = vpop.f32.mrb[3].mxu1 }
  0xf9   :  { %v284_v31 = vadd.f32 %v418_v16, %v223_v27  ;;  %v292_v32 = vadd.f32 %v418_v16, %v255_v28 }
  0xfa   :  { %v475_v33 = vpack.c.bf16 %v286_v25, %v285_v23  ;;  %v495_v34 = vpack.c.bf16 %v294_v26, %v293_v24 }
  0xfb   :  { %v470_v35 = vpack.c.bf16 %v284_v31, %v283_v29  ;;  %v490_v36 = vpack.c.bf16 %v292_v32, %v291_v30 }
  0xfc   :  { %507 = vst [vmem:[%s692_s3 + $0x8] sm:$0xff] %v475_v33   ;;  %511 = vst [vmem:[%s692_s3 + $0x28] sm:$0xff] %v495_v34  }
  0xfd   :  { %471 = vst [vmem:[%s692_s3] sm:$0xff] %v470_v35   ;;  %510 = vst [vmem:[%s692_s3 + $0x20] sm:$0xff] %v490_v36   ;;  %v552_v37 = vpop.f32.mrb[4].mxu0  ;;  %v560_v38 = vpop.f32.mrb[4].mxu1 }
  0xfe   :  { %v236_v39 = vpop.f32.mrb[5].mxu0  ;;  %v268_v40 = vpop.f32.mrb[5].mxu1  ;;  %v289_v43 = vadd.f32 %v552_v37, %v418_v16  ;;  %v297_v44 = vadd.f32 %v560_v38, %v418_v16 }
  0xff   :  { %v553_v41 = vpop.f32.mrb[6].mxu0  ;;  %v561_v42 = vpop.f32.mrb[6].mxu1  ;;  %v287_v49 = vadd.f32 %v418_v16, %v236_v39  ;;  %v295_v50 = vadd.f32 %v418_v16, %v268_v40 }
 0x100   :  { %v290_v45 = vadd.f32 %v553_v41, %v418_v16  ;;  %v298_v46 = vadd.f32 %v561_v42, %v418_v16  ;;  %v239_v47 = vpop.f32.mrb[7].mxu0  ;;  %v271_v48 = vpop.f32.mrb[7].mxu1 }
 0x101   :  { %v288_v51 = vadd.f32 %v418_v16, %v239_v47  ;;  %v296_v52 = vadd.f32 %v418_v16, %v271_v48 }
 0x102   :  { %v485_v53 = vpack.c.bf16 %v290_v45, %v289_v43  ;;  %v505_v54 = vpack.c.bf16 %v298_v46, %v297_v44 }
 0x103   :  { %v480_v55 = vpack.c.bf16 %v288_v51, %v287_v49  ;;  %v500_v56 = vpack.c.bf16 %v296_v52, %v295_v50 }
 0x104   :  { %509 = vst [vmem:[%s692_s3 + $0x18] sm:$0xff] %v485_v53   ;;  %513 = vst [vmem:[%s692_s3 + $0x38] sm:$0xff] %v505_v54  }
 0x105   :  { %508 = vst [vmem:[%s692_s3 + $0x10] sm:$0xff] %v480_v55   ;;  %512 = vst [vmem:[%s692_s3 + $0x30] sm:$0xff] %v500_v56  }

// kernel: lm_lstm_forward.2
= control target key start
LH: loop header
LB: loop body
LE: loop exit
PB: predicated region body
PF: predicated region fallthrough
CT: control target
= control target key end

     0   :  { %v8558_v1 = vmov 0   ;;  %s8553_s1 = inlined_call_operand.vmem [shape: bf16[128,512], index: 1, kind: input, shape index: {}]   ;;  %s8554_s0 = inlined_call_operand.vmem [shape: bf16[16,8,128], index: 0, kind: input, shape index: {}]   ;;  %s8555_s2 = inlined_call_operand.vmem [shape: bf16[128,512], index: 2, kind: input, shape index: {}]   ;;  %s8556_s3 = inlined_call_operand.vmem [shape: f32[1,512], index: 3, kind: input, shape index: {}]   ;;  %s8557_s4 = inlined_call_operand.vmem [shape: bf16[16,8,128], index: 4, kind: output, shape index: {}]  }
   0x1   :  { %v6219_v0 = vld [vmem:[%s8553_s1 + $0x4] ss:$16 sps:$4 sm:$0xff]   ;;  %334 = vmatprep.mubr.bf16.mxu0 %v8558_v1  ;;  %22 = vst [vmem:[#allocation3] sm:$0xf] %v8558_v1  ;;  %447 = vmatprep.mubr.bf16.mxu1 %v8558_v1  ;;  %v6221_v2 = vld [vmem:[%s8553_s1 + $0xc] ss:$16 sps:$4 sm:$0xff]  }
   0x2   :  { %302 = vmatprep.subr.bf16.mxu0 %v6219_v0  ;;  %v6223_v3 = vld [vmem:[%s8553_s1] ss:$16 sps:$4 sm:$0xff]   ;;  %v6224_v4 = vld [vmem:[%s8553_s1 + $0x8] ss:$16 sps:$4 sm:$0xff]   ;;  %415 = vmatprep.subr.bf16.mxu1 %v6221_v2  ;;  %v6225_v5 = vld [vmem:[%s8553_s1 + $0x24] ss:$16 sps:$4 sm:$0xff]  }
   0x3   :  { %303 = vmatpush1.bf16.msra.mxu0 %v6223_v3  ;;  %416 = vmatpush1.bf16.msra.mxu1 %v6224_v4  ;;  %v6227_v6 = vld [vmem:[%s8553_s1 + $0x2c] ss:$16 sps:$4 sm:$0xff]   ;;  %v6229_v7 = vld [vmem:[%s8553_s1 + $0x20] ss:$16 sps:$4 sm:$0xff]   ;;  %v6230_v8 = vld [vmem:[%s8553_s1 + $0x28] ss:$16 sps:$4 sm:$0xff]  }
   0x4   :  { %304 = vmatprep.subr.bf16.mxu0 %v6225_v5  ;;  %417 = vmatprep.subr.bf16.mxu1 %v6227_v6  ;;  %v6231_v9 = vld [vmem:[%s8553_s1 + $0x44] ss:$16 sps:$4 sm:$0xff]   ;;  %v6233_v10 = vld [vmem:[%s8553_s1 + $0x4c] ss:$16 sps:$4 sm:$0xff]   ;;  %v6235_v11 = vld [vmem:[%s8553_s1 + $0x40] ss:$16 sps:$4 sm:$0xff]  }
   0x5   :  { %v6236_v12 = vld [vmem:[%s8553_s1 + $0x48] ss:$16 sps:$4 sm:$0xff]   ;;  %v6237_v13 = vld [vmem:[%s8553_s1 + $0x64] ss:$16 sps:$4 sm:$0xff]   ;;  %v6239_v14 = vld [vmem:[%s8553_s1 + $0x6c] ss:$16 sps:$4 sm:$0xff]  }
   0x6   :  { %v6241_v15 = vld [vmem:[%s8553_s1 + $0x60] ss:$16 sps:$4 sm:$0xff]   ;;  %v6242_v16 = vld [vmem:[%s8553_s1 + $0x68] ss:$16 sps:$4 sm:$0xff]   ;;  %v6243_v17 = vld [vmem:[%s8553_s1 + $0x84] ss:$16 sps:$4 sm:$0xff]  }
   0x7   :  { %305 = vmatpush1.bf16.msra.mxu0 %v6229_v7  ;;  %418 = vmatpush1.bf16.msra.mxu1 %v6230_v8  ;;  %v6245_v18 = vld [vmem:[%s8553_s1 + $0x8c] ss:$16 sps:$4 sm:$0xff]   ;;  %v6247_v19 = vld [vmem:[%s8553_s1 + $0x80] ss:$16 sps:$4 sm:$0xff]   ;;  %v6248_v20 = vld [vmem:[%s8553_s1 + $0x88] ss:$16 sps:$4 sm:$0xff]  }
   0x8   :  { %306 = vmatprep.subr.bf16.mxu0 %v6231_v9  ;;  %419 = vmatprep.subr.bf16.mxu1 %v6233_v10  ;;  %v6249_v21 = vld [vmem:[%s8553_s1 + $0xa4] ss:$16 sps:$4 sm:$0xff]   ;;  %v6251_v22 = vld [vmem:[%s8553_s1 + $0xac] ss:$16 sps:$4 sm:$0xff]   ;;  %v6253_v23 = vld [vmem:[%s8553_s1 + $0xa0] ss:$16 sps:$4 sm:$0xff]  }
   0x9   :  { %v6254_v24 = vld [vmem:[%s8553_s1 + $0xa8] ss:$16 sps:$4 sm:$0xff]   ;;  %v6255_v25 = vld [vmem:[%s8553_s1 + $0xc4] ss:$16 sps:$4 sm:$0xff]   ;;  %v6257_v26 = vld [vmem:[%s8553_s1 + $0xcc] ss:$16 sps:$4 sm:$0xff]  }
   0xa   :  { %v6259_v27 = vld [vmem:[%s8553_s1 + $0xc0] ss:$16 sps:$4 sm:$0xff]   ;;  %v6260_v28 = vld [vmem:[%s8553_s1 + $0xc8] ss:$16 sps:$4 sm:$0xff]   ;;  %v6261_v29 = vld [vmem:[%s8553_s1 + $0xe4] ss:$16 sps:$4 sm:$0xff]  }
   0xb   :  { %307 = vmatpush1.bf16.msra.mxu0 %v6235_v11  ;;  %420 = vmatpush1.bf16.msra.mxu1 %v6236_v12  ;;  %v6263_v30 = vld [vmem:[%s8553_s1 + $0xec] ss:$16 sps:$4 sm:$0xff]   ;;  %v6265_v31 = vld [vmem:[%s8553_s1 + $0xe0] ss:$16 sps:$4 sm:$0xff]   ;;  %v6266_v32 = vld [vmem:[%s8553_s1 + $0xe8] ss:$16 sps:$4 sm:$0xff]   ;;  %v74_v11 = vlaneseq }
   0xc   :  { %308 = vmatprep.subr.bf16.mxu0 %v6237_v13  ;;  %421 = vmatprep.subr.bf16.mxu1 %v6239_v14  ;;  %v6899_v33 = vld [vmem:[%s8555_s2 + $0x4] ss:$16 sps:$4 sm:$0xff]   ;;  %v6904_v34 = vld [vmem:[%s8555_s2 + $0xc] ss:$16 sps:$4 sm:$0xff]   ;;  %v6912_v36 = vld [vmem:[%s8555_s2] ss:$16 sps:$4 sm:$0xff]  }
   0xd   :  { %v6267_v35 = vld [vmem:[%s8554_s0] sm:$0xff]   ;;  %v6924_v38 = vld [vmem:[%s8555_s2 + $0x8] ss:$16 sps:$4 sm:$0xff]   ;;  %v6929_v39 = vld [vmem:[%s8555_s2 + $0x2c] ss:$16 sps:$4 sm:$0xff]   ;;  %v75_v12 = vshrl.u32 %v74_v11, 7 }
   0xe   :  { %v6918_v37 = vld [vmem:[%s8555_s2 + $0x24] ss:$16 sps:$4 sm:$0xff]   ;;  %v6936_v40 = vld [vmem:[%s8555_s2 + $0x20] ss:$16 sps:$4 sm:$0xff]   ;;  %v6949_v42 = vld [vmem:[%s8555_s2 + $0x28] ss:$16 sps:$4 sm:$0xff]  }
   0xf   :  { %309 = vmatpush1.bf16.msra.mxu0 %v6241_v15  ;;  %422 = vmatpush1.bf16.msra.mxu1 %v6242_v16  ;;  %v6943_v41 = vld [vmem:[%s8555_s2 + $0x44] ss:$16 sps:$4 sm:$0xff]   ;;  %v6271_v43 = vld [vmem:[%s8554_s0 + $0x8] sm:$0xff]   ;;  %v6959_v44 = vld [vmem:[%s8555_s2 + $0x40] ss:$16 sps:$4 sm:$0xff]   ;;  %v84_v13 = vsub.s32 2, %v75_v12 }
  0x10   :  { %310 = vmatprep.subr.bf16.mxu0 %v6243_v17  ;;  %423 = vmatprep.subr.bf16.mxu1 %v6245_v18  ;;  %v6965_v45 = vld [vmem:[%s8555_s2 + $0x64] ss:$16 sps:$4 sm:$0xff]   ;;  %v6970_v46 = vld [vmem:[%s8555_s2 + $0x4c] ss:$16 sps:$4 sm:$0xff]   ;;  %v6976_v47 = vld [vmem:[%s8555_s2 + $0x48] ss:$16 sps:$4 sm:$0xff]  }
  0x11   :  { %v6981_v48 = vld [vmem:[%s8555_s2 + $0x6c] ss:$16 sps:$4 sm:$0xff]   ;;  %v6989_v49 = vld [vmem:[%s8555_s2 + $0x60] ss:$16 sps:$4 sm:$0xff]   ;;  %v6995_v50 = vld [vmem:[%s8555_s2 + $0x84] ss:$16 sps:$4 sm:$0xff]  }
  0x12   :  { %v7002_v51 = vld [vmem:[%s8555_s2 + $0x68] ss:$16 sps:$4 sm:$0xff]   ;;  %v6278_v52 = vld [vmem:[%s8554_s0 + $0x10] sm:$0xff]   ;;  %v7017_v54 = vld [vmem:[%s8555_s2 + $0x8c] ss:$16 sps:$4 sm:$0xff]   ;;  %v88_v14 = vsub.s32 3, %v75_v12 }
  0x13   :  { %311 = vmatpush1.bf16.msra.mxu0 %v6247_v19  ;;  %424 = vmatpush1.bf16.msra.mxu1 %v6248_v20  ;;  %v7011_v53 = vld [vmem:[%s8555_s2 + $0x80] ss:$16 sps:$4 sm:$0xff]   ;;  %v7023_v55 = vld [vmem:[%s8555_s2 + $0xa4] ss:$16 sps:$4 sm:$0xff]   ;;  %v7029_v56 = vld [vmem:[%s8555_s2 + $0x88] ss:$16 sps:$4 sm:$0xff]  }
  0x14   :  { %312 = vmatprep.subr.bf16.mxu0 %v6249_v21  ;;  %425 = vmatprep.subr.bf16.mxu1 %v6251_v22  ;;  %v7034_v57 = vld [vmem:[%s8555_s2 + $0xa0] ss:$16 sps:$4 sm:$0xff]   ;;  %v7039_v58 = vld [vmem:[%s8555_s2 + $0xac] ss:$16 sps:$4 sm:$0xff]   ;;  %v7046_v59 = vld [vmem:[%s8555_s2 + $0xc4] ss:$16 sps:$4 sm:$0xff]  }
  0x15   :  { %v7051_v60 = vld [vmem:[%s8555_s2 + $0xa8] ss:$16 sps:$4 sm:$0xff]   ;;  %v7063_v62 = vld [vmem:[%s8555_s2 + $0xc0] ss:$16 sps:$4 sm:$0xff]   ;;  %v7069_v63 = vld [vmem:[%s8555_s2 + $0xcc] ss:$16 sps:$4 sm:$0xff]  }
  0x16   :  { %v6285_v61 = vld [vmem:[%s8554_s0 + $0x18] sm:$0xff]   ;;  %v7074_v0 = vld [vmem:[%s8555_s2 + $0xe4] ss:$16 sps:$4 sm:$0xff]   ;;  %v7092_v4 = vld [vmem:[%s8555_s2 + $0xe0] ss:$16 sps:$4 sm:$0xff]   ;;  %v76_v15 = vsub.s32 0, %v75_v12 }
  0x17   :  { %313 = vmatpush1.bf16.msra.mxu0 %v6253_v23  ;;  %426 = vmatpush1.bf16.msra.mxu1 %v6254_v24  ;;  %v7079_v2 = vld [vmem:[%s8555_s2 + $0xc8] ss:$16 sps:$4 sm:$0xff]   ;;  %v7085_v3 = vld [vmem:[%s8555_s2 + $0xec] ss:$16 sps:$4 sm:$0xff]   ;;  %v6292_v6 = vld [vmem:[%s8554_s0 + $0x20] sm:$0xff]   ;;  %v80_v17 = vsub.s32 1, %v75_v12 }
  0x18   :  { %314 = vmatprep.subr.bf16.mxu0 %v6255_v25  ;;  %427 = vmatprep.subr.bf16.mxu1 %v6257_v26  ;;  %v7099_v5 = vld [vmem:[%s8555_s2 + $0xe8] ss:$16 sps:$4 sm:$0xff]   ;;  %v6306_v8 = vld [vmem:[%s8554_s0 + $0x30] sm:$0xff]   ;;  %v596_v10 = vld [vmem:[#allocation3] sm:$0xf] }
  0x19   :  { %v6299_v7 = vld [vmem:[%s8554_s0 + $0x28] sm:$0xff]   ;;  %v6313_v9 = vld [vmem:[%s8554_s0 + $0x38] sm:$0xff]   ;;  %v72_v16 = vld [vmem:[%s8556_s3] sm:$0xf] }
  0x1a   :  { %v7167_v18 = vrot.slane %v72_v16, %v84_v13  ;;  %v7173_v21 = vrot.slane %v72_v16, %v88_v14  ;;  %v7175_v22 = vrot.slane %v72_v16, %v76_v15  ;;  %v7181_v25 = vrot.slane %v72_v16, %v80_v17 }
  0x1b   :  { %315 = vmatpush1.bf16.msra.mxu0 %v6259_v27  ;;  %428 = vmatpush1.bf16.msra.mxu1 %v6260_v28 }
  0x1c   :  { %316 = vmatprep.subr.bf16.mxu0 %v6261_v29  ;;  %429 = vmatprep.subr.bf16.mxu1 %v6263_v30 }
  0x1f   :  { %317 = vmatpush1.bf16.msra.mxu0 %v6265_v31  ;;  %430 = vmatpush1.bf16.msra.mxu1 %v6266_v32 }
  0x20   :  { %789 = vmatprep.subr.bf16.mxu0 %v6899_v33  ;;  %830 = vmatprep.subr.bf16.mxu1 %v6904_v34 }
  0x22   :  { %335 = vmatmul.mubr.bf16.vlgmr.msra.gmra.mrb[0].mxu0 %v6267_v35  ;;  %448 = vmatmul.mubr.bf16.vlgmr.msra.gmra.mrb[0].mxu1 %v6267_v35 }
  0x23   :  { %790 = vmatpush1.bf16.msra.mxu0 %v6912_v36  ;;  %344 = vmatprep.mubr.bf16.mxu0 %v8558_v1 }
  0x24   :  { %457 = vmatprep.mubr.bf16.mxu1 %v8558_v1  ;;  %791 = vmatprep.subr.bf16.mxu0 %v6918_v37 }
  0x25   :  { %831 = vmatpush1.bf16.msra.mxu1 %v6924_v38 }
  0x26   :  { %832 = vmatprep.subr.bf16.mxu1 %v6929_v39 }
  0x27   :  { %792 = vmatpush1.bf16.msra.mxu0 %v6936_v40 }
  0x28   :  { %793 = vmatprep.subr.bf16.mxu0 %v6943_v41 }
  0x29   :  { %833 = vmatpush1.bf16.msra.mxu1 %v6949_v42 }
  0x2a   :  { %345 = vmatmul.mubr.bf16.gmra.mrb[4].mxu0 %v6271_v43  ;;  %458 = vmatmul.mubr.bf16.gmra.mrb[4].mxu1 %v6271_v43 }
  0x2b   :  { %354 = vmatprep.mubr.bf16.mxu0 %v8558_v1  ;;  %467 = vmatprep.mubr.bf16.mxu1 %v8558_v1 }
  0x2c   :  { %794 = vmatpush1.bf16.msra.mxu0 %v6959_v44  ;;  %834 = vmatprep.subr.bf16.mxu1 %v6970_v46 }
  0x2d   :  { %795 = vmatprep.subr.bf16.mxu0 %v6965_v45  ;;  %835 = vmatpush1.bf16.msra.mxu1 %v6976_v47 }
  0x2e   :  { %836 = vmatprep.subr.bf16.mxu1 %v6981_v48 }
  0x30   :  { %796 = vmatpush1.bf16.msra.mxu0 %v6989_v49 }
  0x31   :  { %797 = vmatprep.subr.bf16.mxu0 %v6995_v50  ;;  %837 = vmatpush1.bf16.msra.mxu1 %v7002_v51 }
  0x32   :  { %355 = vmatmul.mubr.bf16.gmra.mrb[8].mxu0 %v6278_v52  ;;  %468 = vmatmul.mubr.bf16.gmra.mrb[8].mxu1 %v6278_v52 }
  0x33   :  { %364 = vmatprep.mubr.bf16.mxu0 %v8558_v1  ;;  %477 = vmatprep.mubr.bf16.mxu1 %v8558_v1 }
  0x34   :  { %798 = vmatpush1.bf16.msra.mxu0 %v7011_v53  ;;  %838 = vmatprep.subr.bf16.mxu1 %v7017_v54 }
  0x35   :  { %799 = vmatprep.subr.bf16.mxu0 %v7023_v55  ;;  %839 = vmatpush1.bf16.msra.mxu1 %v7029_v56 }
  0x36   :  { %840 = vmatprep.subr.bf16.mxu1 %v7039_v58 }
  0x38   :  { %800 = vmatpush1.bf16.msra.mxu0 %v7034_v57 }
  0x39   :  { %801 = vmatprep.subr.bf16.mxu0 %v7046_v59  ;;  %841 = vmatpush1.bf16.msra.mxu1 %v7051_v60 }
  0x3a   :  { %365 = vmatmul.mubr.bf16.gmra.mrb[12].mxu0 %v6285_v61  ;;  %478 = vmatmul.mubr.bf16.gmra.mrb[12].mxu1 %v6285_v61 }
  0x3b   :  { %374 = vmatprep.mubr.bf16.mxu0 %v8558_v1  ;;  %487 = vmatprep.mubr.bf16.mxu1 %v8558_v1 }
  0x3c   :  { %802 = vmatpush1.bf16.msra.mxu0 %v7063_v62  ;;  %842 = vmatprep.subr.bf16.mxu1 %v7069_v63 }
  0x3d   :  { %803 = vmatprep.subr.bf16.mxu0 %v7074_v0  ;;  %843 = vmatpush1.bf16.msra.mxu1 %v7079_v2 }
  0x3e   :  { %844 = vmatprep.subr.bf16.mxu1 %v7085_v3 }
  0x40   :  { %804 = vmatpush1.bf16.msra.mxu0 %v7092_v4 }
  0x41   :  { %845 = vmatpush1.bf16.msra.mxu1 %v7099_v5  ;;  %1101 = vmatprep.subr.bf16.mxu0 %v6899_v33 }
  0x42   :  { %375 = vmatmul.mubr.bf16.gmra.mrb[16].mxu0 %v6292_v6  ;;  %488 = vmatmul.mubr.bf16.gmra.mrb[16].mxu1 %v6292_v6 }
  0x43   :  { %384 = vmatprep.mubr.bf16.mxu0 %v8558_v1  ;;  %497 = vmatprep.mubr.bf16.mxu1 %v8558_v1 }
  0x44   :  { %1142 = vmatprep.subr.bf16.mxu1 %v6904_v34 }
  0x4a   :  { %385 = vmatmul.mubr.bf16.gmra.mrb[20].mxu0 %v6299_v7  ;;  %498 = vmatmul.mubr.bf16.gmra.mrb[20].mxu1 %v6299_v7 }
  0x4b   :  { %394 = vmatprep.mubr.bf16.mxu0 %v8558_v1  ;;  %507 = vmatprep.mubr.bf16.mxu1 %v8558_v1 }
  0x52   :  { %395 = vmatmul.mubr.bf16.gmra.mrb[24].mxu0 %v6306_v8  ;;  %508 = vmatmul.mubr.bf16.gmra.mrb[24].mxu1 %v6306_v8 }
  0x53   :  { %404 = vmatprep.mubr.bf16.mxu0 %v8558_v1  ;;  %517 = vmatprep.mubr.bf16.mxu1 %v8558_v1 }
  0x5a   :  { %405 = vmatmul.mubr.bf16.gmra.mrb[28].mxu0 %v6313_v9  ;;  %518 = vmatmul.mubr.bf16.gmra.mrb[28].mxu1 %v6313_v9 }
  0x5b   :  { %821 = vmatprep.mubr.bf16.mxu0 %v8558_v1  ;;  %862 = vmatprep.mubr.bf16.mxu1 %v8558_v1 }
  0x62   :  { %822 = vmatmul.mubr.bf16.vlgmr.msra.gmra.mrb[32].mxu0 %v596_v10  ;;  %863 = vmatmul.mubr.bf16.vlgmr.msra.gmra.mrb[32].mxu1 %v596_v10 }
  0x63   :  { %1102 = vmatpush1.bf16.msra.mxu0 %v6912_v36  ;;  %1143 = vmatpush1.bf16.msra.mxu1 %v6924_v38 }
  0x64   :  { %1103 = vmatprep.subr.bf16.mxu0 %v6918_v37  ;;  %1144 = vmatprep.subr.bf16.mxu1 %v6929_v39 }
  0x65   :  { %1133 = vmatprep.mubr.bf16.mxu0 %v8558_v1  ;;  %1174 = vmatprep.mubr.bf16.mxu1 %v8558_v1 }
  0x67   :  { %1104 = vmatpush1.bf16.msra.mxu0 %v6936_v40  ;;  %1145 = vmatpush1.bf16.msra.mxu1 %v6949_v42 }
  0x68   :  { %1105 = vmatprep.subr.bf16.mxu0 %v6943_v41  ;;  %1146 = vmatprep.subr.bf16.mxu1 %v6970_v46 }
  0x6b   :  { %1106 = vmatpush1.bf16.msra.mxu0 %v6959_v44  ;;  %1147 = vmatpush1.bf16.msra.mxu1 %v6976_v47 }
  0x6c   :  { %1107 = vmatprep.subr.bf16.mxu0 %v6965_v45  ;;  %1148 = vmatprep.subr.bf16.mxu1 %v6981_v48 }
  0x6f   :  { %1108 = vmatpush1.bf16.msra.mxu0 %v6989_v49  ;;  %1149 = vmatpush1.bf16.msra.mxu1 %v7002_v51 }
  0x70   :  { %1109 = vmatprep.subr.bf16.mxu0 %v6995_v50  ;;  %1150 = vmatprep.subr.bf16.mxu1 %v7017_v54 }
  0x73   :  { %1110 = vmatpush1.bf16.msra.mxu0 %v7011_v53  ;;  %1151 = vmatpush1.bf16.msra.mxu1 %v7029_v56 }
  0x74   :  { %1111 = vmatprep.subr.bf16.mxu0 %v7023_v55  ;;  %1152 = vmatprep.subr.bf16.mxu1 %v7039_v58 }
  0x77   :  { %1112 = vmatpush1.bf16.msra.mxu0 %v7034_v57  ;;  %1153 = vmatpush1.bf16.msra.mxu1 %v7051_v60 }
  0x78   :  { %1113 = vmatprep.subr.bf16.mxu0 %v7046_v59  ;;  %1154 = vmatprep.subr.bf16.mxu1 %v7069_v63 }
  0x7b   :  { %1114 = vmatpush1.bf16.msra.mxu0 %v7063_v62  ;;  %1155 = vmatpush1.bf16.msra.mxu1 %v7079_v2 }
  0x7c   :  { %1115 = vmatprep.subr.bf16.mxu0 %v7074_v0  ;;  %1156 = vmatprep.subr.bf16.mxu1 %v7085_v3 }
  0x7f   :  { %1116 = vmatpush1.bf16.msra.mxu0 %v7092_v4  ;;  %1157 = vmatpush1.bf16.msra.mxu1 %v7099_v5 }
  0x80   :  { %1414 = vmatprep.subr.bf16.mxu0 %v6899_v33  ;;  %1455 = vmatprep.subr.bf16.mxu1 %v6904_v34 }
  0xf5   :  { %v7169_v19 = vpop.f32.mrb[0].mxu0  ;;  %v7171_v20 = vpop.f32.mrb[0].mxu1 }
  0xf6   :  { %v7177_v23 = vpop.f32.mrb[1].mxu0  ;;  %v7179_v24 = vpop.f32.mrb[1].mxu1 }
  0xf7   :  { %v340_v26 = vpop.f32.mrb[2].mxu0  ;;  %v453_v27 = vpop.f32.mrb[2].mxu1 }
  0xf8   :  { %v7184_v28 = vadd.f32 %v340_v26, %v7175_v22  ;;  %v342_v29 = vpop.f32.mrb[3].mxu0  ;;  %v7187_v30 = vadd.f32 %v453_v27, %v7167_v18  ;;  %v455_v31 = vpop.f32.mrb[3].mxu1 }
  0xf9   :  { %v7190_v32 = vadd.f32 %v342_v29, %v7181_v25  ;;  %v7193_v33 = vadd.f32 %v455_v31, %v7173_v21 }
  0xfd   :  { %v346_v34 = vpop.f32.mrb[4].mxu0  ;;  %v459_v35 = vpop.f32.mrb[4].mxu1 }
  0xfe   :  { %v7196_v43 = vadd.f32 %v346_v34, %v7175_v22  ;;  %v348_v52 = vpop.f32.mrb[5].mxu0  ;;  %v7199_v61 = vadd.f32 %v459_v35, %v7167_v18  ;;  %v461_v6 = vpop.f32.mrb[5].mxu1 }
  0xff   :  { %v7202_v7 = vadd.f32 %v348_v52, %v7181_v25  ;;  %v350_v8 = vpop.f32.mrb[6].mxu0  ;;  %v7205_v9 = vadd.f32 %v461_v6, %v7173_v21  ;;  %v463_v10 = vpop.f32.mrb[6].mxu1 }
 0x100   :  { %v7208_v11 = vadd.f32 %v350_v8, %v7175_v22  ;;  %v352_v12 = vpop.f32.mrb[7].mxu0  ;;  %v7211_v13 = vadd.f32 %v463_v10, %v7167_v18  ;;  %v465_v14 = vpop.f32.mrb[7].mxu1 }
 0x101   :  { %v7214_v15 = vadd.f32 %v352_v12, %v7181_v25  ;;  %v7217_v16 = vadd.f32 %v465_v14, %v7173_v21 }
 0x103   :  { %8560 = vst [vmem:[#allocation5_spill] sm:$0xff] %v7217_v16 }
 0x105   :  { %v356_v17 = vpop.f32.mrb[8].mxu0  ;;  %v469_v26 = vpop.f32.mrb[8].mxu1 }
 0x106   :  { %v7220_v27 = vadd.f32 %v356_v17, %v7175_v22  ;;  %v358_v29 = vpop.f32.mrb[9].mxu0  ;;  %v7223_v31 = vadd.f32 %v469_v26, %v7167_v18  ;;  %v471_v34 = vpop.f32.mrb[9].mxu1 }
 0x107   :  { %v7226_v35 = vadd.f32 %v358_v29, %v7181_v25  ;;  %v360_v52 = vpop.f32.mrb[10].mxu0  ;;  %v7229_v6 = vadd.f32 %v471_v34, %v7173_v21  ;;  %v473_v8 = vpop.f32.mrb[10].mxu1 }
 0x108   :  { %8561 = vst [vmem:[#allocation6_spill] sm:$0xff] %v7220_v27  ;;  %8562 = vst [vmem:[#allocation7_spill] sm:$0xff] %v7223_v31  ;;  %v7232_v10 = vadd.f32 %v360_v52, %v7175_v22  ;;  %v362_v12 = vpop.f32.mrb[11].mxu0  ;;  %v7235_v14 = vadd.f32 %v473_v8, %v7167_v18  ;;  %v475_v17 = vpop.f32.mrb[11].mxu1 }
 0x109   :  { %8563 = vst [vmem:[#allocation8_spill] sm:$0xff] %v7226_v35  ;;  %8564 = vst [vmem:[#allocation9_spill] sm:$0xff] %v7229_v6  ;;  %v7238_v26 = vadd.f32 %v362_v12, %v7181_v25  ;;  %v7241_v1 = vadd.f32 %v475_v17, %v7173_v21 }
 0x10a   :  { %8565 = vst [vmem:[#allocation10_spill] sm:$0xff] %v7232_v10  ;;  %8566 = vst [vmem:[#allocation11_spill] sm:$0xff] %v7235_v14 }
 0x10b   :  { %8567 = vst [vmem:[#allocation12_spill] sm:$0xff] %v7238_v26  ;;  %8568 = vst [vmem:[#allocation13_spill] sm:$0xff] %v7241_v1 }
 0x10d   :  { %v366_v29 = vpop.f32.mrb[12].mxu0  ;;  %v479_v35 = vpop.f32.mrb[12].mxu1 }
 0x10e   :  { %v7244_v34 = vadd.f32 %v366_v29, %v7175_v22  ;;  %v368_v6 = vpop.f32.mrb[13].mxu0  ;;  %v7247_v52 = vadd.f32 %v479_v35, %v7167_v18  ;;  %v481_v10 = vpop.f32.mrb[13].mxu1 }
 0x10f   :  { %v7250_v8 = vadd.f32 %v368_v6, %v7181_v25  ;;  %v370_v14 = vpop.f32.mrb[14].mxu0  ;;  %v7253_v12 = vadd.f32 %v481_v10, %v7173_v21  ;;  %v483_v26 = vpop.f32.mrb[14].mxu1 }
 0x110   :  { %8569 = vst [vmem:[#allocation14_spill] sm:$0xff] %v7244_v34  ;;  %8570 = vst [vmem:[#allocation15_spill] sm:$0xff] %v7247_v52  ;;  %v7256_v17 = vadd.f32 %v370_v14, %v7175_v22  ;;  %v372_v1 = vpop.f32.mrb[15].mxu0  ;;  %v7259_v29 = vadd.f32 %v483_v26, %v7167_v18  ;;  %v485_v34 = vpop.f32.mrb[15].mxu1 }
 0x111   :  { %8571 = vst [vmem:[#allocation16_spill] sm:$0xff] %v7250_v8  ;;  %8572 = vst [vmem:[#allocation17_spill] sm:$0xff] %v7253_v12  ;;  %v7262_v35 = vadd.f32 %v372_v1, %v7181_v25  ;;  %v7265_v52 = vadd.f32 %v485_v34, %v7173_v21 }
 0x112   :  { %8573 = vst [vmem:[#allocation18_spill] sm:$0xff] %v7256_v17  ;;  %8574 = vst [vmem:[#allocation19_spill] sm:$0xff] %v7259_v29 }
 0x113   :  { %8575 = vst [vmem:[#allocation20_spill] sm:$0xff] %v7262_v35  ;;  %8576 = vst [vmem:[#allocation21_spill] sm:$0xff] %v7265_v52 }
 0x115   :  { %v376_v6 = vpop.f32.mrb[16].mxu0  ;;  %v489_v8 = vpop.f32.mrb[16].mxu1 }
 0x116   :  { %v7268_v10 = vadd.f32 %v376_v6, %v7175_v22  ;;  %v378_v12 = vpop.f32.mrb[17].mxu0  ;;  %v7271_v14 = vadd.f32 %v489_v8, %v7167_v18  ;;  %v491_v17 = vpop.f32.mrb[17].mxu1 }
 0x117   :  { %v7274_v26 = vadd.f32 %v378_v12, %v7181_v25  ;;  %v380_v29 = vpop.f32.mrb[18].mxu0  ;;  %v7277_v1 = vadd.f32 %v491_v17, %v7173_v21  ;;  %v493_v35 = vpop.f32.mrb[18].mxu1 }
 0x118   :  { %8577 = vst [vmem:[#allocation22_spill] sm:$0xff] %v7268_v10  ;;  %8578 = vst [vmem:[#allocation23_spill] sm:$0xff] %v7271_v14  ;;  %v7280_v34 = vadd.f32 %v380_v29, %v7175_v22  ;;  %v382_v52 = vpop.f32.mrb[19].mxu0  ;;  %v7283_v6 = vadd.f32 %v493_v35, %v7167_v18  ;;  %v495_v10 = vpop.f32.mrb[19].mxu1 }
 0x119   :  { %8579 = vst [vmem:[#allocation24_spill] sm:$0xff] %v7274_v26  ;;  %8580 = vst [vmem:[#allocation25_spill] sm:$0xff] %v7277_v1  ;;  %v7286_v8 = vadd.f32 %v382_v52, %v7181_v25  ;;  %v7289_v14 = vadd.f32 %v495_v10, %v7173_v21 }
 0x11a   :  { %8581 = vst [vmem:[#allocation26_spill] sm:$0xff] %v7280_v34  ;;  %8582 = vst [vmem:[#allocation27_spill] sm:$0xff] %v7283_v6 }
 0x11b   :  { %8583 = vst [vmem:[#allocation28_spill] sm:$0xff] %v7286_v8  ;;  %8584 = vst [vmem:[#allocation29_spill] sm:$0xff] %v7289_v14 }
 0x11d   :  { %v386_v12 = vpop.f32.mrb[20].mxu0  ;;  %v499_v26 = vpop.f32.mrb[20].mxu1 }
 0x11e   :  { %v7292_v17 = vadd.f32 %v386_v12, %v7175_v22  ;;  %v388_v1 = vpop.f32.mrb[21].mxu0  ;;  %v7295_v29 = vadd.f32 %v499_v26, %v7167_v18  ;;  %v501_v34 = vpop.f32.mrb[21].mxu1 }
 0x11f   :  { %v7298_v35 = vadd.f32 %v388_v1, %v7181_v25  ;;  %v390_v6 = vpop.f32.mrb[22].mxu0  ;;  %v7301_v52 = vadd.f32 %v501_v34, %v7173_v21  ;;  %v503_v8 = vpop.f32.mrb[22].mxu1 }
 0x120   :  { %8585 = vst [vmem:[#allocation30_spill] sm:$0xff] %v7292_v17  ;;  %8586 = vst [vmem:[#allocation31_spill] sm:$0xff] %v7295_v29  ;;  %v7304_v10 = vadd.f32 %v390_v6, %v7175_v22  ;;  %v392_v14 = vpop.f32.mrb[23].mxu0  ;;  %v7307_v12 = vadd.f32 %v503_v8, %v7167_v18  ;;  %v505_v17 = vpop.f32.mrb[23].mxu1 }
 0x121   :  { %8587 = vst [vmem:[#allocation32_spill] sm:$0xff] %v7298_v35  ;;  %8588 = vst [vmem:[#allocation33_spill] sm:$0xff] %v7301_v52  ;;  %v7310_v26 = vadd.f32 %v392_v14, %v7181_v25  ;;  %v7313_v29 = vadd.f32 %v505_v17, %v7173_v21 }
 0x122   :  { %8589 = vst [vmem:[#allocation34_spill] sm:$0xff] %v7304_v10  ;;  %8590 = vst [vmem:[#allocation35_spill] sm:$0xff] %v7307_v12 }
 0x123   :  { %8591 = vst [vmem:[#allocation36_spill] sm:$0xff] %v7310_v26  ;;  %8592 = vst [vmem:[#allocation37_spill] sm:$0xff] %v7313_v29 }
 0x125   :  { %v396_v1 = vpop.f32.mrb[24].mxu0  ;;  %v509_v35 = vpop.f32.mrb[24].mxu1 }
 0x126   :  { %v7316_v34 = vadd.f32 %v396_v1, %v7175_v22  ;;  %v398_v52 = vpop.f32.mrb[25].mxu0  ;;  %v7319_v6 = vadd.f32 %v509_v35, %v7167_v18  ;;  %v511_v10 = vpop.f32.mrb[25].mxu1 }
 0x127   :  { %v7322_v8 = vadd.f32 %v398_v52, %v7181_v25  ;;  %v400_v12 = vpop.f32.mrb[26].mxu0  ;;  %v7325_v14 = vadd.f32 %v511_v10, %v7173_v21  ;;  %v513_v26 = vpop.f32.mrb[26].mxu1 }
 0x128   :  { %8593 = vst [vmem:[#allocation38_spill] sm:$0xff] %v7316_v34  ;;  %8594 = vst [vmem:[#allocation39_spill] sm:$0xff] %v7319_v6  ;;  %v7328_v17 = vadd.f32 %v400_v12, %v7175_v22  ;;  %v402_v29 = vpop.f32.mrb[27].mxu0  ;;  %v7331_v1 = vadd.f32 %v513_v26, %v7167_v18  ;;  %v515_v34 = vpop.f32.mrb[27].mxu1 }
 0x129   :  { %8595 = vst [vmem:[#allocation40_spill] sm:$0xff] %v7322_v8  ;;  %8596 = vst [vmem:[#allocation41_spill] sm:$0xff] %v7325_v14  ;;  %v7334_v35 = vadd.f32 %v402_v29, %v7181_v25  ;;  %v7337_v6 = vadd.f32 %v515_v34, %v7173_v21 }
 0x12a   :  { %8597 = vst [vmem:[#allocation42_spill] sm:$0xff] %v7328_v17  ;;  %8598 = vst [vmem:[#allocation43_spill] sm:$0xff] %v7331_v1 }
 0x12b   :  { %8599 = vst [vmem:[#allocation44_spill] sm:$0xff] %v7334_v35  ;;  %8600 = vst [vmem:[#allocation45_spill] sm:$0xff] %v7337_v6 }
 0x12d   :  { %v406_v52 = vpop.f32.mrb[28].mxu0  ;;  %v519_v8 = vpop.f32.mrb[28].mxu1 }
 0x12e   :  { %v7340_v10 = vadd.f32 %v406_v52, %v7175_v22  ;;  %v408_v14 = vpop.f32.mrb[29].mxu0  ;;  %v7343_v12 = vadd.f32 %v519_v8, %v7167_v18  ;;  %v521_v17 = vpop.f32.mrb[29].mxu1 }
 0x12f   :  { %v7346_v26 = vadd.f32 %v408_v14, %v7181_v25  ;;  %v410_v1 = vpop.f32.mrb[30].mxu0  ;;  %v7349_v29 = vadd.f32 %v521_v17, %v7173_v21  ;;  %v523_v35 = vpop.f32.mrb[30].mxu1  ;;  %v337_v14 = vadd.f32 %v7169_v19, %v7175_v22  ;;  %v450_v17 = vadd.f32 %v7171_v20, %v7167_v18 }
 0x130   :  { %8601 = vst [vmem:[#allocation46_spill] sm:$0xff] %v7340_v10  ;;  %8602 = vst [vmem:[#allocation47_spill] sm:$0xff] %v7343_v12  ;;  %v7352_v34 = vadd.f32 %v410_v1, %v7175_v22  ;;  %v412_v6 = vpop.f32.mrb[31].mxu0  ;;  %v7355_v52 = vadd.f32 %v523_v35, %v7167_v18  ;;  %v525_v10 = vpop.f32.mrb[31].mxu1  ;;  %v339_v1 = vadd.f32 %v7177_v23, %v7181_v25 }
 0x131   :  { %8603 = vst [vmem:[#allocation48_spill] sm:$0xff] %v7346_v26  ;;  %8604 = vst [vmem:[#allocation49_spill] sm:$0xff] %v7349_v29  ;;  %v7358_v8 = vadd.f32 %v412_v6, %v7181_v25  ;;  %v7361_v12 = vadd.f32 %v525_v10, %v7173_v21  ;;  %v452_v35 = vadd.f32 %v7179_v24, %v7173_v21 }
 0x132   :  { %8605 = vst [vmem:[#allocation50_spill] sm:$0xff] %v7352_v34  ;;  %8606 = vst [vmem:[#allocation51_spill] sm:$0xff] %v7355_v52 }
 0x133   :  { %8607 = vst [vmem:[#allocation52_spill] sm:$0xff] %v7358_v8  ;;  %8608 = vst [vmem:[#allocation53_spill] sm:$0xff] %v7361_v12 }
 0x135   :  { %v823_v52 = vpop.f32.mrb[32].mxu0  ;;  %v864_v34 = vpop.f32.mrb[32].mxu1 }
 0x136   :  { %v871_v29 = vadd.f32 %v823_v52, %v337_v14  ;;  %v873_v6 = vadd.f32 %v864_v34, %v450_v17  ;;  %v825_v8 = vpop.f32.mrb[33].mxu0  ;;  %v866_v26 = vpop.f32.mrb[33].mxu1 }
 0x137   :  { %v872_v10 = vadd.f32 %v825_v8, %v339_v1  ;;  %v874_v12 = vadd.f32 %v866_v26, %v452_v35  ;;  %v827_v31 = vpop.f32.mrb[34].mxu0  ;;  %v868_v27 = vpop.f32.mrb[34].mxu1 }
 0x138   :  { %v5675_v19 = vmul.f32 -1.442695, %v871_v29  ;;  %v828_v22 = vpop.f32.mrb[35].mxu0  ;;  %v869_v16 = vpop.f32.mrb[35].mxu1  ;;  %v5677_v20 = vmul.f32 -1.442695, %v873_v6 }
 0x139   :  { %v5676_v18 = vmul.f32 -1.442695, %v872_v10  ;;  %v8609_v6 = vmov 0   ;;  %v7435_v10 = vld [vmem:[%s8555_s2] ss:$16 sps:$4 sm:$0xff]  }
 0x13a   :  { %6515 = vpow2.f32 %v5675_v19  ;;  %v7440_v19 = vld [vmem:[%s8555_s2 + $0x8] ss:$16 sps:$4 sm:$0xff]   ;;  %v7449_v22 = vld [vmem:[%s8555_s2 + $0x24] ss:$16 sps:$4 sm:$0xff]  }
 0x13b   :  { %6517 = vpow2.f32 %v5676_v18  ;;  %v7454_v18 = vld [vmem:[%s8555_s2 + $0x2c] ss:$16 sps:$4 sm:$0xff]  }
 0x13c   :  { %6519 = vtanh.f32 %v874_v12 }
 0x13d   :  { %6521 = vpow2.f32 %v5677_v20  ;;  %v7459_v20 = vld [vmem:[%s8555_s2 + $0x20] ss:$16 sps:$4 sm:$0xff]  }
 0x144   :  { %v6516_v23 = vpop.eup %6515 }
 0x145   :  { %v884_v25 = vadd.f32 1.0, %v6516_v23  ;;  %v6518_v21 = vpop.eup %6517  ;;  %v7464_v23 = vld [vmem:[%s8555_s2 + $0x28] ss:$16 sps:$4 sm:$0xff]  }
 0x146   :  { %v885_v24 = vadd.f32 1.0, %v6518_v21  ;;  %v6520_v34 = vpop.eup %6519  ;;  %v7478_v21 = vld [vmem:[%s8555_s2 + $0x4c] ss:$16 sps:$4 sm:$0xff]  }
 0x147   :  { %6523 = vrcp.f32 %v884_v25  ;;  %v6522_v52 = vpop.eup %6521  ;;  %v7473_v25 = vld [vmem:[%s8555_s2 + $0x44] ss:$16 sps:$4 sm:$0xff]  }
 0x148   :  { %6525 = vrcp.f32 %v885_v24  ;;  %v886_v29 = vadd.f32 1.0, %v6522_v52  ;;  %v7483_v24 = vld [vmem:[%s8555_s2 + $0x40] ss:$16 sps:$4 sm:$0xff]   ;;  %v7497_v52 = vld [vmem:[%s8555_s2 + $0x64] ss:$16 sps:$4 sm:$0xff]  }
 0x14a   :  { %6527 = vrcp.f32 %v886_v29  ;;  %v7521_v29 = vld [vmem:[%s8555_s2 + $0x84] ss:$16 sps:$4 sm:$0xff]  }
 0x151   :  { %v6524_v26 = vpop.eup %6523 }
 0x152   :  { %v896_v31 = vmul.f32 %v6524_v26, %v6520_v34  ;;  %v6526_v27 = vpop.eup %6525  ;;  %v7488_v34 = vld [vmem:[%s8555_s2 + $0x48] ss:$16 sps:$4 sm:$0xff]   ;;  %v7502_v26 = vld [vmem:[%s8555_s2 + $0x6c] ss:$16 sps:$4 sm:$0xff]  }
 0x153   :  { %v895_v8 = vmul.f32 0.0, %v6526_v27  ;;  %v7512_v27 = vld [vmem:[%s8555_s2 + $0x68] ss:$16 sps:$4 sm:$0xff]  }
 0x154   :  { %v6528_v14 = vpop.eup %6527 }
 0x155   :  { %v7371_v16 = vadd.f32 %v896_v31, %v895_v8  ;;  %v7507_v31 = vld [vmem:[%s8555_s2 + $0x60] ss:$16 sps:$4 sm:$0xff]   ;;  %v7526_v8 = vld [vmem:[%s8555_s2 + $0x8c] ss:$16 sps:$4 sm:$0xff]  }
 0x157   :  { %6529 = vtanh.f32 %v7371_v16 }
 0x161   :  { %v6530_v17 = vpop.eup %6529 }
 0x162   :  { %v899_v12 = vmul.f32 %v6530_v17, %v6528_v14  ;;  %v7536_v14 = vld [vmem:[%s8555_s2 + $0x88] ss:$16 sps:$4 sm:$0xff]   ;;  %v7545_v17 = vld [vmem:[%s8555_s2 + $0xa4] ss:$16 sps:$4 sm:$0xff]  }
 0x164   :  { %v900_v1 = vpack.c.bf16 %v899_v12, %v899_v12  ;;  %v7550_v12 = vld [vmem:[%s8555_s2 + $0xac] ss:$16 sps:$4 sm:$0xff]  }
 0x166   :  { %902 = vst [vmem:[#allocation3] sm:$0xf] %v900_v1  ;;  %903 = vst [vmem:[%s8557_s4] sm:$0xf] %v900_v1  ;;  %v7555_v1 = vld [vmem:[%s8555_s2 + $0xa0] ss:$16 sps:$4 sm:$0xff]  }
 0x16d   :  { %v908_v35 = vld [vmem:[#allocation3] sm:$0xf] }
 0x16e   :  { %1134 = vmatmul.mubr.bf16.vlgmr.msra.gmra.mrb[36].mxu0 %v908_v35  ;;  %1175 = vmatmul.mubr.bf16.vlgmr.msra.gmra.mrb[36].mxu1 %v908_v35  ;;  %v7560_v35 = vld [vmem:[%s8555_s2 + $0xa8] ss:$16 sps:$4 sm:$0xff]  }
 0x16f   :  { %1415 = vmatpush1.bf16.msra.mxu0 %v6912_v36  ;;  %1456 = vmatpush1.bf16.msra.mxu1 %v6924_v38 }
 0x170   :  { %1416 = vmatprep.subr.bf16.mxu0 %v6918_v37  ;;  %1457 = vmatprep.subr.bf16.mxu1 %v6929_v39 }
 0x171   :  { %1446 = vmatprep.mubr.bf16.mxu0 %v8609_v6  ;;  %1487 = vmatprep.mubr.bf16.mxu1 %v8609_v6 }
 0x173   :  { %1417 = vmatpush1.bf16.msra.mxu0 %v6936_v40  ;;  %1458 = vmatpush1.bf16.msra.mxu1 %v6949_v42 }
 0x174   :  { %1418 = vmatprep.subr.bf16.mxu0 %v6943_v41  ;;  %1459 = vmatprep.subr.bf16.mxu1 %v6970_v46 }
 0x177   :  { %1419 = vmatpush1.bf16.msra.mxu0 %v6959_v44  ;;  %1460 = vmatpush1.bf16.msra.mxu1 %v6976_v47 }
 0x178   :  { %1420 = vmatprep.subr.bf16.mxu0 %v6965_v45  ;;  %1461 = vmatprep.subr.bf16.mxu1 %v6981_v48 }
 0x17b   :  { %1421 = vmatpush1.bf16.msra.mxu0 %v6989_v49  ;;  %1462 = vmatpush1.bf16.msra.mxu1 %v7002_v51 }
 0x17c   :  { %1422 = vmatprep.subr.bf16.mxu0 %v6995_v50  ;;  %1463 = vmatprep.subr.bf16.mxu1 %v7017_v54 }
 0x17f   :  { %1423 = vmatpush1.bf16.msra.mxu0 %v7011_v53  ;;  %1464 = vmatpush1.bf16.msra.mxu1 %v7029_v56 }
 0x180   :  { %1424 = vmatprep.subr.bf16.mxu0 %v7023_v55  ;;  %1465 = vmatprep.subr.bf16.mxu1 %v7039_v58 }
 0x183   :  { %1425 = vmatpush1.bf16.msra.mxu0 %v7034_v57  ;;  %1466 = vmatpush1.bf16.msra.mxu1 %v7051_v60 }
 0x184   :  { %1426 = vmatprep.subr.bf16.mxu0 %v7046_v59  ;;  %1467 = vmatprep.subr.bf16.mxu1 %v7069_v63 }
 0x187   :  { %1427 = vmatpush1.bf16.msra.mxu0 %v7063_v62  ;;  %1468 = vmatpush1.bf16.msra.mxu1 %v7079_v2 }
 0x188   :  { %1428 = vmatprep.subr.bf16.mxu0 %v7074_v0  ;;  %1469 = vmatprep.subr.bf16.mxu1 %v7085_v3 }
 0x18b   :  { %1429 = vmatpush1.bf16.msra.mxu0 %v7092_v4  ;;  %1470 = vmatpush1.bf16.msra.mxu1 %v7099_v5 }
 0x241   :  { %v1135_v36 = vpop.f32.mrb[36].mxu0  ;;  %v1176_v37 = vpop.f32.mrb[36].mxu1 }
 0x242   :  { %v1183_v38 = vadd.f32 %v1135_v36, %v7184_v28  ;;  %v1185_v39 = vadd.f32 %v1176_v37, %v7187_v30  ;;  %v1137_v40 = vpop.f32.mrb[37].mxu0  ;;  %v1178_v41 = vpop.f32.mrb[37].mxu1  ;;  %v7569_v36 = vld [vmem:[%s8555_s2 + $0xc4] ss:$16 sps:$4 sm:$0xff]   ;;  %v7574_v37 = vld [vmem:[%s8555_s2 + $0xcc] ss:$16 sps:$4 sm:$0xff]  }
 0x243   :  { %v1184_v42 = vadd.f32 %v1137_v40, %v7190_v32  ;;  %v1186_v44 = vadd.f32 %v1178_v41, %v7193_v33  ;;  %v1139_v45 = vpop.f32.mrb[38].mxu0  ;;  %v1180_v46 = vpop.f32.mrb[38].mxu1  ;;  %v7425_v32 = vld [vmem:[%s8555_s2 + $0x4] ss:$16 sps:$4 sm:$0xff]   ;;  %v7430_v33 = vld [vmem:[%s8555_s2 + $0xc] ss:$16 sps:$4 sm:$0xff]  }
 0x244   :  { %v5710_v47 = vmul.f32 -1.442695, %v1183_v38  ;;  %v1140_v48 = vpop.f32.mrb[39].mxu0  ;;  %v1181_v49 = vpop.f32.mrb[39].mxu1  ;;  %v5712_v51 = vmul.f32 -1.442695, %v1185_v39  ;;  %1727 = vmatprep.subr.bf16.mxu0 %v7425_v32  ;;  %1768 = vmatprep.subr.bf16.mxu1 %v7430_v33 }
 0x245   :  { %v5711_v50 = vmul.f32 -1.442695, %v1184_v42  ;;  %v7579_v38 = vld [vmem:[%s8555_s2 + $0xc0] ss:$16 sps:$4 sm:$0xff]   ;;  %v7584_v39 = vld [vmem:[%s8555_s2 + $0xc8] ss:$16 sps:$4 sm:$0xff]  }
 0x246   :  { %6531 = vpow2.f32 %v5710_v47  ;;  %v7591_v40 = vld [vmem:[%s8555_s2 + $0xe4] ss:$16 sps:$4 sm:$0xff]   ;;  %v7598_v41 = vld [vmem:[%s8555_s2 + $0xe0] ss:$16 sps:$4 sm:$0xff]   ;;  %v7603_v42 = vld [vmem:[%s8555_s2 + $0xe8] ss:$16 sps:$4 sm:$0xff]  }
 0x247   :  { %6533 = vpow2.f32 %v5711_v50 }
 0x248   :  { %6535 = vtanh.f32 %v1186_v44  ;;  %v7608_v44 = vld [vmem:[%s8555_s2 + $0xec] ss:$16 sps:$4 sm:$0xff]  }
 0x249   :  { %6537 = vpow2.f32 %v5712_v51 }
 0x250   :  { %v6532_v53 = vpop.eup %6531 }
 0x251   :  { %v1196_v54 = vadd.f32 1.0, %v6532_v53  ;;  %v6534_v55 = vpop.eup %6533 }
 0x252   :  { %v1197_v56 = vadd.f32 1.0, %v6534_v55  ;;  %v6536_v57 = vpop.eup %6535 }
 0x253   :  { %6539 = vrcp.f32 %v1196_v54  ;;  %v6538_v58 = vpop.eup %6537 }
 0x254   :  { %6541 = vrcp.f32 %v1197_v56  ;;  %v1198_v63 = vadd.f32 1.0, %v6538_v58 }
 0x256   :  { %6543 = vrcp.f32 %v1198_v63 }
 0x25d   :  { %v6540_v59 = vpop.eup %6539 }
 0x25e   :  { %v1208_v60 = vmul.f32 %v6540_v59, %v6536_v57  ;;  %v6542_v62 = vpop.eup %6541 }
 0x25f   :  { %v1207_v0 = vmul.f32 %v6542_v62, %v7371_v16  ;;  %v7531_v16 = vld [vmem:[%s8555_s2 + $0x80] ss:$16 sps:$4 sm:$0xff]  }
 0x260   :  { %v6544_v3 = vpop.eup %6543 }
 0x261   :  { %v7414_v2 = vadd.f32 %v1208_v60, %v1207_v0 }
 0x263   :  { %6545 = vtanh.f32 %v7414_v2 }
 0x26d   :  { %v6546_v4 = vpop.eup %6545 }
 0x26e   :  { %v1211_v5 = vmul.f32 %v6546_v4, %v6544_v3 }
 0x270   :  { %v1212_v28 = vpack.c.bf16 %v1211_v5, %v1211_v5 }
 0x272   :  { %1214 = vst [vmem:[#allocation3] sm:$0xf] %v1212_v28  ;;  %5713 = vst [vmem:[%s8557_s4 + $0x4] sm:$0xf] %v1212_v28 }
 0x279   :  { %v1221_v30 = vld [vmem:[#allocation3] sm:$0xf] }
 0x27a   :  { %1447 = vmatmul.mubr.bf16.vlgmr.msra.gmra.mrb[40].mxu0 %v1221_v30  ;;  %1488 = vmatmul.mubr.bf16.vlgmr.msra.gmra.mrb[40].mxu1 %v1221_v30 }
 0x27b   :  { %1759 = vmatprep.mubr.bf16.mxu0 %v8609_v6  ;;  %1800 = vmatprep.mubr.bf16.mxu1 %v8609_v6 }
 0x27c   :  { %1728 = vmatpush1.bf16.msra.mxu0 %v7435_v10  ;;  %1769 = vmatpush1.bf16.msra.mxu1 %v7440_v19 }
 0x27d   :  { %1729 = vmatprep.subr.bf16.mxu0 %v7449_v22  ;;  %1770 = vmatprep.subr.bf16.mxu1 %v7454_v18 }
 0x280   :  { %1730 = vmatpush1.bf16.msra.mxu0 %v7459_v20  ;;  %1771 = vmatpush1.bf16.msra.mxu1 %v7464_v23 }
 0x281   :  { %1731 = vmatprep.subr.bf16.mxu0 %v7473_v25  ;;  %1772 = vmatprep.subr.bf16.mxu1 %v7478_v21 }
 0x284   :  { %1732 = vmatpush1.bf16.msra.mxu0 %v7483_v24  ;;  %1773 = vmatpush1.bf16.msra.mxu1 %v7488_v34 }
 0x285   :  { %1733 = vmatprep.subr.bf16.mxu0 %v7497_v52  ;;  %1774 = vmatprep.subr.bf16.mxu1 %v7502_v26 }
 0x288   :  { %1734 = vmatpush1.bf16.msra.mxu0 %v7507_v31  ;;  %1775 = vmatpush1.bf16.msra.mxu1 %v7512_v27 }
 0x289   :  { %1735 = vmatprep.subr.bf16.mxu0 %v7521_v29  ;;  %1776 = vmatprep.subr.bf16.mxu1 %v7526_v8 }
 0x28c   :  { %1736 = vmatpush1.bf16.msra.mxu0 %v7531_v16  ;;  %1777 = vmatpush1.bf16.msra.mxu1 %v7536_v14 }
 0x28d   :  { %1737 = vmatprep.subr.bf16.mxu0 %v7545_v17  ;;  %1778 = vmatprep.subr.bf16.mxu1 %v7550_v12 }
 0x290   :  { %1738 = vmatpush1.bf16.msra.mxu0 %v7555_v1  ;;  %1779 = vmatpush1.bf16.msra.mxu1 %v7560_v35 }
 0x291   :  { %1739 = vmatprep.subr.bf16.mxu0 %v7569_v36  ;;  %1780 = vmatprep.subr.bf16.mxu1 %v7574_v37 }
 0x294   :  { %1740 = vmatpush1.bf16.msra.mxu0 %v7579_v38  ;;  %1781 = vmatpush1.bf16.msra.mxu1 %v7584_v39 }
 0x295   :  { %1741 = vmatprep.subr.bf16.mxu0 %v7591_v40  ;;  %1782 = vmatprep.subr.bf16.mxu1 %v7608_v44 }
 0x298   :  { %1742 = vmatpush1.bf16.msra.mxu0 %v7598_v41  ;;  %1783 = vmatpush1.bf16.msra.mxu1 %v7603_v42 }
 0x299   :  { %2040 = vmatprep.subr.bf16.mxu0 %v7425_v32  ;;  %2081 = vmatprep.subr.bf16.mxu1 %v7430_v33 }
 0x34d   :  { %v1448_v45 = vpop.f32.mrb[40].mxu0  ;;  %v1489_v46 = vpop.f32.mrb[40].mxu1 }
 0x34e   :  { %v1496_v47 = vadd.f32 %v1448_v45, %v7196_v43  ;;  %v1498_v48 = vadd.f32 %v1489_v46, %v7199_v61  ;;  %v1450_v49 = vpop.f32.mrb[41].mxu0  ;;  %v1491_v50 = vpop.f32.mrb[41].mxu1 }
 0x34f   :  { %v1497_v51 = vadd.f32 %v1450_v49, %v7202_v7  ;;  %v1499_v53 = vadd.f32 %v1491_v50, %v7205_v9  ;;  %v1452_v54 = vpop.f32.mrb[42].mxu0  ;;  %v1493_v55 = vpop.f32.mrb[42].mxu1 }
 0x350   :  { %v5746_v56 = vmul.f32 -1.442695, %v1496_v47  ;;  %v1453_v57 = vpop.f32.mrb[43].mxu0  ;;  %v1494_v58 = vpop.f32.mrb[43].mxu1  ;;  %v5748_v60 = vmul.f32 -1.442695, %v1498_v48 }
 0x351   :  { %v5747_v59 = vmul.f32 -1.442695, %v1497_v51  ;;  %v8610_v57 = vld [vmem:[#allocation5_spill] sm:$0xff] }
 0x352   :  { %6547 = vpow2.f32 %v5746_v56 }
 0x353   :  { %6549 = vpow2.f32 %v5747_v59 }
 0x354   :  { %6551 = vtanh.f32 %v1499_v53 }
 0x355   :  { %6553 = vpow2.f32 %v5748_v60 }
 0x35c   :  { %v6548_v62 = vpop.eup %6547 }
 0x35d   :  { %v1509_v63 = vadd.f32 1.0, %v6548_v62  ;;  %v6550_v43 = vpop.eup %6549 }
 0x35e   :  { %v1510_v61 = vadd.f32 1.0, %v6550_v43  ;;  %v6552_v7 = vpop.eup %6551 }
 0x35f   :  { %6555 = vrcp.f32 %v1509_v63  ;;  %v6554_v0 = vpop.eup %6553 }
 0x360   :  { %6557 = vrcp.f32 %v1510_v61  ;;  %v1511_v5 = vadd.f32 1.0, %v6554_v0 }
 0x362   :  { %6559 = vrcp.f32 %v1511_v5 }
 0x369   :  { %v6556_v9 = vpop.eup %6555 }
 0x36a   :  { %v1521_v3 = vmul.f32 %v6556_v9, %v6552_v7  ;;  %v6558_v4 = vpop.eup %6557 }
 0x36b   :  { %v1520_v28 = vmul.f32 %v6558_v4, %v7414_v2 }
 0x36c   :  { %v6560_v45 = vpop.eup %6559 }
 0x36d   :  { %v7621_v30 = vadd.f32 %v1521_v3, %v1520_v28 }
 0x36f   :  { %6561 = vtanh.f32 %v7621_v30 }
 0x379   :  { %v6562_v46 = vpop.eup %6561 }
 0x37a   :  { %v1524_v47 = vmul.f32 %v6562_v46, %v6560_v45 }
 0x37c   :  { %v1525_v48 = vpack.c.bf16 %v1524_v47, %v1524_v47 }
 0x37e   :  { %1527 = vst [vmem:[#allocation3] sm:$0xf] %v1525_v48  ;;  %5749 = vst [vmem:[%s8557_s4 + $0x8] sm:$0xf] %v1525_v48 }
 0x385   :  { %v1534_v49 = vld [vmem:[#allocation3] sm:$0xf] }
 0x386   :  { %1760 = vmatmul.mubr.bf16.vlgmr.msra.gmra.mrb[44].mxu0 %v1534_v49  ;;  %1801 = vmatmul.mubr.bf16.vlgmr.msra.gmra.mrb[44].mxu1 %v1534_v49 }
 0x387   :  { %2041 = vmatpush1.bf16.msra.mxu0 %v7435_v10  ;;  %2082 = vmatpush1.bf16.msra.mxu1 %v7440_v19 }
 0x388   :  { %2042 = vmatprep.subr.bf16.mxu0 %v7449_v22  ;;  %2083 = vmatprep.subr.bf16.mxu1 %v7454_v18 }
 0x389   :  { %2072 = vmatprep.mubr.bf16.mxu0 %v8609_v6  ;;  %2113 = vmatprep.mubr.bf16.mxu1 %v8609_v6 }
 0x38b   :  { %2043 = vmatpush1.bf16.msra.mxu0 %v7459_v20  ;;  %2084 = vmatpush1.bf16.msra.mxu1 %v7464_v23 }
 0x38c   :  { %2044 = vmatprep.subr.bf16.mxu0 %v7473_v25  ;;  %2085 = vmatprep.subr.bf16.mxu1 %v7478_v21 }
 0x38f   :  { %2045 = vmatpush1.bf16.msra.mxu0 %v7483_v24  ;;  %2086 = vmatpush1.bf16.msra.mxu1 %v7488_v34 }
 0x390   :  { %2046 = vmatprep.subr.bf16.mxu0 %v7497_v52  ;;  %2087 = vmatprep.subr.bf16.mxu1 %v7502_v26 }
 0x393   :  { %2047 = vmatpush1.bf16.msra.mxu0 %v7507_v31  ;;  %2088 = vmatpush1.bf16.msra.mxu1 %v7512_v27 }
 0x394   :  { %2048 = vmatprep.subr.bf16.mxu0 %v7521_v29  ;;  %2089 = vmatprep.subr.bf16.mxu1 %v7526_v8 }
 0x397   :  { %2049 = vmatpush1.bf16.msra.mxu0 %v7531_v16  ;;  %2090 = vmatpush1.bf16.msra.mxu1 %v7536_v14 }
 0x398   :  { %2050 = vmatprep.subr.bf16.mxu0 %v7545_v17  ;;  %2091 = vmatprep.subr.bf16.mxu1 %v7550_v12 }
 0x39b   :  { %2051 = vmatpush1.bf16.msra.mxu0 %v7555_v1  ;;  %2092 = vmatpush1.bf16.msra.mxu1 %v7560_v35 }
 0x39c   :  { %2052 = vmatprep.subr.bf16.mxu0 %v7569_v36  ;;  %2093 = vmatprep.subr.bf16.mxu1 %v7574_v37 }
 0x39f   :  { %2053 = vmatpush1.bf16.msra.mxu0 %v7579_v38  ;;  %2094 = vmatpush1.bf16.msra.mxu1 %v7584_v39 }
 0x3a0   :  { %2054 = vmatprep.subr.bf16.mxu0 %v7591_v40  ;;  %2095 = vmatprep.subr.bf16.mxu1 %v7608_v44 }
 0x3a3   :  { %2055 = vmatpush1.bf16.msra.mxu0 %v7598_v41  ;;  %2096 = vmatpush1.bf16.msra.mxu1 %v7603_v42 }
 0x3a4   :  { %2353 = vmatprep.subr.bf16.mxu0 %v7425_v32  ;;  %2394 = vmatprep.subr.bf16.mxu1 %v7430_v33 }
 0x459   :  { %v1761_v2 = vpop.f32.mrb[44].mxu0  ;;  %v1802_v50 = vpop.f32.mrb[44].mxu1 }
 0x45a   :  { %v1809_v51 = vadd.f32 %v1761_v2, %v7208_v11  ;;  %v1811_v53 = vadd.f32 %v1802_v50, %v7211_v13  ;;  %v1763_v54 = vpop.f32.mrb[45].mxu0  ;;  %v1804_v55 = vpop.f32.mrb[45].mxu1 }
 0x45b   :  { %v1810_v56 = vadd.f32 %v1763_v54, %v7214_v15  ;;  %v1812_v58 = vadd.f32 %v1804_v55, %v8610_v57  ;;  %v1765_v59 = vpop.f32.mrb[46].mxu0  ;;  %v1806_v60 = vpop.f32.mrb[46].mxu1  ;;  %v8611_v54 = vld [vmem:[#allocation6_spill] sm:$0xff] }
 0x45c   :  { %v5782_v62 = vmul.f32 -1.442695, %v1809_v51  ;;  %v1766_v63 = vpop.f32.mrb[47].mxu0  ;;  %v1807_v43 = vpop.f32.mrb[47].mxu1  ;;  %v5784_v7 = vmul.f32 -1.442695, %v1811_v53 }
 0x45d   :  { %v5783_v61 = vmul.f32 -1.442695, %v1810_v56  ;;  %v8612_v56 = vld [vmem:[#allocation7_spill] sm:$0xff]  ;;  %v8613_v60 = vld [vmem:[#allocation8_spill] sm:$0xff]  ;;  %v8614_v63 = vld [vmem:[#allocation9_spill] sm:$0xff] }
 0x45e   :  { %6563 = vpow2.f32 %v5782_v62 }
 0x45f   :  { %6565 = vpow2.f32 %v5783_v61 }
 0x460   :  { %6567 = vtanh.f32 %v1812_v58 }
 0x461   :  { %6569 = vpow2.f32 %v5784_v7 }
 0x468   :  { %v6564_v0 = vpop.eup %6563 }
 0x469   :  { %v1822_v9 = vadd.f32 1.0, %v6564_v0  ;;  %v6566_v11 = vpop.eup %6565 }
 0x46a   :  { %v1823_v13 = vadd.f32 1.0, %v6566_v11  ;;  %v6568_v15 = vpop.eup %6567 }
 0x46b   :  { %6571 = vrcp.f32 %v1822_v9  ;;  %v6570_v3 = vpop.eup %6569 }
 0x46c   :  { %6573 = vrcp.f32 %v1823_v13  ;;  %v1824_v45 = vadd.f32 1.0, %v6570_v3 }
 0x46e   :  { %6575 = vrcp.f32 %v1824_v45 }
 0x475   :  { %v6572_v4 = vpop.eup %6571 }
 0x476   :  { %v1834_v5 = vmul.f32 %v6572_v4, %v6568_v15  ;;  %v6574_v28 = vpop.eup %6573 }
 0x477   :  { %v1833_v46 = vmul.f32 %v6574_v28, %v7621_v30 }
 0x478   :  { %v6576_v48 = vpop.eup %6575 }
 0x479   :  { %v7666_v47 = vadd.f32 %v1834_v5, %v1833_v46 }
 0x47b   :  { %6577 = vtanh.f32 %v7666_v47 }
 0x485   :  { %v6578_v49 = vpop.eup %6577 }
 0x486   :  { %v1837_v2 = vmul.f32 %v6578_v49, %v6576_v48 }
 0x488   :  { %v1838_v50 = vpack.c.bf16 %v1837_v2, %v1837_v2 }
 0x48a   :  { %1840 = vst [vmem:[#allocation3] sm:$0xf] %v1838_v50  ;;  %5785 = vst [vmem:[%s8557_s4 + $0xc] sm:$0xf] %v1838_v50 }
 0x491   :  { %v1847_v51 = vld [vmem:[#allocation3] sm:$0xf] }
 0x492   :  { %2073 = vmatmul.mubr.bf16.vlgmr.msra.gmra.mrb[48].mxu0 %v1847_v51  ;;  %2114 = vmatmul.mubr.bf16.vlgmr.msra.gmra.mrb[48].mxu1 %v1847_v51 }
 0x493   :  { %2354 = vmatpush1.bf16.msra.mxu0 %v7435_v10  ;;  %2395 = vmatpush1.bf16.msra.mxu1 %v7440_v19 }
 0x494   :  { %2355 = vmatprep.subr.bf16.mxu0 %v7449_v22  ;;  %2396 = vmatprep.subr.bf16.mxu1 %v7454_v18 }
 0x495   :  { %2385 = vmatprep.mubr.bf16.mxu0 %v8609_v6  ;;  %2426 = vmatprep.mubr.bf16.mxu1 %v8609_v6 }
 0x497   :  { %2356 = vmatpush1.bf16.msra.mxu0 %v7459_v20  ;;  %2397 = vmatpush1.bf16.msra.mxu1 %v7464_v23 }
 0x498   :  { %2357 = vmatprep.subr.bf16.mxu0 %v7473_v25  ;;  %2398 = vmatprep.subr.bf16.mxu1 %v7478_v21 }
 0x49b   :  { %2358 = vmatpush1.bf16.msra.mxu0 %v7483_v24  ;;  %2399 = vmatpush1.bf16.msra.mxu1 %v7488_v34 }
 0x49c   :  { %2359 = vmatprep.subr.bf16.mxu0 %v7497_v52  ;;  %2400 = vmatprep.subr.bf16.mxu1 %v7502_v26 }
 0x49f   :  { %2360 = vmatpush1.bf16.msra.mxu0 %v7507_v31  ;;  %2401 = vmatpush1.bf16.msra.mxu1 %v7512_v27 }
 0x4a0   :  { %2361 = vmatprep.subr.bf16.mxu0 %v7521_v29  ;;  %2402 = vmatprep.subr.bf16.mxu1 %v7526_v8 }
 0x4a3   :  { %2362 = vmatpush1.bf16.msra.mxu0 %v7531_v16  ;;  %2403 = vmatpush1.bf16.msra.mxu1 %v7536_v14 }
 0x4a4   :  { %2363 = vmatprep.subr.bf16.mxu0 %v7545_v17  ;;  %2404 = vmatprep.subr.bf16.mxu1 %v7550_v12 }
 0x4a7   :  { %2364 = vmatpush1.bf16.msra.mxu0 %v7555_v1  ;;  %2405 = vmatpush1.bf16.msra.mxu1 %v7560_v35 }
 0x4a8   :  { %2365 = vmatprep.subr.bf16.mxu0 %v7569_v36  ;;  %2406 = vmatprep.subr.bf16.mxu1 %v7574_v37 }
 0x4ab   :  { %2366 = vmatpush1.bf16.msra.mxu0 %v7579_v38  ;;  %2407 = vmatpush1.bf16.msra.mxu1 %v7584_v39 }
 0x4ac   :  { %2367 = vmatprep.subr.bf16.mxu0 %v7591_v40  ;;  %2408 = vmatprep.subr.bf16.mxu1 %v7608_v44 }
 0x4af   :  { %2368 = vmatpush1.bf16.msra.mxu0 %v7598_v41  ;;  %2409 = vmatpush1.bf16.msra.mxu1 %v7603_v42 }
 0x4b0   :  { %2666 = vmatprep.subr.bf16.mxu0 %v7425_v32  ;;  %2707 = vmatprep.subr.bf16.mxu1 %v7430_v33 }
 0x565   :  { %v2074_v30 = vpop.f32.mrb[48].mxu0  ;;  %v2115_v53 = vpop.f32.mrb[48].mxu1 }
 0x566   :  { %v2122_v55 = vadd.f32 %v2074_v30, %v8611_v54  ;;  %v2124_v57 = vadd.f32 %v2115_v53, %v8612_v56  ;;  %v2076_v58 = vpop.f32.mrb[49].mxu0  ;;  %v2117_v59 = vpop.f32.mrb[49].mxu1 }
 0x567   :  { %v2123_v62 = vadd.f32 %v2076_v58, %v8613_v60  ;;  %v2125_v43 = vadd.f32 %v2117_v59, %v8614_v63  ;;  %v2078_v61 = vpop.f32.mrb[50].mxu0  ;;  %v2119_v7 = vpop.f32.mrb[50].mxu1  ;;  %v7770_v63 = vld [vmem:[%s8555_s2 + $0xc] ss:$16 sps:$4 sm:$0xff]  }
 0x568   :  { %v5818_v0 = vmul.f32 -1.442695, %v2122_v55  ;;  %v2079_v9 = vpop.f32.mrb[51].mxu0  ;;  %v2120_v11 = vpop.f32.mrb[51].mxu1  ;;  %v5820_v33 = vmul.f32 -1.442695, %v2124_v57 }
 0x569   :  { %v5819_v32 = vmul.f32 -1.442695, %v2123_v62  ;;  %v7765_v62 = vld [vmem:[%s8555_s2 + $0x4] ss:$16 sps:$4 sm:$0xff]   ;;  %v7780_v61 = vld [vmem:[%s8555_s2 + $0x8] ss:$16 sps:$4 sm:$0xff]  }
 0x56a   :  { %6579 = vpow2.f32 %v5818_v0  ;;  %v7789_v7 = vld [vmem:[%s8555_s2 + $0x24] ss:$16 sps:$4 sm:$0xff]   ;;  %v7794_v0 = vld [vmem:[%s8555_s2 + $0x2c] ss:$16 sps:$4 sm:$0xff]   ;;  %v7799_v9 = vld [vmem:[%s8555_s2 + $0x20] ss:$16 sps:$4 sm:$0xff]  }
 0x56b   :  { %6581 = vpow2.f32 %v5819_v32  ;;  %v7804_v11 = vld [vmem:[%s8555_s2 + $0x28] ss:$16 sps:$4 sm:$0xff]   ;;  %v7813_v32 = vld [vmem:[%s8555_s2 + $0x44] ss:$16 sps:$4 sm:$0xff]  }
 0x56c   :  { %6583 = vtanh.f32 %v2125_v43  ;;  %v7775_v43 = vld [vmem:[%s8555_s2] ss:$16 sps:$4 sm:$0xff]  }
 0x56d   :  { %6585 = vpow2.f32 %v5820_v33  ;;  %v7818_v33 = vld [vmem:[%s8555_s2 + $0x4c] ss:$16 sps:$4 sm:$0xff]  }
 0x574   :  { %v6580_v13 = vpop.eup %6579 }
 0x575   :  { %v2135_v15 = vadd.f32 1.0, %v6580_v13  ;;  %v6582_v3 = vpop.eup %6581  ;;  %v7823_v13 = vld [vmem:[%s8555_s2 + $0x40] ss:$16 sps:$4 sm:$0xff]  }
 0x576   :  { %v2136_v4 = vadd.f32 1.0, %v6582_v3  ;;  %v6584_v5 = vpop.eup %6583  ;;  %v7837_v3 = vld [vmem:[%s8555_s2 + $0x64] ss:$16 sps:$4 sm:$0xff]  }
 0x577   :  { %6587 = vrcp.f32 %v2135_v15  ;;  %v6586_v28 = vpop.eup %6585  ;;  %v7828_v15 = vld [vmem:[%s8555_s2 + $0x48] ss:$16 sps:$4 sm:$0xff]  }
 0x578   :  { %6589 = vrcp.f32 %v2136_v4  ;;  %v2137_v49 = vadd.f32 1.0, %v6586_v28  ;;  %v7842_v4 = vld [vmem:[%s8555_s2 + $0x6c] ss:$16 sps:$4 sm:$0xff]   ;;  %v7852_v28 = vld [vmem:[%s8555_s2 + $0x68] ss:$16 sps:$4 sm:$0xff]  }
 0x57a   :  { %6591 = vrcp.f32 %v2137_v49  ;;  %v7876_v49 = vld [vmem:[%s8555_s2 + $0x88] ss:$16 sps:$4 sm:$0xff]  }
 0x581   :  { %v6588_v45 = vpop.eup %6587 }
 0x582   :  { %v2147_v46 = vmul.f32 %v6588_v45, %v6584_v5  ;;  %v6590_v48 = vpop.eup %6589  ;;  %v7847_v5 = vld [vmem:[%s8555_s2 + $0x60] ss:$16 sps:$4 sm:$0xff]   ;;  %v7861_v45 = vld [vmem:[%s8555_s2 + $0x84] ss:$16 sps:$4 sm:$0xff]  }
 0x583   :  { %v2146_v2 = vmul.f32 %v6590_v48, %v7666_v47  ;;  %v7871_v48 = vld [vmem:[%s8555_s2 + $0x80] ss:$16 sps:$4 sm:$0xff]  }
 0x584   :  { %v6592_v51 = vpop.eup %6591 }
 0x585   :  { %v7711_v50 = vadd.f32 %v2147_v46, %v2146_v2  ;;  %v7866_v46 = vld [vmem:[%s8555_s2 + $0x8c] ss:$16 sps:$4 sm:$0xff]   ;;  %v7885_v2 = vld [vmem:[%s8555_s2 + $0xa4] ss:$16 sps:$4 sm:$0xff]  }
 0x587   :  { %6593 = vtanh.f32 %v7711_v50 }
 0x591   :  { %v6594_v30 = vpop.eup %6593 }
 0x592   :  { %v2150_v53 = vmul.f32 %v6594_v30, %v6592_v51  ;;  %v7895_v51 = vld [vmem:[%s8555_s2 + $0xa0] ss:$16 sps:$4 sm:$0xff]   ;;  %v7900_v30 = vld [vmem:[%s8555_s2 + $0xa8] ss:$16 sps:$4 sm:$0xff]  }
 0x594   :  { %v2151_v54 = vpack.c.bf16 %v2150_v53, %v2150_v53  ;;  %v7909_v53 = vld [vmem:[%s8555_s2 + $0xc4] ss:$16 sps:$4 sm:$0xff]  }
 0x596   :  { %2153 = vst [vmem:[#allocation3] sm:$0xf] %v2151_v54  ;;  %5821 = vst [vmem:[%s8557_s4 + $0x10] sm:$0xf] %v2151_v54  ;;  %v7914_v54 = vld [vmem:[%s8555_s2 + $0xcc] ss:$16 sps:$4 sm:$0xff]  }
 0x59d   :  { %v2160_v55 = vld [vmem:[#allocation3] sm:$0xf] }
 0x59e   :  { %2386 = vmatmul.mubr.bf16.vlgmr.msra.gmra.mrb[52].mxu0 %v2160_v55  ;;  %2427 = vmatmul.mubr.bf16.vlgmr.msra.gmra.mrb[52].mxu1 %v2160_v55  ;;  %v7919_v55 = vld [vmem:[%s8555_s2 + $0xc0] ss:$16 sps:$4 sm:$0xff]  }
 0x59f   :  { %2667 = vmatpush1.bf16.msra.mxu0 %v7435_v10  ;;  %2708 = vmatpush1.bf16.msra.mxu1 %v7440_v19 }
 0x5a0   :  { %2668 = vmatprep.subr.bf16.mxu0 %v7449_v22  ;;  %2709 = vmatprep.subr.bf16.mxu1 %v7454_v18  ;;  %v8615_v22 = vld [vmem:[#allocation10_spill] sm:$0xff] }
 0x5a1   :  { %2698 = vmatprep.mubr.bf16.mxu0 %v8609_v6  ;;  %2739 = vmatprep.mubr.bf16.mxu1 %v8609_v6 }
 0x5a3   :  { %2669 = vmatpush1.bf16.msra.mxu0 %v7459_v20  ;;  %2710 = vmatpush1.bf16.msra.mxu1 %v7464_v23  ;;  %v8616_v20 = vld [vmem:[#allocation11_spill] sm:$0xff] }
 0x5a4   :  { %2670 = vmatprep.subr.bf16.mxu0 %v7473_v25  ;;  %2711 = vmatprep.subr.bf16.mxu1 %v7478_v21 }
 0x5a7   :  { %2671 = vmatpush1.bf16.msra.mxu0 %v7483_v24  ;;  %2712 = vmatpush1.bf16.msra.mxu1 %v7488_v34  ;;  %v8617_v24 = vld [vmem:[#allocation12_spill] sm:$0xff] }
 0x5a8   :  { %2672 = vmatprep.subr.bf16.mxu0 %v7497_v52  ;;  %2713 = vmatprep.subr.bf16.mxu1 %v7502_v26  ;;  %v8618_v52 = vld [vmem:[#allocation13_spill] sm:$0xff] }
 0x5ab   :  { %2673 = vmatpush1.bf16.msra.mxu0 %v7507_v31  ;;  %2714 = vmatpush1.bf16.msra.mxu1 %v7512_v27 }
 0x5ac   :  { %2674 = vmatprep.subr.bf16.mxu0 %v7521_v29  ;;  %2715 = vmatprep.subr.bf16.mxu1 %v7526_v8 }
 0x5af   :  { %2675 = vmatpush1.bf16.msra.mxu0 %v7531_v16  ;;  %2716 = vmatpush1.bf16.msra.mxu1 %v7536_v14 }
 0x5b0   :  { %2676 = vmatprep.subr.bf16.mxu0 %v7545_v17  ;;  %2717 = vmatprep.subr.bf16.mxu1 %v7550_v12 }
 0x5b3   :  { %2677 = vmatpush1.bf16.msra.mxu0 %v7555_v1  ;;  %2718 = vmatpush1.bf16.msra.mxu1 %v7560_v35 }
 0x5b4   :  { %2678 = vmatprep.subr.bf16.mxu0 %v7569_v36  ;;  %2719 = vmatprep.subr.bf16.mxu1 %v7574_v37 }
 0x5b7   :  { %2679 = vmatpush1.bf16.msra.mxu0 %v7579_v38  ;;  %2720 = vmatpush1.bf16.msra.mxu1 %v7584_v39 }
 0x5b8   :  { %2680 = vmatprep.subr.bf16.mxu0 %v7591_v40  ;;  %2721 = vmatprep.subr.bf16.mxu1 %v7608_v44 }
 0x5bb   :  { %2681 = vmatpush1.bf16.msra.mxu0 %v7598_v41  ;;  %2722 = vmatpush1.bf16.msra.mxu1 %v7603_v42 }
 0x5bc   :  { %2979 = vmatprep.subr.bf16.mxu0 %v7765_v62  ;;  %3020 = vmatprep.subr.bf16.mxu1 %v7770_v63 }
 0x671   :  { %v2387_v10 = vpop.f32.mrb[52].mxu0  ;;  %v2428_v19 = vpop.f32.mrb[52].mxu1 }
 0x672   :  { %v2435_v18 = vadd.f32 %v2387_v10, %v8615_v22  ;;  %v2437_v23 = vadd.f32 %v2428_v19, %v8616_v20  ;;  %v2389_v25 = vpop.f32.mrb[53].mxu0  ;;  %v2430_v21 = vpop.f32.mrb[53].mxu1  ;;  %v7924_v10 = vld [vmem:[%s8555_s2 + $0xc8] ss:$16 sps:$4 sm:$0xff]   ;;  %v7931_v19 = vld [vmem:[%s8555_s2 + $0xe4] ss:$16 sps:$4 sm:$0xff]  }
 0x673   :  { %v2436_v34 = vadd.f32 %v2389_v25, %v8617_v24  ;;  %v2438_v26 = vadd.f32 %v2430_v21, %v8618_v52  ;;  %v2391_v31 = vpop.f32.mrb[54].mxu0  ;;  %v2432_v27 = vpop.f32.mrb[54].mxu1  ;;  %v7938_v22 = vld [vmem:[%s8555_s2 + $0xe0] ss:$16 sps:$4 sm:$0xff]   ;;  %v7948_v20 = vld [vmem:[%s8555_s2 + $0xec] ss:$16 sps:$4 sm:$0xff]  }
 0x674   :  { %v5854_v29 = vmul.f32 -1.442695, %v2435_v18  ;;  %v2392_v8 = vpop.f32.mrb[55].mxu0  ;;  %v2433_v16 = vpop.f32.mrb[55].mxu1  ;;  %v5856_v17 = vmul.f32 -1.442695, %v2437_v23 }
 0x675   :  { %v5855_v14 = vmul.f32 -1.442695, %v2436_v34  ;;  %v7943_v18 = vld [vmem:[%s8555_s2 + $0xe8] ss:$16 sps:$4 sm:$0xff]   ;;  %v8619_v21 = vld [vmem:[#allocation14_spill] sm:$0xff]  ;;  %v8621_v27 = vld [vmem:[#allocation16_spill] sm:$0xff] }
 0x676   :  { %6595 = vpow2.f32 %v5854_v29  ;;  %v8620_v34 = vld [vmem:[#allocation15_spill] sm:$0xff]  ;;  %v8622_v8 = vld [vmem:[#allocation17_spill] sm:$0xff] }
 0x677   :  { %6597 = vpow2.f32 %v5855_v14 }
 0x678   :  { %6599 = vtanh.f32 %v2438_v26 }
 0x679   :  { %6601 = vpow2.f32 %v5856_v17 }
 0x680   :  { %v6596_v12 = vpop.eup %6595 }
 0x681   :  { %v2448_v1 = vadd.f32 1.0, %v6596_v12  ;;  %v6598_v35 = vpop.eup %6597 }
 0x682   :  { %v2449_v36 = vadd.f32 1.0, %v6598_v35  ;;  %v6600_v37 = vpop.eup %6599 }
 0x683   :  { %6603 = vrcp.f32 %v2448_v1  ;;  %v6602_v38 = vpop.eup %6601 }
 0x684   :  { %6605 = vrcp.f32 %v2449_v36  ;;  %v2450_v42 = vadd.f32 1.0, %v6602_v38 }
 0x686   :  { %6607 = vrcp.f32 %v2450_v42 }
 0x68d   :  { %v6604_v39 = vpop.eup %6603 }
 0x68e   :  { %v2460_v40 = vmul.f32 %v6604_v39, %v6600_v37  ;;  %v6606_v41 = vpop.eup %6605 }
 0x68f   :  { %v2459_v44 = vmul.f32 %v6606_v41, %v7711_v50  ;;  %v7890_v50 = vld [vmem:[%s8555_s2 + $0xac] ss:$16 sps:$4 sm:$0xff]  }
 0x690   :  { %v6608_v56 = vpop.eup %6607 }
 0x691   :  { %v7754_v47 = vadd.f32 %v2460_v40, %v2459_v44 }
 0x693   :  { %6609 = vtanh.f32 %v7754_v47 }
 0x69d   :  { %v6610_v57 = vpop.eup %6609 }
 0x69e   :  { %v2463_v58 = vmul.f32 %v6610_v57, %v6608_v56 }
 0x6a0   :  { %v2464_v59 = vpack.c.bf16 %v2463_v58, %v2463_v58 }
 0x6a2   :  { %2466 = vst [vmem:[#allocation3] sm:$0xf] %v2464_v59  ;;  %5857 = vst [vmem:[%s8557_s4 + $0x14] sm:$0xf] %v2464_v59 }
 0x6a9   :  { %v2473_v60 = vld [vmem:[#allocation3] sm:$0xf] }
 0x6aa   :  { %2699 = vmatmul.mubr.bf16.vlgmr.msra.gmra.mrb[56].mxu0 %v2473_v60  ;;  %2740 = vmatmul.mubr.bf16.vlgmr.msra.gmra.mrb[56].mxu1 %v2473_v60 }
 0x6ab   :  { %3011 = vmatprep.mubr.bf16.mxu0 %v8609_v6  ;;  %3052 = vmatprep.mubr.bf16.mxu1 %v8609_v6 }
 0x6ac   :  { %2980 = vmatpush1.bf16.msra.mxu0 %v7775_v43  ;;  %3021 = vmatpush1.bf16.msra.mxu1 %v7780_v61 }
 0x6ad   :  { %2981 = vmatprep.subr.bf16.mxu0 %v7789_v7  ;;  %3022 = vmatprep.subr.bf16.mxu1 %v7794_v0 }
 0x6b0   :  { %2982 = vmatpush1.bf16.msra.mxu0 %v7799_v9  ;;  %3023 = vmatpush1.bf16.msra.mxu1 %v7804_v11 }
 0x6b1   :  { %2983 = vmatprep.subr.bf16.mxu0 %v7813_v32  ;;  %3024 = vmatprep.subr.bf16.mxu1 %v7818_v33 }
 0x6b4   :  { %2984 = vmatpush1.bf16.msra.mxu0 %v7823_v13  ;;  %3025 = vmatpush1.bf16.msra.mxu1 %v7828_v15 }
 0x6b5   :  { %2985 = vmatprep.subr.bf16.mxu0 %v7837_v3  ;;  %3026 = vmatprep.subr.bf16.mxu1 %v7842_v4 }
 0x6b8   :  { %2986 = vmatpush1.bf16.msra.mxu0 %v7847_v5  ;;  %3027 = vmatpush1.bf16.msra.mxu1 %v7852_v28 }
 0x6b9   :  { %2987 = vmatprep.subr.bf16.mxu0 %v7861_v45  ;;  %3028 = vmatprep.subr.bf16.mxu1 %v7866_v46 }
 0x6bc   :  { %2988 = vmatpush1.bf16.msra.mxu0 %v7871_v48  ;;  %3029 = vmatpush1.bf16.msra.mxu1 %v7876_v49 }
 0x6bd   :  { %2989 = vmatprep.subr.bf16.mxu0 %v7885_v2  ;;  %3030 = vmatprep.subr.bf16.mxu1 %v7890_v50 }
 0x6c0   :  { %2990 = vmatpush1.bf16.msra.mxu0 %v7895_v51  ;;  %3031 = vmatpush1.bf16.msra.mxu1 %v7900_v30 }
 0x6c1   :  { %2991 = vmatprep.subr.bf16.mxu0 %v7909_v53  ;;  %3032 = vmatprep.subr.bf16.mxu1 %v7914_v54 }
 0x6c4   :  { %2992 = vmatpush1.bf16.msra.mxu0 %v7919_v55  ;;  %3033 = vmatpush1.bf16.msra.mxu1 %v7924_v10 }
 0x6c5   :  { %2993 = vmatprep.subr.bf16.mxu0 %v7931_v19  ;;  %3034 = vmatprep.subr.bf16.mxu1 %v7948_v20 }
 0x6c8   :  { %2994 = vmatpush1.bf16.msra.mxu0 %v7938_v22  ;;  %3035 = vmatpush1.bf16.msra.mxu1 %v7943_v18 }
 0x6c9   :  { %3292 = vmatprep.subr.bf16.mxu0 %v7765_v62  ;;  %3333 = vmatprep.subr.bf16.mxu1 %v7770_v63 }
 0x77d   :  { %v2700_v23 = vpop.f32.mrb[56].mxu0  ;;  %v2741_v25 = vpop.f32.mrb[56].mxu1 }
 0x77e   :  { %v2748_v24 = vadd.f32 %v2700_v23, %v8619_v21  ;;  %v2750_v52 = vadd.f32 %v2741_v25, %v8620_v34  ;;  %v2702_v26 = vpop.f32.mrb[57].mxu0  ;;  %v2743_v31 = vpop.f32.mrb[57].mxu1 }
 0x77f   :  { %v2749_v29 = vadd.f32 %v2702_v26, %v8621_v27  ;;  %v2751_v16 = vadd.f32 %v2743_v31, %v8622_v8  ;;  %v2704_v14 = vpop.f32.mrb[58].mxu0  ;;  %v2745_v17 = vpop.f32.mrb[58].mxu1  ;;  %v8623_v31 = vld [vmem:[#allocation18_spill] sm:$0xff] }
 0x780   :  { %v5890_v12 = vmul.f32 -1.442695, %v2748_v24  ;;  %v2705_v1 = vpop.f32.mrb[59].mxu0  ;;  %v2746_v35 = vpop.f32.mrb[59].mxu1  ;;  %v5892_v37 = vmul.f32 -1.442695, %v2750_v52 }
 0x781   :  { %v5891_v36 = vmul.f32 -1.442695, %v2749_v29  ;;  %v8624_v29 = vld [vmem:[#allocation19_spill] sm:$0xff]  ;;  %v8625_v17 = vld [vmem:[#allocation20_spill] sm:$0xff]  ;;  %v8626_v1 = vld [vmem:[#allocation21_spill] sm:$0xff] }
 0x782   :  { %6611 = vpow2.f32 %v5890_v12 }
 0x783   :  { %6613 = vpow2.f32 %v5891_v36 }
 0x784   :  { %6615 = vtanh.f32 %v2751_v16 }
 0x785   :  { %6617 = vpow2.f32 %v5892_v37 }
 0x78c   :  { %v6612_v38 = vpop.eup %6611 }
 0x78d   :  { %v2761_v39 = vadd.f32 1.0, %v6612_v38  ;;  %v6614_v40 = vpop.eup %6613 }
 0x78e   :  { %v2762_v41 = vadd.f32 1.0, %v6614_v40  ;;  %v6616_v42 = vpop.eup %6615 }
 0x78f   :  { %6619 = vrcp.f32 %v2761_v39  ;;  %v6618_v44 = vpop.eup %6617 }
 0x790   :  { %6621 = vrcp.f32 %v2762_v41  ;;  %v2763_v59 = vadd.f32 1.0, %v6618_v44 }
 0x792   :  { %6623 = vrcp.f32 %v2763_v59 }
 0x799   :  { %v6620_v56 = vpop.eup %6619 }
 0x79a   :  { %v2773_v57 = vmul.f32 %v6620_v56, %v6616_v42  ;;  %v6622_v58 = vpop.eup %6621 }
 0x79b   :  { %v2772_v60 = vmul.f32 %v6622_v58, %v7754_v47 }
 0x79c   :  { %v6624_v25 = vpop.eup %6623 }
 0x79d   :  { %v7961_v23 = vadd.f32 %v2773_v57, %v2772_v60 }
 0x79f   :  { %6625 = vtanh.f32 %v7961_v23 }
 0x7a9   :  { %v6626_v21 = vpop.eup %6625 }
 0x7aa   :  { %v2776_v24 = vmul.f32 %v6626_v21, %v6624_v25 }
 0x7ac   :  { %v2777_v34 = vpack.c.bf16 %v2776_v24, %v2776_v24 }
 0x7ae   :  { %5893 = vst [vmem:[%s8557_s4 + $0x18] sm:$0xf] %v2777_v34  ;;  %2779 = vst [vmem:[#allocation3] sm:$0xf] %v2777_v34 }
 0x7b5   :  { %v2786_v52 = vld [vmem:[#allocation3] sm:$0xf] }
 0x7b6   :  { %3012 = vmatmul.mubr.bf16.vlgmr.msra.gmra.mrb[60].mxu0 %v2786_v52  ;;  %3053 = vmatmul.mubr.bf16.vlgmr.msra.gmra.mrb[60].mxu1 %v2786_v52 }
 0x7b7   :  { %3293 = vmatpush1.bf16.msra.mxu0 %v7775_v43  ;;  %3334 = vmatpush1.bf16.msra.mxu1 %v7780_v61 }
 0x7b8   :  { %3294 = vmatprep.subr.bf16.mxu0 %v7789_v7  ;;  %3335 = vmatprep.subr.bf16.mxu1 %v7794_v0 }
 0x7b9   :  { %3324 = vmatprep.mubr.bf16.mxu0 %v8609_v6  ;;  %3365 = vmatprep.mubr.bf16.mxu1 %v8609_v6 }
 0x7bb   :  { %3295 = vmatpush1.bf16.msra.mxu0 %v7799_v9  ;;  %3336 = vmatpush1.bf16.msra.mxu1 %v7804_v11 }
 0x7bc   :  { %3296 = vmatprep.subr.bf16.mxu0 %v7813_v32  ;;  %3337 = vmatprep.subr.bf16.mxu1 %v7818_v33 }
 0x7bf   :  { %3297 = vmatpush1.bf16.msra.mxu0 %v7823_v13  ;;  %3338 = vmatpush1.bf16.msra.mxu1 %v7828_v15 }
 0x7c0   :  { %3298 = vmatprep.subr.bf16.mxu0 %v7837_v3  ;;  %3339 = vmatprep.subr.bf16.mxu1 %v7842_v4 }
 0x7c3   :  { %3299 = vmatpush1.bf16.msra.mxu0 %v7847_v5  ;;  %3340 = vmatpush1.bf16.msra.mxu1 %v7852_v28 }
 0x7c4   :  { %3300 = vmatprep.subr.bf16.mxu0 %v7861_v45  ;;  %3341 = vmatprep.subr.bf16.mxu1 %v7866_v46 }
 0x7c7   :  { %3301 = vmatpush1.bf16.msra.mxu0 %v7871_v48  ;;  %3342 = vmatpush1.bf16.msra.mxu1 %v7876_v49 }
 0x7c8   :  { %3302 = vmatprep.subr.bf16.mxu0 %v7885_v2  ;;  %3343 = vmatprep.subr.bf16.mxu1 %v7890_v50 }
 0x7cb   :  { %3303 = vmatpush1.bf16.msra.mxu0 %v7895_v51  ;;  %3344 = vmatpush1.bf16.msra.mxu1 %v7900_v30 }
 0x7cc   :  { %3304 = vmatprep.subr.bf16.mxu0 %v7909_v53  ;;  %3345 = vmatprep.subr.bf16.mxu1 %v7914_v54 }
 0x7cf   :  { %3305 = vmatpush1.bf16.msra.mxu0 %v7919_v55  ;;  %3346 = vmatpush1.bf16.msra.mxu1 %v7924_v10 }
 0x7d0   :  { %3306 = vmatprep.subr.bf16.mxu0 %v7931_v19  ;;  %3347 = vmatprep.subr.bf16.mxu1 %v7948_v20 }
 0x7d3   :  { %3307 = vmatpush1.bf16.msra.mxu0 %v7938_v22  ;;  %3348 = vmatpush1.bf16.msra.mxu1 %v7943_v18 }
 0x7d4   :  { %3605 = vmatprep.subr.bf16.mxu0 %v7765_v62  ;;  %3646 = vmatprep.subr.bf16.mxu1 %v7770_v63 }
 0x889   :  { %v3013_v47 = vpop.f32.mrb[60].mxu0  ;;  %v3054_v26 = vpop.f32.mrb[60].mxu1 }
 0x88a   :  { %v3061_v27 = vadd.f32 %v3013_v47, %v8623_v31  ;;  %v3063_v8 = vadd.f32 %v3054_v26, %v8624_v29  ;;  %v3015_v16 = vpop.f32.mrb[61].mxu0  ;;  %v3056_v14 = vpop.f32.mrb[61].mxu1 }
 0x88b   :  { %v3062_v12 = vadd.f32 %v3015_v16, %v8625_v17  ;;  %v3064_v35 = vadd.f32 %v3056_v14, %v8626_v1  ;;  %v3017_v36 = vpop.f32.mrb[62].mxu0  ;;  %v3058_v37 = vpop.f32.mrb[62].mxu1  ;;  %v8627_v14 = vld [vmem:[#allocation22_spill] sm:$0xff] }
 0x88c   :  { %v5926_v38 = vmul.f32 -1.442695, %v3061_v27  ;;  %v3018_v39 = vpop.f32.mrb[63].mxu0  ;;  %v3059_v40 = vpop.f32.mrb[63].mxu1  ;;  %v5928_v42 = vmul.f32 -1.442695, %v3063_v8 }
 0x88d   :  { %v5927_v41 = vmul.f32 -1.442695, %v3062_v12  ;;  %v8628_v12 = vld [vmem:[#allocation23_spill] sm:$0xff]  ;;  %v8629_v37 = vld [vmem:[#allocation24_spill] sm:$0xff]  ;;  %v8630_v39 = vld [vmem:[#allocation25_spill] sm:$0xff] }
 0x88e   :  { %6627 = vpow2.f32 %v5926_v38 }
 0x88f   :  { %6629 = vpow2.f32 %v5927_v41 }
 0x890   :  { %6631 = vtanh.f32 %v3064_v35 }
 0x891   :  { %6633 = vpow2.f32 %v5928_v42 }
 0x898   :  { %v6628_v44 = vpop.eup %6627 }
 0x899   :  { %v3074_v56 = vadd.f32 1.0, %v6628_v44  ;;  %v6630_v57 = vpop.eup %6629 }
 0x89a   :  { %v3075_v58 = vadd.f32 1.0, %v6630_v57  ;;  %v6632_v59 = vpop.eup %6631 }
 0x89b   :  { %6635 = vrcp.f32 %v3074_v56  ;;  %v6634_v60 = vpop.eup %6633 }
 0x89c   :  { %6637 = vrcp.f32 %v3075_v58  ;;  %v3076_v34 = vadd.f32 1.0, %v6634_v60 }
 0x89e   :  { %6639 = vrcp.f32 %v3076_v34 }
 0x8a5   :  { %v6636_v25 = vpop.eup %6635 }
 0x8a6   :  { %v3086_v21 = vmul.f32 %v6636_v25, %v6632_v59  ;;  %v6638_v24 = vpop.eup %6637 }
 0x8a7   :  { %v3085_v52 = vmul.f32 %v6638_v24, %v7961_v23 }
 0x8a8   :  { %v6640_v26 = vpop.eup %6639 }
 0x8a9   :  { %v8006_v47 = vadd.f32 %v3086_v21, %v3085_v52 }
 0x8ab   :  { %6641 = vtanh.f32 %v8006_v47 }
 0x8b5   :  { %v6642_v31 = vpop.eup %6641 }
 0x8b6   :  { %v3089_v27 = vmul.f32 %v6642_v31, %v6640_v26 }
 0x8b8   :  { %v3090_v29 = vpack.c.bf16 %v3089_v27, %v3089_v27 }
 0x8ba   :  { %5929 = vst [vmem:[%s8557_s4 + $0x1c] sm:$0xf] %v3090_v29  ;;  %3092 = vst [vmem:[#allocation3] sm:$0xf] %v3090_v29 }
 0x8c1   :  { %v3099_v8 = vld [vmem:[#allocation3] sm:$0xf] }
 0x8c2   :  { %3325 = vmatmul.mubr.bf16.vlgmr.msra.gmra.mrb[64].mxu0 %v3099_v8  ;;  %3366 = vmatmul.mubr.bf16.vlgmr.msra.gmra.mrb[64].mxu1 %v3099_v8 }
 0x8c3   :  { %3606 = vmatpush1.bf16.msra.mxu0 %v7775_v43  ;;  %3647 = vmatpush1.bf16.msra.mxu1 %v7780_v61 }
 0x8c4   :  { %3607 = vmatprep.subr.bf16.mxu0 %v7789_v7  ;;  %3648 = vmatprep.subr.bf16.mxu1 %v7794_v0 }
 0x8c5   :  { %3637 = vmatprep.mubr.bf16.mxu0 %v8609_v6  ;;  %3678 = vmatprep.mubr.bf16.mxu1 %v8609_v6 }
 0x8c7   :  { %3608 = vmatpush1.bf16.msra.mxu0 %v7799_v9  ;;  %3649 = vmatpush1.bf16.msra.mxu1 %v7804_v11 }
 0x8c8   :  { %3609 = vmatprep.subr.bf16.mxu0 %v7813_v32  ;;  %3650 = vmatprep.subr.bf16.mxu1 %v7818_v33 }
 0x8cb   :  { %3610 = vmatpush1.bf16.msra.mxu0 %v7823_v13  ;;  %3651 = vmatpush1.bf16.msra.mxu1 %v7828_v15 }
 0x8cc   :  { %3611 = vmatprep.subr.bf16.mxu0 %v7837_v3  ;;  %3652 = vmatprep.subr.bf16.mxu1 %v7842_v4 }
 0x8cf   :  { %3612 = vmatpush1.bf16.msra.mxu0 %v7847_v5  ;;  %3653 = vmatpush1.bf16.msra.mxu1 %v7852_v28 }
 0x8d0   :  { %3613 = vmatprep.subr.bf16.mxu0 %v7861_v45  ;;  %3654 = vmatprep.subr.bf16.mxu1 %v7866_v46 }
 0x8d3   :  { %3614 = vmatpush1.bf16.msra.mxu0 %v7871_v48  ;;  %3655 = vmatpush1.bf16.msra.mxu1 %v7876_v49 }
 0x8d4   :  { %3615 = vmatprep.subr.bf16.mxu0 %v7885_v2  ;;  %3656 = vmatprep.subr.bf16.mxu1 %v7890_v50 }
 0x8d7   :  { %3616 = vmatpush1.bf16.msra.mxu0 %v7895_v51  ;;  %3657 = vmatpush1.bf16.msra.mxu1 %v7900_v30 }
 0x8d8   :  { %3617 = vmatprep.subr.bf16.mxu0 %v7909_v53  ;;  %3658 = vmatprep.subr.bf16.mxu1 %v7914_v54 }
 0x8db   :  { %3618 = vmatpush1.bf16.msra.mxu0 %v7919_v55  ;;  %3659 = vmatpush1.bf16.msra.mxu1 %v7924_v10 }
 0x8dc   :  { %3619 = vmatprep.subr.bf16.mxu0 %v7931_v19  ;;  %3660 = vmatprep.subr.bf16.mxu1 %v7948_v20 }
 0x8df   :  { %3620 = vmatpush1.bf16.msra.mxu0 %v7938_v22  ;;  %3661 = vmatpush1.bf16.msra.mxu1 %v7943_v18 }
 0x8e0   :  { %3918 = vmatprep.subr.bf16.mxu0 %v7765_v62  ;;  %3959 = vmatprep.subr.bf16.mxu1 %v7770_v63 }
 0x995   :  { %v3326_v23 = vpop.f32.mrb[64].mxu0  ;;  %v3367_v16 = vpop.f32.mrb[64].mxu1 }
 0x996   :  { %v3374_v17 = vadd.f32 %v3326_v23, %v8627_v14  ;;  %v3376_v1 = vadd.f32 %v3367_v16, %v8628_v12  ;;  %v3328_v35 = vpop.f32.mrb[65].mxu0  ;;  %v3369_v36 = vpop.f32.mrb[65].mxu1 }
 0x997   :  { %v3375_v38 = vadd.f32 %v3328_v35, %v8629_v37  ;;  %v3377_v40 = vadd.f32 %v3369_v36, %v8630_v39  ;;  %v3330_v41 = vpop.f32.mrb[66].mxu0  ;;  %v3371_v42 = vpop.f32.mrb[66].mxu1  ;;  %v8110_v39 = vld [vmem:[%s8555_s2 + $0xc] ss:$16 sps:$4 sm:$0xff]  }
 0x998   :  { %v5962_v44 = vmul.f32 -1.442695, %v3374_v17  ;;  %v3331_v56 = vpop.f32.mrb[67].mxu0  ;;  %v3372_v57 = vpop.f32.mrb[67].mxu1  ;;  %v5964_v63 = vmul.f32 -1.442695, %v3376_v1 }
 0x999   :  { %v5963_v62 = vmul.f32 -1.442695, %v3375_v38  ;;  %v8105_v38 = vld [vmem:[%s8555_s2 + $0x4] ss:$16 sps:$4 sm:$0xff]   ;;  %v8120_v41 = vld [vmem:[%s8555_s2 + $0x8] ss:$16 sps:$4 sm:$0xff]  }
 0x99a   :  { %6643 = vpow2.f32 %v5962_v44  ;;  %v8129_v42 = vld [vmem:[%s8555_s2 + $0x24] ss:$16 sps:$4 sm:$0xff]   ;;  %v8134_v44 = vld [vmem:[%s8555_s2 + $0x2c] ss:$16 sps:$4 sm:$0xff]   ;;  %v8139_v56 = vld [vmem:[%s8555_s2 + $0x20] ss:$16 sps:$4 sm:$0xff]  }
 0x99b   :  { %6645 = vpow2.f32 %v5963_v62  ;;  %v8144_v57 = vld [vmem:[%s8555_s2 + $0x28] ss:$16 sps:$4 sm:$0xff]   ;;  %v8153_v62 = vld [vmem:[%s8555_s2 + $0x44] ss:$16 sps:$4 sm:$0xff]  }
 0x99c   :  { %6647 = vtanh.f32 %v3377_v40  ;;  %v8115_v40 = vld [vmem:[%s8555_s2] ss:$16 sps:$4 sm:$0xff]  }
 0x99d   :  { %6649 = vpow2.f32 %v5964_v63  ;;  %v8158_v63 = vld [vmem:[%s8555_s2 + $0x4c] ss:$16 sps:$4 sm:$0xff]  }
 0x9a4   :  { %v6644_v58 = vpop.eup %6643 }
 0x9a5   :  { %v3387_v59 = vadd.f32 1.0, %v6644_v58  ;;  %v6646_v60 = vpop.eup %6645  ;;  %v8163_v58 = vld [vmem:[%s8555_s2 + $0x40] ss:$16 sps:$4 sm:$0xff]  }
 0x9a6   :  { %v3388_v25 = vadd.f32 1.0, %v6646_v60  ;;  %v6648_v21 = vpop.eup %6647  ;;  %v8177_v60 = vld [vmem:[%s8555_s2 + $0x64] ss:$16 sps:$4 sm:$0xff]  }
 0x9a7   :  { %6651 = vrcp.f32 %v3387_v59  ;;  %v6650_v24 = vpop.eup %6649  ;;  %v8168_v59 = vld [vmem:[%s8555_s2 + $0x48] ss:$16 sps:$4 sm:$0xff]  }
 0x9a8   :  { %6653 = vrcp.f32 %v3388_v25  ;;  %v3389_v31 = vadd.f32 1.0, %v6650_v24  ;;  %v8182_v25 = vld [vmem:[%s8555_s2 + $0x6c] ss:$16 sps:$4 sm:$0xff]   ;;  %v8192_v24 = vld [vmem:[%s8555_s2 + $0x68] ss:$16 sps:$4 sm:$0xff]  }
 0x9aa   :  { %6655 = vrcp.f32 %v3389_v31  ;;  %v8216_v31 = vld [vmem:[%s8555_s2 + $0x88] ss:$16 sps:$4 sm:$0xff]  }
 0x9b1   :  { %v6652_v34 = vpop.eup %6651 }
 0x9b2   :  { %v3399_v52 = vmul.f32 %v6652_v34, %v6648_v21  ;;  %v6654_v26 = vpop.eup %6653  ;;  %v8187_v21 = vld [vmem:[%s8555_s2 + $0x60] ss:$16 sps:$4 sm:$0xff]   ;;  %v8201_v34 = vld [vmem:[%s8555_s2 + $0x84] ss:$16 sps:$4 sm:$0xff]  }
 0x9b3   :  { %v3398_v27 = vmul.f32 %v6654_v26, %v8006_v47  ;;  %v8211_v26 = vld [vmem:[%s8555_s2 + $0x80] ss:$16 sps:$4 sm:$0xff]  }
 0x9b4   :  { %v6656_v8 = vpop.eup %6655 }
 0x9b5   :  { %v8051_v29 = vadd.f32 %v3399_v52, %v3398_v27  ;;  %v8206_v52 = vld [vmem:[%s8555_s2 + $0x8c] ss:$16 sps:$4 sm:$0xff]   ;;  %v8225_v27 = vld [vmem:[%s8555_s2 + $0xa4] ss:$16 sps:$4 sm:$0xff]  }
 0x9b7   :  { %6657 = vtanh.f32 %v8051_v29 }
 0x9c1   :  { %v6658_v23 = vpop.eup %6657 }
 0x9c2   :  { %v3402_v16 = vmul.f32 %v6658_v23, %v6656_v8  ;;  %v8235_v8 = vld [vmem:[%s8555_s2 + $0xa0] ss:$16 sps:$4 sm:$0xff]   ;;  %v8240_v23 = vld [vmem:[%s8555_s2 + $0xa8] ss:$16 sps:$4 sm:$0xff]  }
 0x9c4   :  { %v3403_v14 = vpack.c.bf16 %v3402_v16, %v3402_v16  ;;  %v8249_v16 = vld [vmem:[%s8555_s2 + $0xc4] ss:$16 sps:$4 sm:$0xff]  }
 0x9c6   :  { %5965 = vst [vmem:[%s8557_s4 + $0x20] sm:$0xf] %v3403_v14  ;;  %3405 = vst [vmem:[#allocation3] sm:$0xf] %v3403_v14  ;;  %v8254_v14 = vld [vmem:[%s8555_s2 + $0xcc] ss:$16 sps:$4 sm:$0xff]  }
 0x9cd   :  { %v3412_v17 = vld [vmem:[#allocation3] sm:$0xf] }
 0x9ce   :  { %3638 = vmatmul.mubr.bf16.vlgmr.msra.gmra.mrb[68].mxu0 %v3412_v17  ;;  %3679 = vmatmul.mubr.bf16.vlgmr.msra.gmra.mrb[68].mxu1 %v3412_v17  ;;  %v8259_v17 = vld [vmem:[%s8555_s2 + $0xc0] ss:$16 sps:$4 sm:$0xff]  }
 0x9cf   :  { %3919 = vmatpush1.bf16.msra.mxu0 %v7775_v43  ;;  %3960 = vmatpush1.bf16.msra.mxu1 %v7780_v61 }
 0x9d0   :  { %3920 = vmatprep.subr.bf16.mxu0 %v7789_v7  ;;  %3961 = vmatprep.subr.bf16.mxu1 %v7794_v0  ;;  %v8631_v7 = vld [vmem:[#allocation26_spill] sm:$0xff] }
 0x9d1   :  { %3950 = vmatprep.mubr.bf16.mxu0 %v8609_v6  ;;  %3991 = vmatprep.mubr.bf16.mxu1 %v8609_v6 }
 0x9d3   :  { %3921 = vmatpush1.bf16.msra.mxu0 %v7799_v9  ;;  %3962 = vmatpush1.bf16.msra.mxu1 %v7804_v11  ;;  %v8632_v9 = vld [vmem:[#allocation27_spill] sm:$0xff] }
 0x9d4   :  { %3922 = vmatprep.subr.bf16.mxu0 %v7813_v32  ;;  %3963 = vmatprep.subr.bf16.mxu1 %v7818_v33 }
 0x9d7   :  { %3923 = vmatpush1.bf16.msra.mxu0 %v7823_v13  ;;  %3964 = vmatpush1.bf16.msra.mxu1 %v7828_v15  ;;  %v8633_v13 = vld [vmem:[#allocation28_spill] sm:$0xff] }
 0x9d8   :  { %3924 = vmatprep.subr.bf16.mxu0 %v7837_v3  ;;  %3965 = vmatprep.subr.bf16.mxu1 %v7842_v4  ;;  %v8634_v3 = vld [vmem:[#allocation29_spill] sm:$0xff] }
 0x9db   :  { %3925 = vmatpush1.bf16.msra.mxu0 %v7847_v5  ;;  %3966 = vmatpush1.bf16.msra.mxu1 %v7852_v28 }
 0x9dc   :  { %3926 = vmatprep.subr.bf16.mxu0 %v7861_v45  ;;  %3967 = vmatprep.subr.bf16.mxu1 %v7866_v46 }
 0x9df   :  { %3927 = vmatpush1.bf16.msra.mxu0 %v7871_v48  ;;  %3968 = vmatpush1.bf16.msra.mxu1 %v7876_v49 }
 0x9e0   :  { %3928 = vmatprep.subr.bf16.mxu0 %v7885_v2  ;;  %3969 = vmatprep.subr.bf16.mxu1 %v7890_v50 }
 0x9e3   :  { %3929 = vmatpush1.bf16.msra.mxu0 %v7895_v51  ;;  %3970 = vmatpush1.bf16.msra.mxu1 %v7900_v30 }
 0x9e4   :  { %3930 = vmatprep.subr.bf16.mxu0 %v7909_v53  ;;  %3971 = vmatprep.subr.bf16.mxu1 %v7914_v54 }
 0x9e7   :  { %3931 = vmatpush1.bf16.msra.mxu0 %v7919_v55  ;;  %3972 = vmatpush1.bf16.msra.mxu1 %v7924_v10 }
 0x9e8   :  { %3932 = vmatprep.subr.bf16.mxu0 %v7931_v19  ;;  %3973 = vmatprep.subr.bf16.mxu1 %v7948_v20 }
 0x9eb   :  { %3933 = vmatpush1.bf16.msra.mxu0 %v7938_v22  ;;  %3974 = vmatpush1.bf16.msra.mxu1 %v7943_v18 }
 0x9ec   :  { %4231 = vmatprep.subr.bf16.mxu0 %v8105_v38  ;;  %4272 = vmatprep.subr.bf16.mxu1 %v8110_v39 }
 0xaa1   :  { %v3639_v43 = vpop.f32.mrb[68].mxu0  ;;  %v3680_v61 = vpop.f32.mrb[68].mxu1 }
 0xaa2   :  { %v3687_v0 = vadd.f32 %v3639_v43, %v8631_v7  ;;  %v3689_v11 = vadd.f32 %v3680_v61, %v8632_v9  ;;  %v3641_v32 = vpop.f32.mrb[69].mxu0  ;;  %v3682_v33 = vpop.f32.mrb[69].mxu1  ;;  %v8264_v43 = vld [vmem:[%s8555_s2 + $0xc8] ss:$16 sps:$4 sm:$0xff]   ;;  %v8271_v61 = vld [vmem:[%s8555_s2 + $0xe4] ss:$16 sps:$4 sm:$0xff]  }
 0xaa3   :  { %v3688_v15 = vadd.f32 %v3641_v32, %v8633_v13  ;;  %v3690_v4 = vadd.f32 %v3682_v33, %v8634_v3  ;;  %v3643_v5 = vpop.f32.mrb[70].mxu0  ;;  %v3684_v28 = vpop.f32.mrb[70].mxu1  ;;  %v8278_v7 = vld [vmem:[%s8555_s2 + $0xe0] ss:$16 sps:$4 sm:$0xff]   ;;  %v8288_v9 = vld [vmem:[%s8555_s2 + $0xec] ss:$16 sps:$4 sm:$0xff]  }
 0xaa4   :  { %v5998_v45 = vmul.f32 -1.442695, %v3687_v0  ;;  %v3644_v46 = vpop.f32.mrb[71].mxu0  ;;  %v3685_v48 = vpop.f32.mrb[71].mxu1  ;;  %v6000_v2 = vmul.f32 -1.442695, %v3689_v11 }
 0xaa5   :  { %v5999_v49 = vmul.f32 -1.442695, %v3688_v15  ;;  %v8283_v0 = vld [vmem:[%s8555_s2 + $0xe8] ss:$16 sps:$4 sm:$0xff]   ;;  %v8635_v33 = vld [vmem:[#allocation30_spill] sm:$0xff]  ;;  %v8637_v28 = vld [vmem:[#allocation32_spill] sm:$0xff] }
 0xaa6   :  { %6659 = vpow2.f32 %v5998_v45  ;;  %v8636_v15 = vld [vmem:[#allocation31_spill] sm:$0xff]  ;;  %v8638_v46 = vld [vmem:[#allocation33_spill] sm:$0xff] }
 0xaa7   :  { %6661 = vpow2.f32 %v5999_v49 }
 0xaa8   :  { %6663 = vtanh.f32 %v3690_v4 }
 0xaa9   :  { %6665 = vpow2.f32 %v6000_v2 }
 0xab0   :  { %v6660_v50 = vpop.eup %6659 }
 0xab1   :  { %v3700_v51 = vadd.f32 1.0, %v6660_v50  ;;  %v6662_v30 = vpop.eup %6661 }
 0xab2   :  { %v3701_v53 = vadd.f32 1.0, %v6662_v30  ;;  %v6664_v54 = vpop.eup %6663 }
 0xab3   :  { %6667 = vrcp.f32 %v3700_v51  ;;  %v6666_v55 = vpop.eup %6665 }
 0xab4   :  { %6669 = vrcp.f32 %v3701_v53  ;;  %v3702_v18 = vadd.f32 1.0, %v6666_v55 }
 0xab6   :  { %6671 = vrcp.f32 %v3702_v18 }
 0xabd   :  { %v6668_v10 = vpop.eup %6667 }
 0xabe   :  { %v3712_v19 = vmul.f32 %v6668_v10, %v6664_v54  ;;  %v6670_v22 = vpop.eup %6669 }
 0xabf   :  { %v3711_v20 = vmul.f32 %v6670_v22, %v8051_v29  ;;  %v8230_v29 = vld [vmem:[%s8555_s2 + $0xac] ss:$16 sps:$4 sm:$0xff]  }
 0xac0   :  { %v6672_v12 = vpop.eup %6671 }
 0xac1   :  { %v8094_v47 = vadd.f32 %v3712_v19, %v3711_v20 }
 0xac3   :  { %6673 = vtanh.f32 %v8094_v47 }
 0xacd   :  { %v6674_v1 = vpop.eup %6673 }
 0xace   :  { %v3715_v35 = vmul.f32 %v6674_v1, %v6672_v12 }
 0xad0   :  { %v3716_v36 = vpack.c.bf16 %v3715_v35, %v3715_v35 }
 0xad2   :  { %6001 = vst [vmem:[%s8557_s4 + $0x24] sm:$0xf] %v3716_v36  ;;  %3718 = vst [vmem:[#allocation3] sm:$0xf] %v3716_v36 }
 0xad9   :  { %v3725_v37 = vld [vmem:[#allocation3] sm:$0xf] }
 0xada   :  { %3951 = vmatmul.mubr.bf16.vlgmr.msra.gmra.mrb[72].mxu0 %v3725_v37  ;;  %3992 = vmatmul.mubr.bf16.vlgmr.msra.gmra.mrb[72].mxu1 %v3725_v37 }
 0xadb   :  { %4263 = vmatprep.mubr.bf16.mxu0 %v8609_v6  ;;  %4304 = vmatprep.mubr.bf16.mxu1 %v8609_v6 }
 0xadc   :  { %4232 = vmatpush1.bf16.msra.mxu0 %v8115_v40  ;;  %4273 = vmatpush1.bf16.msra.mxu1 %v8120_v41 }
 0xadd   :  { %4233 = vmatprep.subr.bf16.mxu0 %v8129_v42  ;;  %4274 = vmatprep.subr.bf16.mxu1 %v8134_v44 }
 0xae0   :  { %4234 = vmatpush1.bf16.msra.mxu0 %v8139_v56  ;;  %4275 = vmatpush1.bf16.msra.mxu1 %v8144_v57 }
 0xae1   :  { %4235 = vmatprep.subr.bf16.mxu0 %v8153_v62  ;;  %4276 = vmatprep.subr.bf16.mxu1 %v8158_v63 }
 0xae4   :  { %4236 = vmatpush1.bf16.msra.mxu0 %v8163_v58  ;;  %4277 = vmatpush1.bf16.msra.mxu1 %v8168_v59 }
 0xae5   :  { %4237 = vmatprep.subr.bf16.mxu0 %v8177_v60  ;;  %4278 = vmatprep.subr.bf16.mxu1 %v8182_v25 }
 0xae8   :  { %4238 = vmatpush1.bf16.msra.mxu0 %v8187_v21  ;;  %4279 = vmatpush1.bf16.msra.mxu1 %v8192_v24 }
 0xae9   :  { %4239 = vmatprep.subr.bf16.mxu0 %v8201_v34  ;;  %4280 = vmatprep.subr.bf16.mxu1 %v8206_v52 }
 0xaec   :  { %4240 = vmatpush1.bf16.msra.mxu0 %v8211_v26  ;;  %4281 = vmatpush1.bf16.msra.mxu1 %v8216_v31 }
 0xaed   :  { %4241 = vmatprep.subr.bf16.mxu0 %v8225_v27  ;;  %4282 = vmatprep.subr.bf16.mxu1 %v8230_v29 }
 0xaf0   :  { %4242 = vmatpush1.bf16.msra.mxu0 %v8235_v8  ;;  %4283 = vmatpush1.bf16.msra.mxu1 %v8240_v23 }
 0xaf1   :  { %4243 = vmatprep.subr.bf16.mxu0 %v8249_v16  ;;  %4284 = vmatprep.subr.bf16.mxu1 %v8254_v14 }
 0xaf4   :  { %4244 = vmatpush1.bf16.msra.mxu0 %v8259_v17  ;;  %4285 = vmatpush1.bf16.msra.mxu1 %v8264_v43 }
 0xaf5   :  { %4245 = vmatprep.subr.bf16.mxu0 %v8271_v61  ;;  %4286 = vmatprep.subr.bf16.mxu1 %v8288_v9 }
 0xaf8   :  { %4246 = vmatpush1.bf16.msra.mxu0 %v8278_v7  ;;  %4287 = vmatpush1.bf16.msra.mxu1 %v8283_v0 }
 0xaf9   :  { %4544 = vmatprep.subr.bf16.mxu0 %v8105_v38  ;;  %4585 = vmatprep.subr.bf16.mxu1 %v8110_v39 }
 0xbad   :  { %v3952_v11 = vpop.f32.mrb[72].mxu0  ;;  %v3993_v32 = vpop.f32.mrb[72].mxu1 }
 0xbae   :  { %v4000_v13 = vadd.f32 %v3952_v11, %v8635_v33  ;;  %v4002_v3 = vadd.f32 %v3993_v32, %v8636_v15  ;;  %v3954_v4 = vpop.f32.mrb[73].mxu0  ;;  %v3995_v5 = vpop.f32.mrb[73].mxu1 }
 0xbaf   :  { %v4001_v45 = vadd.f32 %v3954_v4, %v8637_v28  ;;  %v4003_v48 = vadd.f32 %v3995_v5, %v8638_v46  ;;  %v3956_v49 = vpop.f32.mrb[74].mxu0  ;;  %v3997_v2 = vpop.f32.mrb[74].mxu1  ;;  %v8639_v5 = vld [vmem:[#allocation34_spill] sm:$0xff] }
 0xbb0   :  { %v6034_v50 = vmul.f32 -1.442695, %v4000_v13  ;;  %v3957_v51 = vpop.f32.mrb[75].mxu0  ;;  %v3998_v30 = vpop.f32.mrb[75].mxu1  ;;  %v6036_v54 = vmul.f32 -1.442695, %v4002_v3 }
 0xbb1   :  { %v6035_v53 = vmul.f32 -1.442695, %v4001_v45  ;;  %v8640_v45 = vld [vmem:[#allocation35_spill] sm:$0xff]  ;;  %v8641_v2 = vld [vmem:[#allocation36_spill] sm:$0xff]  ;;  %v8642_v51 = vld [vmem:[#allocation37_spill] sm:$0xff] }
 0xbb2   :  { %6675 = vpow2.f32 %v6034_v50 }
 0xbb3   :  { %6677 = vpow2.f32 %v6035_v53 }
 0xbb4   :  { %6679 = vtanh.f32 %v4003_v48 }
 0xbb5   :  { %6681 = vpow2.f32 %v6036_v54 }
 0xbbc   :  { %v6676_v55 = vpop.eup %6675 }
 0xbbd   :  { %v4013_v10 = vadd.f32 1.0, %v6676_v55  ;;  %v6678_v19 = vpop.eup %6677 }
 0xbbe   :  { %v4014_v22 = vadd.f32 1.0, %v6678_v19  ;;  %v6680_v18 = vpop.eup %6679 }
 0xbbf   :  { %6683 = vrcp.f32 %v4013_v10  ;;  %v6682_v20 = vpop.eup %6681 }
 0xbc0   :  { %6685 = vrcp.f32 %v4014_v22  ;;  %v4015_v36 = vadd.f32 1.0, %v6682_v20 }
 0xbc2   :  { %6687 = vrcp.f32 %v4015_v36 }
 0xbc9   :  { %v6684_v12 = vpop.eup %6683 }
 0xbca   :  { %v4025_v1 = vmul.f32 %v6684_v12, %v6680_v18  ;;  %v6686_v35 = vpop.eup %6685 }
 0xbcb   :  { %v4024_v37 = vmul.f32 %v6686_v35, %v8094_v47 }
 0xbcc   :  { %v6688_v32 = vpop.eup %6687 }
 0xbcd   :  { %v8301_v11 = vadd.f32 %v4025_v1, %v4024_v37 }
 0xbcf   :  { %6689 = vtanh.f32 %v8301_v11 }
 0xbd9   :  { %v6690_v33 = vpop.eup %6689 }
 0xbda   :  { %v4028_v13 = vmul.f32 %v6690_v33, %v6688_v32 }
 0xbdc   :  { %v4029_v15 = vpack.c.bf16 %v4028_v13, %v4028_v13 }
 0xbde   :  { %6037 = vst [vmem:[%s8557_s4 + $0x28] sm:$0xf] %v4029_v15  ;;  %4031 = vst [vmem:[#allocation3] sm:$0xf] %v4029_v15 }
 0xbe5   :  { %v4038_v3 = vld [vmem:[#allocation3] sm:$0xf] }
 0xbe6   :  { %4264 = vmatmul.mubr.bf16.vlgmr.msra.gmra.mrb[76].mxu0 %v4038_v3  ;;  %4305 = vmatmul.mubr.bf16.vlgmr.msra.gmra.mrb[76].mxu1 %v4038_v3 }
 0xbe7   :  { %4545 = vmatpush1.bf16.msra.mxu0 %v8115_v40  ;;  %4586 = vmatpush1.bf16.msra.mxu1 %v8120_v41 }
 0xbe8   :  { %4546 = vmatprep.subr.bf16.mxu0 %v8129_v42  ;;  %4587 = vmatprep.subr.bf16.mxu1 %v8134_v44 }
 0xbe9   :  { %4576 = vmatprep.mubr.bf16.mxu0 %v8609_v6  ;;  %4617 = vmatprep.mubr.bf16.mxu1 %v8609_v6 }
 0xbeb   :  { %4547 = vmatpush1.bf16.msra.mxu0 %v8139_v56  ;;  %4588 = vmatpush1.bf16.msra.mxu1 %v8144_v57 }
 0xbec   :  { %4548 = vmatprep.subr.bf16.mxu0 %v8153_v62  ;;  %4589 = vmatprep.subr.bf16.mxu1 %v8158_v63 }
 0xbef   :  { %4549 = vmatpush1.bf16.msra.mxu0 %v8163_v58  ;;  %4590 = vmatpush1.bf16.msra.mxu1 %v8168_v59 }
 0xbf0   :  { %4550 = vmatprep.subr.bf16.mxu0 %v8177_v60  ;;  %4591 = vmatprep.subr.bf16.mxu1 %v8182_v25 }
 0xbf3   :  { %4551 = vmatpush1.bf16.msra.mxu0 %v8187_v21  ;;  %4592 = vmatpush1.bf16.msra.mxu1 %v8192_v24 }
 0xbf4   :  { %4552 = vmatprep.subr.bf16.mxu0 %v8201_v34  ;;  %4593 = vmatprep.subr.bf16.mxu1 %v8206_v52 }
 0xbf7   :  { %4553 = vmatpush1.bf16.msra.mxu0 %v8211_v26  ;;  %4594 = vmatpush1.bf16.msra.mxu1 %v8216_v31 }
 0xbf8   :  { %4554 = vmatprep.subr.bf16.mxu0 %v8225_v27  ;;  %4595 = vmatprep.subr.bf16.mxu1 %v8230_v29 }
 0xbfb   :  { %4555 = vmatpush1.bf16.msra.mxu0 %v8235_v8  ;;  %4596 = vmatpush1.bf16.msra.mxu1 %v8240_v23 }
 0xbfc   :  { %4556 = vmatprep.subr.bf16.mxu0 %v8249_v16  ;;  %4597 = vmatprep.subr.bf16.mxu1 %v8254_v14 }
 0xbff   :  { %4557 = vmatpush1.bf16.msra.mxu0 %v8259_v17  ;;  %4598 = vmatpush1.bf16.msra.mxu1 %v8264_v43 }
 0xc00   :  { %4558 = vmatprep.subr.bf16.mxu0 %v8271_v61  ;;  %4599 = vmatprep.subr.bf16.mxu1 %v8288_v9 }
 0xc03   :  { %4559 = vmatpush1.bf16.msra.mxu0 %v8278_v7  ;;  %4600 = vmatpush1.bf16.msra.mxu1 %v8283_v0 }
 0xc04   :  { %4857 = vmatprep.subr.bf16.mxu0 %v8105_v38  ;;  %4898 = vmatprep.subr.bf16.mxu1 %v8110_v39 }
 0xcb9   :  { %v4265_v47 = vpop.f32.mrb[76].mxu0  ;;  %v4306_v4 = vpop.f32.mrb[76].mxu1 }
 0xcba   :  { %v4313_v28 = vadd.f32 %v4265_v47, %v8639_v5  ;;  %v4315_v46 = vadd.f32 %v4306_v4, %v8640_v45  ;;  %v4267_v48 = vpop.f32.mrb[77].mxu0  ;;  %v4308_v49 = vpop.f32.mrb[77].mxu1 }
 0xcbb   :  { %v4314_v50 = vadd.f32 %v4267_v48, %v8641_v2  ;;  %v4316_v30 = vadd.f32 %v4308_v49, %v8642_v51  ;;  %v4269_v53 = vpop.f32.mrb[78].mxu0  ;;  %v4310_v54 = vpop.f32.mrb[78].mxu1  ;;  %v8643_v49 = vld [vmem:[#allocation38_spill] sm:$0xff] }
 0xcbc   :  { %v6070_v55 = vmul.f32 -1.442695, %v4313_v28  ;;  %v4270_v10 = vpop.f32.mrb[79].mxu0  ;;  %v4311_v19 = vpop.f32.mrb[79].mxu1  ;;  %v6072_v18 = vmul.f32 -1.442695, %v4315_v46 }
 0xcbd   :  { %v6071_v22 = vmul.f32 -1.442695, %v4314_v50  ;;  %v8644_v50 = vld [vmem:[#allocation39_spill] sm:$0xff]  ;;  %v8645_v54 = vld [vmem:[#allocation40_spill] sm:$0xff]  ;;  %v8646_v10 = vld [vmem:[#allocation41_spill] sm:$0xff] }
 0xcbe   :  { %6691 = vpow2.f32 %v6070_v55 }
 0xcbf   :  { %6693 = vpow2.f32 %v6071_v22 }
 0xcc0   :  { %6695 = vtanh.f32 %v4316_v30 }
 0xcc1   :  { %6697 = vpow2.f32 %v6072_v18 }
 0xcc8   :  { %v6692_v20 = vpop.eup %6691 }
 0xcc9   :  { %v4326_v12 = vadd.f32 1.0, %v6692_v20  ;;  %v6694_v1 = vpop.eup %6693 }
 0xcca   :  { %v4327_v35 = vadd.f32 1.0, %v6694_v1  ;;  %v6696_v36 = vpop.eup %6695 }
 0xccb   :  { %6699 = vrcp.f32 %v4326_v12  ;;  %v6698_v37 = vpop.eup %6697 }
 0xccc   :  { %6701 = vrcp.f32 %v4327_v35  ;;  %v4328_v15 = vadd.f32 1.0, %v6698_v37 }
 0xcce   :  { %6703 = vrcp.f32 %v4328_v15 }
 0xcd5   :  { %v6700_v32 = vpop.eup %6699 }
 0xcd6   :  { %v4338_v33 = vmul.f32 %v6700_v32, %v6696_v36  ;;  %v6702_v13 = vpop.eup %6701 }
 0xcd7   :  { %v4337_v3 = vmul.f32 %v6702_v13, %v8301_v11 }
 0xcd8   :  { %v6704_v4 = vpop.eup %6703 }
 0xcd9   :  { %v8346_v47 = vadd.f32 %v4338_v33, %v4337_v3 }
 0xcdb   :  { %6705 = vtanh.f32 %v8346_v47 }
 0xce5   :  { %v6706_v5 = vpop.eup %6705 }
 0xce6   :  { %v4341_v28 = vmul.f32 %v6706_v5, %v6704_v4 }
 0xce8   :  { %v4342_v45 = vpack.c.bf16 %v4341_v28, %v4341_v28 }
 0xcea   :  { %6073 = vst [vmem:[%s8557_s4 + $0x2c] sm:$0xf] %v4342_v45  ;;  %4344 = vst [vmem:[#allocation3] sm:$0xf] %v4342_v45 }
 0xcf1   :  { %v4351_v46 = vld [vmem:[#allocation3] sm:$0xf] }
 0xcf2   :  { %4577 = vmatmul.mubr.bf16.vlgmr.msra.gmra.mrb[80].mxu0 %v4351_v46  ;;  %4618 = vmatmul.mubr.bf16.vlgmr.msra.gmra.mrb[80].mxu1 %v4351_v46 }
 0xcf3   :  { %4858 = vmatpush1.bf16.msra.mxu0 %v8115_v40  ;;  %4899 = vmatpush1.bf16.msra.mxu1 %v8120_v41 }
 0xcf4   :  { %4859 = vmatprep.subr.bf16.mxu0 %v8129_v42  ;;  %4900 = vmatprep.subr.bf16.mxu1 %v8134_v44 }
 0xcf5   :  { %4889 = vmatprep.mubr.bf16.mxu0 %v8609_v6  ;;  %4930 = vmatprep.mubr.bf16.mxu1 %v8609_v6 }
 0xcf7   :  { %4860 = vmatpush1.bf16.msra.mxu0 %v8139_v56  ;;  %4901 = vmatpush1.bf16.msra.mxu1 %v8144_v57 }
 0xcf8   :  { %4861 = vmatprep.subr.bf16.mxu0 %v8153_v62  ;;  %4902 = vmatprep.subr.bf16.mxu1 %v8158_v63 }
 0xcfb   :  { %4862 = vmatpush1.bf16.msra.mxu0 %v8163_v58  ;;  %4903 = vmatpush1.bf16.msra.mxu1 %v8168_v59 }
 0xcfc   :  { %4863 = vmatprep.subr.bf16.mxu0 %v8177_v60  ;;  %4904 = vmatprep.subr.bf16.mxu1 %v8182_v25 }
 0xcff   :  { %4864 = vmatpush1.bf16.msra.mxu0 %v8187_v21  ;;  %4905 = vmatpush1.bf16.msra.mxu1 %v8192_v24 }
 0xd00   :  { %4865 = vmatprep.subr.bf16.mxu0 %v8201_v34  ;;  %4906 = vmatprep.subr.bf16.mxu1 %v8206_v52 }
 0xd03   :  { %4866 = vmatpush1.bf16.msra.mxu0 %v8211_v26  ;;  %4907 = vmatpush1.bf16.msra.mxu1 %v8216_v31 }
 0xd04   :  { %4867 = vmatprep.subr.bf16.mxu0 %v8225_v27  ;;  %4908 = vmatprep.subr.bf16.mxu1 %v8230_v29 }
 0xd07   :  { %4868 = vmatpush1.bf16.msra.mxu0 %v8235_v8  ;;  %4909 = vmatpush1.bf16.msra.mxu1 %v8240_v23 }
 0xd08   :  { %4869 = vmatprep.subr.bf16.mxu0 %v8249_v16  ;;  %4910 = vmatprep.subr.bf16.mxu1 %v8254_v14 }
 0xd0b   :  { %4870 = vmatpush1.bf16.msra.mxu0 %v8259_v17  ;;  %4911 = vmatpush1.bf16.msra.mxu1 %v8264_v43 }
 0xd0c   :  { %4871 = vmatprep.subr.bf16.mxu0 %v8271_v61  ;;  %4912 = vmatprep.subr.bf16.mxu1 %v8288_v9 }
 0xd0f   :  { %4872 = vmatpush1.bf16.msra.mxu0 %v8278_v7  ;;  %4913 = vmatpush1.bf16.msra.mxu1 %v8283_v0 }
 0xd10   :  { %5170 = vmatprep.subr.bf16.mxu0 %v8105_v38  ;;  %5211 = vmatprep.subr.bf16.mxu1 %v8110_v39 }
 0xdc5   :  { %v4578_v11 = vpop.f32.mrb[80].mxu0  ;;  %v4619_v48 = vpop.f32.mrb[80].mxu1 }
 0xdc6   :  { %v4626_v2 = vadd.f32 %v4578_v11, %v8643_v49  ;;  %v4628_v51 = vadd.f32 %v4619_v48, %v8644_v50  ;;  %v4580_v30 = vpop.f32.mrb[81].mxu0  ;;  %v4621_v53 = vpop.f32.mrb[81].mxu1 }
 0xdc7   :  { %v4627_v55 = vadd.f32 %v4580_v30, %v8645_v54  ;;  %v4629_v19 = vadd.f32 %v4621_v53, %v8646_v10  ;;  %v4582_v22 = vpop.f32.mrb[82].mxu0  ;;  %v4623_v18 = vpop.f32.mrb[82].mxu1  ;;  %v6472_v10 = vld [vmem:[%s8555_s2 + $0xc] ss:$16 sps:$4 sm:$0xff]  }
 0xdc8   :  { %v6106_v20 = vmul.f32 -1.442695, %v4626_v2  ;;  %v4583_v12 = vpop.f32.mrb[83].mxu0  ;;  %v4624_v1 = vpop.f32.mrb[83].mxu1  ;;  %v6108_v39 = vmul.f32 -1.442695, %v4628_v51 }
 0xdc9   :  { %v6107_v38 = vmul.f32 -1.442695, %v4627_v55  ;;  %v6469_v55 = vld [vmem:[%s8555_s2 + $0x4] ss:$16 sps:$4 sm:$0xff]   ;;  %v6470_v22 = vld [vmem:[%s8555_s2 + $0x8] ss:$16 sps:$4 sm:$0xff]  }
 0xdca   :  { %6707 = vpow2.f32 %v6106_v20  ;;  %v6478_v18 = vld [vmem:[%s8555_s2 + $0x2c] ss:$16 sps:$4 sm:$0xff]   ;;  %v6473_v20 = vld [vmem:[%s8555_s2 + $0x20] ss:$16 sps:$4 sm:$0xff]   ;;  %v6476_v12 = vld [vmem:[%s8555_s2 + $0x28] ss:$16 sps:$4 sm:$0xff]  }
 0xdcb   :  { %6709 = vpow2.f32 %v6107_v38  ;;  %v6481_v1 = vld [vmem:[%s8555_s2 + $0x44] ss:$16 sps:$4 sm:$0xff]   ;;  %v6484_v38 = vld [vmem:[%s8555_s2 + $0x4c] ss:$16 sps:$4 sm:$0xff]  }
 0xdcc   :  { %6711 = vtanh.f32 %v4629_v19  ;;  %v6467_v19 = vld [vmem:[%s8555_s2] ss:$16 sps:$4 sm:$0xff]  }
 0xdcd   :  { %6713 = vpow2.f32 %v6108_v39  ;;  %v6479_v39 = vld [vmem:[%s8555_s2 + $0x40] ss:$16 sps:$4 sm:$0xff]  }
 0xdd4   :  { %v6708_v35 = vpop.eup %6707 }
 0xdd5   :  { %v4639_v36 = vadd.f32 1.0, %v6708_v35  ;;  %v6710_v37 = vpop.eup %6709  ;;  %v6482_v35 = vld [vmem:[%s8555_s2 + $0x48] ss:$16 sps:$4 sm:$0xff]  }
 0xdd6   :  { %v4640_v32 = vadd.f32 1.0, %v6710_v37  ;;  %v6712_v33 = vpop.eup %6711  ;;  %v6490_v37 = vld [vmem:[%s8555_s2 + $0x6c] ss:$16 sps:$4 sm:$0xff]  }
 0xdd7   :  { %6715 = vrcp.f32 %v4639_v36  ;;  %v6714_v13 = vpop.eup %6713  ;;  %v6487_v36 = vld [vmem:[%s8555_s2 + $0x64] ss:$16 sps:$4 sm:$0xff]  }
 0xdd8   :  { %6717 = vrcp.f32 %v4640_v32  ;;  %v4641_v5 = vadd.f32 1.0, %v6714_v13  ;;  %v6485_v32 = vld [vmem:[%s8555_s2 + $0x60] ss:$16 sps:$4 sm:$0xff]   ;;  %v6493_v13 = vld [vmem:[%s8555_s2 + $0x84] ss:$16 sps:$4 sm:$0xff]  }
 0xdda   :  { %6719 = vrcp.f32 %v4641_v5  ;;  %v6499_v5 = vld [vmem:[%s8555_s2 + $0xa4] ss:$16 sps:$4 sm:$0xff]  }
 0xde1   :  { %v6716_v15 = vpop.eup %6715 }
 0xde2   :  { %v4651_v3 = vmul.f32 %v6716_v15, %v6712_v33  ;;  %v6718_v4 = vpop.eup %6717  ;;  %v6488_v33 = vld [vmem:[%s8555_s2 + $0x68] ss:$16 sps:$4 sm:$0xff]   ;;  %v6496_v15 = vld [vmem:[%s8555_s2 + $0x8c] ss:$16 sps:$4 sm:$0xff]  }
 0xde3   :  { %v4650_v28 = vmul.f32 %v6718_v4, %v8346_v47  ;;  %v6494_v4 = vld [vmem:[%s8555_s2 + $0x88] ss:$16 sps:$4 sm:$0xff]  }
 0xde4   :  { %v6720_v46 = vpop.eup %6719 }
 0xde5   :  { %v8391_v45 = vadd.f32 %v4651_v3, %v4650_v28  ;;  %v6491_v3 = vld [vmem:[%s8555_s2 + $0x80] ss:$16 sps:$4 sm:$0xff]   ;;  %v6502_v28 = vld [vmem:[%s8555_s2 + $0xac] ss:$16 sps:$4 sm:$0xff]  }
 0xde7   :  { %6721 = vtanh.f32 %v8391_v45 }
 0xdf1   :  { %v6722_v11 = vpop.eup %6721 }
 0xdf2   :  { %v4654_v48 = vmul.f32 %v6722_v11, %v6720_v46  ;;  %v6500_v46 = vld [vmem:[%s8555_s2 + $0xa8] ss:$16 sps:$4 sm:$0xff]   ;;  %v6505_v11 = vld [vmem:[%s8555_s2 + $0xc4] ss:$16 sps:$4 sm:$0xff]  }
 0xdf4   :  { %v4655_v49 = vpack.c.bf16 %v4654_v48, %v4654_v48  ;;  %v6508_v48 = vld [vmem:[%s8555_s2 + $0xcc] ss:$16 sps:$4 sm:$0xff]  }
 0xdf6   :  { %6109 = vst [vmem:[%s8557_s4 + $0x30] sm:$0xf] %v4655_v49  ;;  %4657 = vst [vmem:[#allocation3] sm:$0xf] %v4655_v49  ;;  %v6503_v49 = vld [vmem:[%s8555_s2 + $0xc0] ss:$16 sps:$4 sm:$0xff]  }
 0xdfd   :  { %v4664_v2 = vld [vmem:[#allocation3] sm:$0xf] }
 0xdfe   :  { %4890 = vmatmul.mubr.bf16.vlgmr.msra.gmra.mrb[84].mxu0 %v4664_v2  ;;  %4931 = vmatmul.mubr.bf16.vlgmr.msra.gmra.mrb[84].mxu1 %v4664_v2  ;;  %v6506_v2 = vld [vmem:[%s8555_s2 + $0xc8] ss:$16 sps:$4 sm:$0xff]  }
 0xdff   :  { %5171 = vmatpush1.bf16.msra.mxu0 %v8115_v40  ;;  %5212 = vmatpush1.bf16.msra.mxu1 %v8120_v41 }
 0xe00   :  { %5172 = vmatprep.subr.bf16.mxu0 %v8129_v42  ;;  %5213 = vmatprep.subr.bf16.mxu1 %v8134_v44  ;;  %v8647_v42 = vld [vmem:[#allocation42_spill] sm:$0xff] }
 0xe01   :  { %5202 = vmatprep.mubr.bf16.mxu0 %v8609_v6  ;;  %5243 = vmatprep.mubr.bf16.mxu1 %v8609_v6 }
 0xe03   :  { %5173 = vmatpush1.bf16.msra.mxu0 %v8139_v56  ;;  %5214 = vmatpush1.bf16.msra.mxu1 %v8144_v57  ;;  %v8648_v56 = vld [vmem:[#allocation43_spill] sm:$0xff] }
 0xe04   :  { %5174 = vmatprep.subr.bf16.mxu0 %v8153_v62  ;;  %5215 = vmatprep.subr.bf16.mxu1 %v8158_v63 }
 0xe07   :  { %5175 = vmatpush1.bf16.msra.mxu0 %v8163_v58  ;;  %5216 = vmatpush1.bf16.msra.mxu1 %v8168_v59  ;;  %v8649_v58 = vld [vmem:[#allocation44_spill] sm:$0xff] }
 0xe08   :  { %5176 = vmatprep.subr.bf16.mxu0 %v8177_v60  ;;  %5217 = vmatprep.subr.bf16.mxu1 %v8182_v25  ;;  %v8650_v60 = vld [vmem:[#allocation45_spill] sm:$0xff] }
 0xe0b   :  { %5177 = vmatpush1.bf16.msra.mxu0 %v8187_v21  ;;  %5218 = vmatpush1.bf16.msra.mxu1 %v8192_v24 }
 0xe0c   :  { %5178 = vmatprep.subr.bf16.mxu0 %v8201_v34  ;;  %5219 = vmatprep.subr.bf16.mxu1 %v8206_v52 }
 0xe0f   :  { %5179 = vmatpush1.bf16.msra.mxu0 %v8211_v26  ;;  %5220 = vmatpush1.bf16.msra.mxu1 %v8216_v31 }
 0xe10   :  { %5180 = vmatprep.subr.bf16.mxu0 %v8225_v27  ;;  %5221 = vmatprep.subr.bf16.mxu1 %v8230_v29 }
 0xe13   :  { %5181 = vmatpush1.bf16.msra.mxu0 %v8235_v8  ;;  %5222 = vmatpush1.bf16.msra.mxu1 %v8240_v23 }
 0xe14   :  { %5182 = vmatprep.subr.bf16.mxu0 %v8249_v16  ;;  %5223 = vmatprep.subr.bf16.mxu1 %v8254_v14 }
 0xe17   :  { %5183 = vmatpush1.bf16.msra.mxu0 %v8259_v17  ;;  %5224 = vmatpush1.bf16.msra.mxu1 %v8264_v43 }
 0xe18   :  { %5184 = vmatprep.subr.bf16.mxu0 %v8271_v61  ;;  %5225 = vmatprep.subr.bf16.mxu1 %v8288_v9 }
 0xe1b   :  { %5185 = vmatpush1.bf16.msra.mxu0 %v8278_v7  ;;  %5226 = vmatpush1.bf16.msra.mxu1 %v8283_v0 }
 0xe1c   :  { %5483 = vmatprep.subr.bf16.mxu0 %v6469_v55  ;;  %5524 = vmatprep.subr.bf16.mxu1 %v6472_v10 }
 0xed1   :  { %v4891_v40 = vpop.f32.mrb[84].mxu0  ;;  %v4932_v41 = vpop.f32.mrb[84].mxu1 }
 0xed2   :  { %v4939_v44 = vadd.f32 %v4891_v40, %v8647_v42  ;;  %v4941_v57 = vadd.f32 %v4932_v41, %v8648_v56  ;;  %v4893_v62 = vpop.f32.mrb[85].mxu0  ;;  %v4934_v63 = vpop.f32.mrb[85].mxu1  ;;  %v6511_v40 = vld [vmem:[%s8555_s2 + $0xe4] ss:$16 sps:$4 sm:$0xff]   ;;  %v6509_v41 = vld [vmem:[%s8555_s2 + $0xe0] ss:$16 sps:$4 sm:$0xff]  }
 0xed3   :  { %v4940_v59 = vadd.f32 %v4893_v62, %v8649_v58  ;;  %v4942_v25 = vadd.f32 %v4934_v63, %v8650_v60  ;;  %v4895_v21 = vpop.f32.mrb[86].mxu0  ;;  %v4936_v24 = vpop.f32.mrb[86].mxu1  ;;  %v6512_v42 = vld [vmem:[%s8555_s2 + $0xe8] ss:$16 sps:$4 sm:$0xff]   ;;  %v8651_v62 = vld [vmem:[#allocation46_spill] sm:$0xff] }
 0xed4   :  { %v6142_v34 = vmul.f32 -1.442695, %v4939_v44  ;;  %v4896_v52 = vpop.f32.mrb[87].mxu0  ;;  %v4937_v26 = vpop.f32.mrb[87].mxu1  ;;  %v6144_v27 = vmul.f32 -1.442695, %v4941_v57 }
 0xed5   :  { %v6143_v31 = vmul.f32 -1.442695, %v4940_v59  ;;  %v6514_v44 = vld [vmem:[%s8555_s2 + $0xec] ss:$16 sps:$4 sm:$0xff]   ;;  %v8652_v58 = vld [vmem:[#allocation47_spill] sm:$0xff] }
 0xed6   :  { %6723 = vpow2.f32 %v6142_v34  ;;  %v8653_v21 = vld [vmem:[#allocation48_spill] sm:$0xff]  ;;  %v8654_v34 = vld [vmem:[#allocation49_spill] sm:$0xff] }
 0xed7   :  { %6725 = vpow2.f32 %v6143_v31 }
 0xed8   :  { %6727 = vtanh.f32 %v4942_v25 }
 0xed9   :  { %6729 = vpow2.f32 %v6144_v27 }
 0xee0   :  { %v6724_v29 = vpop.eup %6723 }
 0xee1   :  { %v4952_v8 = vadd.f32 1.0, %v6724_v29  ;;  %v6726_v23 = vpop.eup %6725 }
 0xee2   :  { %v4953_v16 = vadd.f32 1.0, %v6726_v23  ;;  %v6728_v14 = vpop.eup %6727 }
 0xee3   :  { %6731 = vrcp.f32 %v4952_v8  ;;  %v6730_v17 = vpop.eup %6729 }
 0xee4   :  { %6733 = vrcp.f32 %v4953_v16  ;;  %v4954_v0 = vadd.f32 1.0, %v6730_v17 }
 0xee6   :  { %6735 = vrcp.f32 %v4954_v0 }
 0xeed   :  { %v6732_v43 = vpop.eup %6731 }
 0xeee   :  { %v4964_v61 = vmul.f32 %v6732_v43, %v6728_v14  ;;  %v6734_v7 = vpop.eup %6733 }
 0xeef   :  { %v4963_v9 = vmul.f32 %v6734_v7, %v8391_v45  ;;  %v6497_v45 = vld [vmem:[%s8555_s2 + $0xa0] ss:$16 sps:$4 sm:$0xff]  }
 0xef0   :  { %v6736_v50 = vpop.eup %6735 }
 0xef1   :  { %v8434_v47 = vadd.f32 %v4964_v61, %v4963_v9 }
 0xef3   :  { %6737 = vtanh.f32 %v8434_v47 }
 0xefd   :  { %v6738_v51 = vpop.eup %6737 }
 0xefe   :  { %v4967_v30 = vmul.f32 %v6738_v51, %v6736_v50 }
 0xf00   :  { %v4968_v53 = vpack.c.bf16 %v4967_v30, %v4967_v30 }
 0xf02   :  { %6145 = vst [vmem:[%s8557_s4 + $0x34] sm:$0xf] %v4968_v53  ;;  %4970 = vst [vmem:[#allocation3] sm:$0xf] %v4968_v53 }
 0xf09   :  { %v4977_v54 = vld [vmem:[#allocation3] sm:$0xf] }
 0xf0a   :  { %5203 = vmatmul.mubr.bf16.vlgmr.msra.gmra.mrb[88].mxu0 %v4977_v54  ;;  %5244 = vmatmul.mubr.bf16.vlgmr.msra.gmra.mrb[88].mxu1 %v4977_v54 }
 0xf0b   :  { %5515 = vmatprep.mubr.bf16.mxu0 %v8609_v6  ;;  %5556 = vmatprep.mubr.bf16.mxu1 %v8609_v6  ;;  %v6475_v6 = vld [vmem:[%s8555_s2 + $0x24] ss:$16 sps:$4 sm:$0xff]  }
 0xf0c   :  { %5484 = vmatpush1.bf16.msra.mxu0 %v6467_v19  ;;  %5525 = vmatpush1.bf16.msra.mxu1 %v6470_v22 }
 0xf0d   :  { %5485 = vmatprep.subr.bf16.mxu0 %v6475_v6  ;;  %5526 = vmatprep.subr.bf16.mxu1 %v6478_v18 }
 0xf10   :  { %5486 = vmatpush1.bf16.msra.mxu0 %v6473_v20  ;;  %5527 = vmatpush1.bf16.msra.mxu1 %v6476_v12  ;;  %v8655_v12 = vld [vmem:[#allocation50_spill] sm:$0xff] }
 0xf11   :  { %5487 = vmatprep.subr.bf16.mxu0 %v6481_v1  ;;  %5528 = vmatprep.subr.bf16.mxu1 %v6484_v38 }
 0xf14   :  { %5488 = vmatpush1.bf16.msra.mxu0 %v6479_v39  ;;  %5529 = vmatpush1.bf16.msra.mxu1 %v6482_v35 }
 0xf15   :  { %5489 = vmatprep.subr.bf16.mxu0 %v6487_v36  ;;  %5530 = vmatprep.subr.bf16.mxu1 %v6490_v37  ;;  %v8657_v36 = vld [vmem:[#allocation52_spill] sm:$0xff] }
 0xf18   :  { %5490 = vmatpush1.bf16.msra.mxu0 %v6485_v32  ;;  %5531 = vmatpush1.bf16.msra.mxu1 %v6488_v33  ;;  %v8658_v32 = vld [vmem:[#allocation53_spill] sm:$0xff] }
 0xf19   :  { %5491 = vmatprep.subr.bf16.mxu0 %v6493_v13  ;;  %5532 = vmatprep.subr.bf16.mxu1 %v6496_v15 }
 0xf1c   :  { %5492 = vmatpush1.bf16.msra.mxu0 %v6491_v3  ;;  %5533 = vmatpush1.bf16.msra.mxu1 %v6494_v4 }
 0xf1d   :  { %5493 = vmatprep.subr.bf16.mxu0 %v6499_v5  ;;  %5534 = vmatprep.subr.bf16.mxu1 %v6502_v28 }
 0xf20   :  { %5494 = vmatpush1.bf16.msra.mxu0 %v6497_v45  ;;  %5535 = vmatpush1.bf16.msra.mxu1 %v6500_v46 }
 0xf21   :  { %5495 = vmatprep.subr.bf16.mxu0 %v6505_v11  ;;  %5536 = vmatprep.subr.bf16.mxu1 %v6508_v48 }
 0xf24   :  { %5496 = vmatpush1.bf16.msra.mxu0 %v6503_v49  ;;  %5537 = vmatpush1.bf16.msra.mxu1 %v6506_v2 }
 0xf25   :  { %5497 = vmatprep.subr.bf16.mxu0 %v6511_v40  ;;  %5538 = vmatprep.subr.bf16.mxu1 %v6514_v44 }
 0xf28   :  { %5498 = vmatpush1.bf16.msra.mxu0 %v6509_v41  ;;  %5539 = vmatpush1.bf16.msra.mxu1 %v6512_v42 }
 0xfdd   :  { %v5204_v56 = vpop.f32.mrb[88].mxu0  ;;  %v5245_v57 = vpop.f32.mrb[88].mxu1 }
 0xfde   :  { %v5252_v63 = vadd.f32 %v5204_v56, %v8651_v62  ;;  %v5254_v59 = vadd.f32 %v5245_v57, %v8652_v58  ;;  %v5206_v60 = vpop.f32.mrb[89].mxu0  ;;  %v5247_v25 = vpop.f32.mrb[89].mxu1 }
 0xfdf   :  { %v5253_v24 = vadd.f32 %v5206_v60, %v8653_v21  ;;  %v5255_v52 = vadd.f32 %v5247_v25, %v8654_v34  ;;  %v5208_v26 = vpop.f32.mrb[90].mxu0  ;;  %v5249_v31 = vpop.f32.mrb[90].mxu1 }
 0xfe0   :  { %v6178_v27 = vmul.f32 -1.442695, %v5252_v63  ;;  %v5209_v29 = vpop.f32.mrb[91].mxu0  ;;  %v5250_v8 = vpop.f32.mrb[91].mxu1  ;;  %v6180_v16 = vmul.f32 -1.442695, %v5254_v59 }
 0xfe1   :  { %v6179_v23 = vmul.f32 -1.442695, %v5253_v24 }
 0xfe2   :  { %6739 = vpow2.f32 %v6178_v27 }
 0xfe3   :  { %6741 = vpow2.f32 %v6179_v23 }
 0xfe4   :  { %6743 = vtanh.f32 %v5255_v52 }
 0xfe5   :  { %6745 = vpow2.f32 %v6180_v16 }
 0xfec   :  { %v6740_v14 = vpop.eup %6739 }
 0xfed   :  { %v5265_v17 = vadd.f32 1.0, %v6740_v14  ;;  %v6742_v43 = vpop.eup %6741 }
 0xfee   :  { %v5266_v61 = vadd.f32 1.0, %v6742_v43  ;;  %v6744_v7 = vpop.eup %6743 }
 0xfef   :  { %6747 = vrcp.f32 %v5265_v17  ;;  %v6746_v0 = vpop.eup %6745 }
 0xff0   :  { %6749 = vrcp.f32 %v5266_v61  ;;  %v5267_v30 = vadd.f32 1.0, %v6746_v0 }
 0xff2   :  { %6751 = vrcp.f32 %v5267_v30 }
 0xff9   :  { %v6748_v9 = vpop.eup %6747 }
 0xffa   :  { %v5277_v50 = vmul.f32 %v6748_v9, %v6744_v7  ;;  %v6750_v51 = vpop.eup %6749 }
 0xffb   :  { %v5276_v53 = vmul.f32 %v6750_v51, %v8434_v47  ;;  %v8656_v47 = vld [vmem:[#allocation51_spill] sm:$0xff] }
 0xffc   :  { %v6752_v55 = vpop.eup %6751 }
 0xffd   :  { %v5278_v54 = vadd.f32 %v5277_v50, %v5276_v53 }
 0xfff   :  { %6753 = vtanh.f32 %v5278_v54 }
0x1009   :  { %v6754_v10 = vpop.eup %6753 }
0x100a   :  { %v5280_v19 = vmul.f32 %v6754_v10, %v6752_v55 }
0x100c   :  { %v5281_v22 = vpack.c.bf16 %v5280_v19, %v5280_v19 }
0x100e   :  { %6181 = vst [vmem:[%s8557_s4 + $0x38] sm:$0xf] %v5281_v22  ;;  %5283 = vst [vmem:[#allocation3] sm:$0xf] %v5281_v22 }
0x1015   :  { %v5290_v6 = vld [vmem:[#allocation3] sm:$0xf] }
0x1016   :  { %5516 = vmatmul.mubr.bf16.vlgmr.msra.gmra.mrb[92].mxu0 %v5290_v6  ;;  %5557 = vmatmul.mubr.bf16.vlgmr.msra.gmra.mrb[92].mxu1 %v5290_v6 }
0x10e9   :  { %v5517_v18 = vpop.f32.mrb[92].mxu0  ;;  %v5558_v20 = vpop.f32.mrb[92].mxu1 }
0x10ea   :  { %v5565_v1 = vadd.f32 %v5517_v18, %v8655_v12  ;;  %v5567_v38 = vadd.f32 %v5558_v20, %v8656_v47  ;;  %v5519_v39 = vpop.f32.mrb[93].mxu0  ;;  %v5560_v35 = vpop.f32.mrb[93].mxu1 }
0x10eb   :  { %v5566_v37 = vadd.f32 %v5519_v39, %v8657_v36  ;;  %v5568_v33 = vadd.f32 %v5560_v35, %v8658_v32  ;;  %v5521_v13 = vpop.f32.mrb[94].mxu0  ;;  %v5562_v15 = vpop.f32.mrb[94].mxu1 }
0x10ec   :  { %v6214_v3 = vmul.f32 -1.442695, %v5565_v1  ;;  %v5522_v4 = vpop.f32.mrb[95].mxu0  ;;  %v5563_v5 = vpop.f32.mrb[95].mxu1  ;;  %v6216_v45 = vmul.f32 -1.442695, %v5567_v38 }
0x10ed   :  { %v6215_v28 = vmul.f32 -1.442695, %v5566_v37 }
0x10ee   :  { %6755 = vpow2.f32 %v6214_v3 }
0x10ef   :  { %6757 = vpow2.f32 %v6215_v28 }
0x10f0   :  { %6759 = vtanh.f32 %v5568_v33 }
0x10f1   :  { %6761 = vpow2.f32 %v6216_v45 }
0x10f8   :  { %v6756_v46 = vpop.eup %6755 }
0x10f9   :  { %v5578_v11 = vadd.f32 1.0, %v6756_v46  ;;  %v6758_v48 = vpop.eup %6757 }
0x10fa   :  { %v5579_v49 = vadd.f32 1.0, %v6758_v48  ;;  %v6760_v2 = vpop.eup %6759 }
0x10fb   :  { %6763 = vrcp.f32 %v5578_v11  ;;  %v6762_v40 = vpop.eup %6761 }
0x10fc   :  { %6765 = vrcp.f32 %v5579_v49  ;;  %v5580_v56 = vadd.f32 1.0, %v6762_v40 }
0x10fe   :  { %6767 = vrcp.f32 %v5580_v56 }
0x1105   :  { %v6764_v41 = vpop.eup %6763 }
0x1106   :  { %v5590_v42 = vmul.f32 %v6764_v41, %v6760_v2  ;;  %v6766_v44 = vpop.eup %6765 }
0x1107   :  { %v5589_v57 = vmul.f32 %v6766_v44, %v5278_v54 }
0x1108   :  { %v6768_v63 = vpop.eup %6767 }
0x1109   :  { %v5591_v62 = vadd.f32 %v5590_v42, %v5589_v57 }
0x110b   :  { %6769 = vtanh.f32 %v5591_v62 }
0x1115   :  { %v6770_v58 = vpop.eup %6769 }
0x1116   :  { %v5593_v59 = vmul.f32 %v6770_v58, %v6768_v63 }
0x1118   :  { %v5594_v60 = vpack.c.bf16 %v5593_v59, %v5593_v59 }
0x111a   :  { %5596 = vst [vmem:[#allocation3] sm:$0xf] %v5594_v60  ;;  %6217 = vst [vmem:[%s8557_s4 + $0x3c] sm:$0xf] %v5594_v60 }

</bundles_post_ra>
